<compile_context>
chip_gen: v7x
topology: tpu7x:2x2x1
jax: 0.10.0
libtpu: 0.0.40
codegen_flags: <defaults>
</compile_context>

<pallas_src>
import jax
import jax.numpy as jnp
from jax.experimental import pallas as pl
from jax.experimental.pallas import tpu as pltpu

LRELU_SLOPE = 0.2
BN_EPS = 1e-5
TM_TARGET = 512                 # M-tile; 2*(TM*K + TM*128)*bytes stays << 32 MiB
VMEM_LIMIT = 32 * 1024 * 1024   # safe on v5e/v6e (128 MiB) and v7x (64 MiB)


# ---------------- Pallas kernels ----------------

def _conv_lrelu_kernel(p_ref, w_ref, o_ref):
    # conv-as-matmul (bf16 operands, f32 accumulate) + LeakyReLU(0.2)
    y = jnp.dot(p_ref[...], w_ref[...], preferred_element_type=jnp.float32)
    o_ref[...] = jnp.where(y > 0, y, LRELU_SLOPE * y).astype(o_ref.dtype)


def _conv_sigmoid_kernel(p_ref, w_ref, o_ref):
    # final conv-as-matmul + Sigmoid (f32 math)
    y = jnp.dot(p_ref[...], w_ref[...], preferred_element_type=jnp.float32)
    o_ref[...] = jax.nn.sigmoid(y).astype(o_ref.dtype)


def _conv_stats_kernel(p_ref, w_ref, y_ref, st_ref):
    # BN pass 1: matmul tile + per-tile partial sum / sum-of-squares per channel.
    # Stats come from the f32 accumulator; the stored tile is bf16.
    y = jnp.dot(p_ref[...], w_ref[...], preferred_element_type=jnp.float32)
    y_ref[...] = y.astype(y_ref.dtype)
    s = jnp.sum(y, axis=0, keepdims=True)        # (1, Cp)
    sq = jnp.sum(y * y, axis=0, keepdims=True)   # (1, Cp)
    row = jax.lax.broadcasted_iota(jnp.int32, (8, y.shape[1]), 0)
    st = jnp.where(row == 0, s, jnp.where(row == 1, sq, 0.0))
    st_ref[...] = st[None]                       # (1, 8, Cp): row0=sum, row1=sumsq


def _bn_lrelu_kernel(y_ref, sc_ref, sh_ref, o_ref):
    # BN pass 2: y*scale + shift (per-channel, precomputed) + LeakyReLU(0.2)
    y = y_ref[...] * sc_ref[...] + sh_ref[...]   # bf16 * f32 -> f32
    o_ref[...] = jnp.where(y > 0, y, LRELU_SLOPE * y).astype(o_ref.dtype)


# ---------------- helpers / glue ----------------

def _round_up(x, m):
    return (x + m - 1) // m * m


def _compiler_params():
    return pltpu.CompilerParams(
        dimension_semantics=("parallel",),
        vmem_limit_bytes=VMEM_LIMIT,
    )


def _im2col(x_nhwc, kh, kw, stride, pad):
    x = jnp.pad(x_nhwc, ((0, 0), (pad, pad), (pad, pad), (0, 0)))
    n, h, w, c = x.shape
    ho = (h - kh) // stride + 1
    wo = (w - kw) // stride + 1
    cols = []
    for i in range(kh):
        for j in range(kw):
            cols.append(x[:, i:i + ho * stride:stride, j:j + wo * stride:stride, :])
    p = jnp.stack(cols, axis=3)                   # [N, Ho, Wo, KH*KW, C]
    return p.reshape(n * ho * wo, kh * kw * c), (n, ho, wo)


def _fold_weight(w_oihw, kp, cp):
    # [Cout, Cin, KH, KW] -> [KH*KW*Cin, Cout] (matches im2col ordering),
    # zero-padded to (kp, cp), bf16 for the MXU.
    co, ci, kh, kw = w_oihw.shape
    w = jnp.transpose(w_oihw, (2, 3, 1, 0)).reshape(kh * kw * ci, co)
    w = jnp.pad(w, ((0, kp - kh * kw * ci), (0, cp - co)))
    return w.astype(jnp.bfloat16)


def _prep(p, w_oihw):
    # Pad patch matrix / weight so K and Cout are lane-dense (mult of 128) and
    # M is a multiple of the tile; zero row/col padding is exact (contributes 0).
    co, ci, kh, kw = w_oihw.shape
    k = kh * kw * ci
    m = p.shape[0]
    kp = _round_up(k, 128)
    cp = _round_up(co, 128)
    tm = min(TM_TARGET, _round_up(m, 8))
    mp = _round_up(m, tm)
    pp = jnp.pad(p.astype(jnp.bfloat16), ((0, mp - m), (0, kp - k)))
    wp = _fold_weight(w_oihw, kp, cp)
    return pp, wp, tm, mp, kp, cp, m, co


def _conv_act(p, w_oihw, kernel, out_dtype, transcendental=False):
    # Fused conv(+activation) tiled over M.
    pp, wp, tm, mp, kp, cp, m, co = _prep(p, w_oihw)
    nt = mp // tm
    y = pl.pallas_call(
        kernel,
        out_shape=jax.ShapeDtypeStruct((mp, cp), out_dtype),
        grid=(nt,),
        in_specs=[pl.BlockSpec((tm, kp), lambda i: (i, 0)),
                  pl.BlockSpec((kp, cp), lambda i: (0, 0))],
        out_specs=pl.BlockSpec((tm, cp), lambda i: (i, 0)),
        compiler_params=_compiler_params(),
        cost_estimate=pl.CostEstimate(
            flops=2 * mp * kp * cp,
            transcendentals=(mp * cp if transcendental else 0),
            bytes_accessed=pp.size * 2 + wp.size * 2
                           + mp * cp * jnp.dtype(out_dtype).itemsize),
    )(pp, wp)
    return y[:m, :co]


def _conv_bn_lrelu(p, w_oihw, gamma, beta):
    # Conv + BatchNorm2d (training-mode biased batch stats) + LeakyReLU(0.2),
    # implemented as two tiled passes so M can be pipelined.
    pp, wp, tm, mp, kp, cp, m, co = _prep(p, w_oihw)
    nt = mp // tm

    # pass 1: matmul tiles (bf16 out) + per-tile partial stats (f32)
    y, stats = pl.pallas_call(
        _conv_stats_kernel,
        out_shape=(jax.ShapeDtypeStruct((mp, cp), jnp.bfloat16),
                   jax.ShapeDtypeStruct((nt, 8, cp), jnp.float32)),
        grid=(nt,),
        in_specs=[pl.BlockSpec((tm, kp), lambda i: (i, 0)),
                  pl.BlockSpec((kp, cp), lambda i: (0, 0))],
        out_specs=(pl.BlockSpec((tm, cp), lambda i: (i, 0)),
                   pl.BlockSpec((1, 8, cp), lambda i: (i, 0, 0))),
        compiler_params=_compiler_params(),
        cost_estimate=pl.CostEstimate(
            flops=2 * mp * kp * cp, transcendentals=0,
            bytes_accessed=pp.size * 2 + wp.size * 2 + mp * cp * 2
                           + nt * 8 * cp * 4),
    )(pp, wp)

    # tiny per-channel reduce in plain JAX (padded rows are zero -> exact)
    s = jnp.sum(stats[:, 0, :], axis=0)
    sq = jnp.sum(stats[:, 1, :], axis=0)
    mean = s / m
    var = sq / m - mean * mean            # biased variance (torch BN training fwd)
    gp = jnp.pad(gamma, (0, cp - co))
    bp = jnp.pad(beta, (0, cp - co))
    inv_std = jax.lax.rsqrt(var + BN_EPS)
    scale = (gp * inv_std).reshape(1, cp).astype(jnp.float32)
    shift = (bp - mean * gp * inv_std).reshape(1, cp).astype(jnp.float32)

    # pass 2: normalize + affine + LeakyReLU, tiled over M, bf16 out
    out = pl.pallas_call(
        _bn_lrelu_kernel,
        out_shape=jax.ShapeDtypeStruct((mp, cp), jnp.bfloat16),
        grid=(nt,),
        in_specs=[pl.BlockSpec((tm, cp), lambda i: (i, 0)),
                  pl.BlockSpec((1, cp), lambda i: (0, 0)),
                  pl.BlockSpec((1, cp), lambda i: (0, 0))],
        out_specs=pl.BlockSpec((tm, cp), lambda i: (i, 0)),
        compiler_params=_compiler_params(),
        cost_estimate=pl.CostEstimate(
            flops=4 * mp * cp, transcendentals=0,
            bytes_accessed=mp * cp * 2 + 2 * cp * 4 + mp * cp * 2),
    )(y, scale, shift)
    return out[:m, :co]


def init_params(key, num_channels, num_features):
    nc, nf = num_channels, num_features
    shapes = [
        (nf, nc, 4, 4),
        (nf * 2, nf, 4, 4),
        (nf * 4, nf * 2, 4, 4),
        (nf * 8, nf * 4, 4, 4),
        (1, nf * 8, 4, 4),
    ]
    keys = jax.random.split(key, len(shapes))
    # DCGAN-style init N(0, 0.02); BN gamma=1, beta=0 (torch defaults).
    ws = [0.02 * jax.random.normal(k, s, jnp.float32) for k, s in zip(keys, shapes)]
    bn = [(jnp.ones((c,), jnp.float32), jnp.zeros((c,), jnp.float32))
          for c in (nf * 2, nf * 4, nf * 8)]
    return ws, bn


def discriminator_forward(x_nchw, ws, bn):
    # NCHW -> NHWC, bf16 GEMM operands (f32 accumulate inside kernels).
    x = jnp.transpose(x_nchw, (0, 2, 3, 1)).astype(jnp.bfloat16)

    # layer 1: Conv(4, s=2, p=1, no bias) + LeakyReLU(0.2)
    p, (n, ho, wo) = _im2col(x, 4, 4, 2, 1)
    y = _conv_act(p, ws[0], _conv_lrelu_kernel, jnp.bfloat16)
    x = y.reshape(n, ho, wo, ws[0].shape[0])

    # layers 2-4: Conv(4, s=2, p=1) + BatchNorm2d (batch stats) + LeakyReLU(0.2)
    for li in range(1, 4):
        p, (n, ho, wo) = _im2col(x, 4, 4, 2, 1)
        g, b = bn[li - 1]
        y = _conv_bn_lrelu(p, ws[li], g, b)
        x = y.reshape(n, ho, wo, ws[li].shape[0])

    # layer 5: Conv(4, s=1, p=0) + Sigmoid
    p, (n, ho, wo) = _im2col(x, 4, 4, 1, 0)
    y = _conv_act(p, ws[4], _conv_sigmoid_kernel, jnp.float32, transcendental=True)
    return y.reshape(n, ho, wo, 1).transpose(0, 3, 1, 2)   # [N, 1, 1, 1]


# ---------------- pure-JAX reference (correctness check only) ----------------

def _reference_forward(x_nchw, ws, bn):
    x = jnp.transpose(x_nchw, (0, 2, 3, 1)).astype(jnp.float32)   # NHWC

    def conv(v, w, stride, pad):
        return jax.lax.conv_general_dilated(
            v, jnp.transpose(w, (2, 3, 1, 0)),
            window_strides=(stride, stride),
            padding=((pad, pad), (pad, pad)),
            dimension_numbers=("NHWC", "HWIO", "NHWC"))

    def lrelu(v):
        return jnp.where(v > 0, v, LRELU_SLOPE * v)

    y = lrelu(conv(x, ws[0], 2, 1))
    for li in range(1, 4):
        y = conv(y, ws[li], 2, 1)
        mean = jnp.mean(y, axis=(0, 1, 2))
        var = jnp.mean((y - mean) ** 2, axis=(0, 1, 2))
        g, b = bn[li - 1]
        y = lrelu((y - mean) * jax.lax.rsqrt(var + BN_EPS) * g + b)
    y = jax.nn.sigmoid(conv(y, ws[4], 1, 0))
    return jnp.transpose(y, (0, 3, 1, 2))


if __name__ == "__main__":
    num_channels = 3
    num_features = 8          # small nf; spatial must be 64 for the 4x4/s1/p0 head
    key = jax.random.PRNGKey(0)
    k_in, k_par = jax.random.split(key)

    x = jax.random.normal(k_in, (2, num_channels, 64, 64), jnp.float32)  # NCHW
    ws, bn = init_params(k_par, num_channels, num_features)

    fwd = jax.jit(discriminator_forward)
    out = jax.block_until_ready(fwd(x, ws, bn))

    assert out.shape == (2, 1, 1, 1), out.shape
    assert bool(jnp.all((out >= 0.0) & (out <= 1.0)))  # sigmoid range sanity check

    ref = jax.block_until_ready(jax.jit(_reference_forward)(x, ws, bn))
    max_err = float(jnp.max(jnp.abs(out.astype(jnp.float32) - ref)))
    assert max_err < 5e-2, ("max abs err vs f32 reference", max_err)

    print("KERNEL_OK")
</pallas_src>

<mosaic_0001>
module attributes {stable_mosaic.version = 11 : i64} {
  func.func @_conv_lrelu_kernel(%arg0: i32, %arg1: memref<512x128xbf16, #tpu.memory_space<vmem>>, %arg2: memref<128x128xbf16, #tpu.memory_space<vmem>>, %arg3: memref<512x128xbf16, #tpu.memory_space<vmem>>) attributes {dimension_semantics = [#tpu.dimension_semantics<parallel>], iteration_bounds = array<i64: 4>, scalar_prefetch = 0 : i64, scratch_operands = 0 : i64, tpu.core_type = #tpu.core_type<tc>, window_params = [{transform_indices = @transform_0, window_bounds = array<i64: 512, 128>}, {pipeline_mode = #tpu.pipeline_mode<synchronous>, transform_indices = @transform_1, window_bounds = array<i64: 128, 128>}, {transform_indices = @transform_2, window_bounds = array<i64: 512, 128>}]} {
    %c0 = arith.constant 0 : index
    %c0_0 = arith.constant 0 : index
    %0 = vector.load %arg1[%c0, %c0_0] : memref<512x128xbf16, #tpu.memory_space<vmem>>, vector<512x128xbf16>
    %c0_1 = arith.constant 0 : index
    %c0_2 = arith.constant 0 : index
    %1 = vector.load %arg2[%c0_1, %c0_2] : memref<128x128xbf16, #tpu.memory_space<vmem>>, vector<128x128xbf16>
    %cst = arith.constant dense<0.000000e+00> : vector<512x128xf32>
    %2 = tpu.matmul %0, %1, %cst {dimension_numbers = #tpu.dot_dimension_numbers<[1], [0], [0], [1], [0, 0, 1, 1], [], []>} : vector<512x128xbf16>, vector<128x128xbf16>, vector<512x128xf32> -> vector<512x128xf32>
    %cst_3 = arith.constant 0.000000e+00 : f32
    %3 = vector.broadcast %cst_3 : f32 to vector<512x128xf32>
    %4 = arith.cmpf ogt, %2, %3 : vector<512x128xf32>
    %cst_4 = arith.constant 2.000000e-01 : f32
    %5 = vector.broadcast %cst_4 : f32 to vector<512x128xf32>
    %6 = arith.mulf %5, %2 : vector<512x128xf32>
    %7 = arith.select %4, %2, %6 : vector<512x128xi1>, vector<512x128xf32>
    %8 = arith.truncf %7 : vector<512x128xf32> to vector<512x128xbf16>
    %c0_5 = arith.constant 0 : index
    %c0_6 = arith.constant 0 : index
    %9 = vector.load %arg3[%c0_5, %c0_6] : memref<512x128xbf16, #tpu.memory_space<vmem>>, vector<512x128xbf16>
    tpu.vector_store %arg3[%c0_5, %c0_6], %8 {strides = array<i32>} : memref<512x128xbf16, #tpu.memory_space<vmem>>, vector<512x128xbf16>,
    return
  }
  func.func @transform_0(%arg0: i32) -> (i32, i32) {
    %c0_i32 = arith.constant 0 : i32
    %c0_i32_0 = arith.constant 0 : i32
    return %arg0, %c0_i32 : i32, i32
  }
  func.func @transform_1(%arg0: i32) -> (i32, i32) {
    %c0_i32 = arith.constant 0 : i32
    %c0_i32_0 = arith.constant 0 : i32
    %c0_i32_1 = arith.constant 0 : i32
    return %c0_i32, %c0_i32_0 : i32, i32
  }
  func.func @transform_2(%arg0: i32) -> (i32, i32) {
    %c0_i32 = arith.constant 0 : i32
    %c0_i32_0 = arith.constant 0 : i32
    return %arg0, %c0_i32 : i32, i32
  }
}

module attributes {stable_mosaic.version = 11 : i64} {
  func.func @_conv_stats_kernel(%arg0: i32, %arg1: memref<512x128xbf16, #tpu.memory_space<vmem>>, %arg2: memref<128x128xbf16, #tpu.memory_space<vmem>>, %arg3: memref<512x128xbf16, #tpu.memory_space<vmem>>, %arg4: memref<1x8x128xf32, #tpu.memory_space<vmem>>) attributes {dimension_semantics = [#tpu.dimension_semantics<parallel>], iteration_bounds = array<i64: 1>, scalar_prefetch = 0 : i64, scratch_operands = 0 : i64, tpu.core_type = #tpu.core_type<tc>, window_params = [{transform_indices = @transform_0, window_bounds = array<i64: 512, 128>}, {pipeline_mode = #tpu.pipeline_mode<synchronous>, transform_indices = @transform_1, window_bounds = array<i64: 128, 128>}, {transform_indices = @transform_2, window_bounds = array<i64: 512, 128>}, {transform_indices = @transform_3, window_bounds = array<i64: 1, 8, 128>}]} {
    %c0 = arith.constant 0 : index
    %c0_0 = arith.constant 0 : index
    %0 = vector.load %arg1[%c0, %c0_0] : memref<512x128xbf16, #tpu.memory_space<vmem>>, vector<512x128xbf16>
    %c0_1 = arith.constant 0 : index
    %c0_2 = arith.constant 0 : index
    %1 = vector.load %arg2[%c0_1, %c0_2] : memref<128x128xbf16, #tpu.memory_space<vmem>>, vector<128x128xbf16>
    %cst = arith.constant dense<0.000000e+00> : vector<512x128xf32>
    %2 = tpu.matmul %0, %1, %cst {dimension_numbers = #tpu.dot_dimension_numbers<[1], [0], [0], [1], [0, 0, 1, 1], [], []>} : vector<512x128xbf16>, vector<128x128xbf16>, vector<512x128xf32> -> vector<512x128xf32>
    %3 = arith.truncf %2 : vector<512x128xf32> to vector<512x128xbf16>
    %c0_3 = arith.constant 0 : index
    %c0_4 = arith.constant 0 : index
    %4 = vector.load %arg3[%c0_3, %c0_4] : memref<512x128xbf16, #tpu.memory_space<vmem>>, vector<512x128xbf16>
    tpu.vector_store %arg3[%c0_3, %c0_4], %3 {strides = array<i32>} : memref<512x128xbf16, #tpu.memory_space<vmem>>, vector<512x128xbf16>,
    %cst_5 = arith.constant dense<0.000000e+00> : vector<128xf32>
    %5 = vector.multi_reduction <add>, %2, %cst_5 [0] : vector<512x128xf32> to vector<128xf32>
    %6 = vector.shape_cast %5 : vector<128xf32> to vector<1x128xf32>
    %7 = arith.mulf %2, %2 : vector<512x128xf32>
    %cst_6 = arith.constant dense<0.000000e+00> : vector<128xf32>
    %8 = vector.multi_reduction <add>, %7, %cst_6 [0] : vector<512x128xf32> to vector<128xf32>
    %9 = vector.shape_cast %8 : vector<128xf32> to vector<1x128xf32>
    %10 = tpu.iota {dimensions = array<i32: 0>} : vector<8x128xi32>
    %c0_i32 = arith.constant 0 : i32
    %11 = vector.broadcast %c0_i32 : i32 to vector<8x128xi32>
    %12 = arith.cmpi eq, %10, %11 : vector<8x128xi32>
    %c1_i32 = arith.constant 1 : i32
    %13 = vector.broadcast %c1_i32 : i32 to vector<8x128xi32>
    %14 = arith.cmpi eq, %10, %13 : vector<8x128xi32>
    %cst_7 = arith.constant 0.000000e+00 : f32
    %15 = vector.shape_cast %9 : vector<1x128xf32> to vector<1x128xf32>
    %16 = vector.broadcast %15 : vector<1x128xf32> to vector<8x128xf32>
    %17 = vector.broadcast %cst_7 : f32 to vector<8x128xf32>
    %18 = arith.select %14, %16, %17 : vector<8x128xi1>, vector<8x128xf32>
    %19 = vector.shape_cast %6 : vector<1x128xf32> to vector<1x128xf32>
    %20 = vector.broadcast %19 : vector<1x128xf32> to vector<8x128xf32>
    %21 = arith.select %12, %20, %18 : vector<8x128xi1>, vector<8x128xf32>
    %22 = vector.shape_cast %21 : vector<8x128xf32> to vector<1x8x128xf32>
    %c0_8 = arith.constant 0 : index
    %c0_9 = arith.constant 0 : index
    %c0_10 = arith.constant 0 : index
    %23 = vector.load %arg4[%c0_8, %c0_9, %c0_10] : memref<1x8x128xf32, #tpu.memory_space<vmem>>, vector<1x8x128xf32>
    tpu.vector_store %arg4[%c0_8, %c0_9, %c0_10], %22 {strides = array<i32>} : memref<1x8x128xf32, #tpu.memory_space<vmem>>, vector<1x8x128xf32>,
    return
  }
  func.func @transform_0(%arg0: i32) -> (i32, i32) {
    %c0_i32 = arith.constant 0 : i32
    %c0_i32_0 = arith.constant 0 : i32
    return %arg0, %c0_i32 : i32, i32
  }
  func.func @transform_1(%arg0: i32) -> (i32, i32) {
    %c0_i32 = arith.constant 0 : i32
    %c0_i32_0 = arith.constant 0 : i32
    %c0_i32_1 = arith.constant 0 : i32
    return %c0_i32, %c0_i32_0 : i32, i32
  }
  func.func @transform_2(%arg0: i32) -> (i32, i32) {
    %c0_i32 = arith.constant 0 : i32
    %c0_i32_0 = arith.constant 0 : i32
    return %arg0, %c0_i32 : i32, i32
  }
  func.func @transform_3(%arg0: i32) -> (i32, i32, i32) {
    %c0_i32 = arith.constant 0 : i32
    %c0_i32_0 = arith.constant 0 : i32
    %c0_i32_1 = arith.constant 0 : i32
    return %arg0, %c0_i32, %c0_i32_0 : i32, i32, i32
  }
}

module attributes {stable_mosaic.version = 11 : i64} {
  func.func @_bn_lrelu_kernel(%arg0: i32, %arg1: memref<512x128xbf16, #tpu.memory_space<vmem>>, %arg2: memref<1x128xf32, #tpu.memory_space<vmem>>, %arg3: memref<1x128xf32, #tpu.memory_space<vmem>>, %arg4: memref<512x128xbf16, #tpu.memory_space<vmem>>) attributes {dimension_semantics = [#tpu.dimension_semantics<parallel>], iteration_bounds = array<i64: 1>, scalar_prefetch = 0 : i64, scratch_operands = 0 : i64, tpu.core_type = #tpu.core_type<tc>, window_params = [{transform_indices = @transform_0, window_bounds = array<i64: 512, 128>}, {pipeline_mode = #tpu.pipeline_mode<synchronous>, transform_indices = @transform_1, window_bounds = array<i64: 1, 128>}, {pipeline_mode = #tpu.pipeline_mode<synchronous>, transform_indices = @transform_2, window_bounds = array<i64: 1, 128>}, {transform_indices = @transform_3, window_bounds = array<i64: 512, 128>}]} {
    %c0 = arith.constant 0 : index
    %c0_0 = arith.constant 0 : index
    %0 = vector.load %arg1[%c0, %c0_0] : memref<512x128xbf16, #tpu.memory_space<vmem>>, vector<512x128xbf16>
    %c0_1 = arith.constant 0 : index
    %c0_2 = arith.constant 0 : index
    %1 = vector.load %arg2[%c0_1, %c0_2] : memref<1x128xf32, #tpu.memory_space<vmem>>, vector<1x128xf32>
    %2 = arith.extf %0 : vector<512x128xbf16> to vector<512x128xf32>
    %3 = vector.broadcast %1 : vector<1x128xf32> to vector<512x128xf32>
    %4 = arith.mulf %2, %3 : vector<512x128xf32>
    %c0_3 = arith.constant 0 : index
    %c0_4 = arith.constant 0 : index
    %5 = vector.load %arg3[%c0_3, %c0_4] : memref<1x128xf32, #tpu.memory_space<vmem>>, vector<1x128xf32>
    %6 = vector.broadcast %5 : vector<1x128xf32> to vector<512x128xf32>
    %7 = arith.addf %4, %6 : vector<512x128xf32>
    %cst = arith.constant 0.000000e+00 : f32
    %8 = vector.broadcast %cst : f32 to vector<512x128xf32>
    %9 = arith.cmpf ogt, %7, %8 : vector<512x128xf32>
    %cst_5 = arith.constant 2.000000e-01 : f32
    %10 = vector.broadcast %cst_5 : f32 to vector<512x128xf32>
    %11 = arith.mulf %10, %7 : vector<512x128xf32>
    %12 = arith.select %9, %7, %11 : vector<512x128xi1>, vector<512x128xf32>
    %13 = arith.truncf %12 : vector<512x128xf32> to vector<512x128xbf16>
    %c0_6 = arith.constant 0 : index
    %c0_7 = arith.constant 0 : index
    %14 = vector.load %arg4[%c0_6, %c0_7] : memref<512x128xbf16, #tpu.memory_space<vmem>>, vector<512x128xbf16>
    tpu.vector_store %arg4[%c0_6, %c0_7], %13 {strides = array<i32>} : memref<512x128xbf16, #tpu.memory_space<vmem>>, vector<512x128xbf16>,
    return
  }
  func.func @transform_0(%arg0: i32) -> (i32, i32) {
    %c0_i32 = arith.constant 0 : i32
    %c0_i32_0 = arith.constant 0 : i32
    return %arg0, %c0_i32 : i32, i32
  }
  func.func @transform_1(%arg0: i32) -> (i32, i32) {
    %c0_i32 = arith.constant 0 : i32
    %c0_i32_0 = arith.constant 0 : i32
    %c0_i32_1 = arith.constant 0 : i32
    return %c0_i32, %c0_i32_0 : i32, i32
  }
  func.func @transform_2(%arg0: i32) -> (i32, i32) {
    %c0_i32 = arith.constant 0 : i32
    %c0_i32_0 = arith.constant 0 : i32
    %c0_i32_1 = arith.constant 0 : i32
    return %c0_i32, %c0_i32_0 : i32, i32
  }
  func.func @transform_3(%arg0: i32) -> (i32, i32) {
    %c0_i32 = arith.constant 0 : i32
    %c0_i32_0 = arith.constant 0 : i32
    return %arg0, %c0_i32 : i32, i32
  }
}

module attributes {stable_mosaic.version = 11 : i64} {
  func.func @_conv_stats_kernel(%arg0: i32, %arg1: memref<128x256xbf16, #tpu.memory_space<vmem>>, %arg2: memref<256x128xbf16, #tpu.memory_space<vmem>>, %arg3: memref<128x128xbf16, #tpu.memory_space<vmem>>, %arg4: memref<1x8x128xf32, #tpu.memory_space<vmem>>) attributes {dimension_semantics = [#tpu.dimension_semantics<parallel>], iteration_bounds = array<i64: 1>, scalar_prefetch = 0 : i64, scratch_operands = 0 : i64, tpu.core_type = #tpu.core_type<tc>, window_params = [{transform_indices = @transform_0, window_bounds = array<i64: 128, 256>}, {pipeline_mode = #tpu.pipeline_mode<synchronous>, transform_indices = @transform_1, window_bounds = array<i64: 256, 128>}, {transform_indices = @transform_2, window_bounds = array<i64: 128, 128>}, {transform_indices = @transform_3, window_bounds = array<i64: 1, 8, 128>}]} {
    %c0 = arith.constant 0 : index
    %c0_0 = arith.constant 0 : index
    %0 = vector.load %arg1[%c0, %c0_0] : memref<128x256xbf16, #tpu.memory_space<vmem>>, vector<128x256xbf16>
    %c0_1 = arith.constant 0 : index
    %c0_2 = arith.constant 0 : index
    %1 = vector.load %arg2[%c0_1, %c0_2] : memref<256x128xbf16, #tpu.memory_space<vmem>>, vector<256x128xbf16>
    %cst = arith.constant dense<0.000000e+00> : vector<128x128xf32>
    %2 = tpu.matmul %0, %1, %cst {dimension_numbers = #tpu.dot_dimension_numbers<[1], [0], [0], [1], [0, 0, 1, 1], [], []>} : vector<128x256xbf16>, vector<256x128xbf16>, vector<128x128xf32> -> vector<128x128xf32>
    %3 = arith.truncf %2 : vector<128x128xf32> to vector<128x128xbf16>
    %c0_3 = arith.constant 0 : index
    %c0_4 = arith.constant 0 : index
    %4 = vector.load %arg3[%c0_3, %c0_4] : memref<128x128xbf16, #tpu.memory_space<vmem>>, vector<128x128xbf16>
    tpu.vector_store %arg3[%c0_3, %c0_4], %3 {strides = array<i32>} : memref<128x128xbf16, #tpu.memory_space<vmem>>, vector<128x128xbf16>,
    %cst_5 = arith.constant dense<0.000000e+00> : vector<128xf32>
    %5 = vector.multi_reduction <add>, %2, %cst_5 [0] : vector<128x128xf32> to vector<128xf32>
    %6 = vector.shape_cast %5 : vector<128xf32> to vector<1x128xf32>
    %7 = arith.mulf %2, %2 : vector<128x128xf32>
    %cst_6 = arith.constant dense<0.000000e+00> : vector<128xf32>
    %8 = vector.multi_reduction <add>, %7, %cst_6 [0] : vector<128x128xf32> to vector<128xf32>
    %9 = vector.shape_cast %8 : vector<128xf32> to vector<1x128xf32>
    %10 = tpu.iota {dimensions = array<i32: 0>} : vector<8x128xi32>
    %c0_i32 = arith.constant 0 : i32
    %11 = vector.broadcast %c0_i32 : i32 to vector<8x128xi32>
    %12 = arith.cmpi eq, %10, %11 : vector<8x128xi32>
    %c1_i32 = arith.constant 1 : i32
    %13 = vector.broadcast %c1_i32 : i32 to vector<8x128xi32>
    %14 = arith.cmpi eq, %10, %13 : vector<8x128xi32>
    %cst_7 = arith.constant 0.000000e+00 : f32
    %15 = vector.shape_cast %9 : vector<1x128xf32> to vector<1x128xf32>
    %16 = vector.broadcast %15 : vector<1x128xf32> to vector<8x128xf32>
    %17 = vector.broadcast %cst_7 : f32 to vector<8x128xf32>
    %18 = arith.select %14, %16, %17 : vector<8x128xi1>, vector<8x128xf32>
    %19 = vector.shape_cast %6 : vector<1x128xf32> to vector<1x128xf32>
    %20 = vector.broadcast %19 : vector<1x128xf32> to vector<8x128xf32>
    %21 = arith.select %12, %20, %18 : vector<8x128xi1>, vector<8x128xf32>
    %22 = vector.shape_cast %21 : vector<8x128xf32> to vector<1x8x128xf32>
    %c0_8 = arith.constant 0 : index
    %c0_9 = arith.constant 0 : index
    %c0_10 = arith.constant 0 : index
    %23 = vector.load %arg4[%c0_8, %c0_9, %c0_10] : memref<1x8x128xf32, #tpu.memory_space<vmem>>, vector<1x8x128xf32>
    tpu.vector_store %arg4[%c0_8, %c0_9, %c0_10], %22 {strides = array<i32>} : memref<1x8x128xf32, #tpu.memory_space<vmem>>, vector<1x8x128xf32>,
    return
  }
  func.func @transform_0(%arg0: i32) -> (i32, i32) {
    %c0_i32 = arith.constant 0 : i32
    %c0_i32_0 = arith.constant 0 : i32
    return %arg0, %c0_i32 : i32, i32
  }
  func.func @transform_1(%arg0: i32) -> (i32, i32) {
    %c0_i32 = arith.constant 0 : i32
    %c0_i32_0 = arith.constant 0 : i32
    %c0_i32_1 = arith.constant 0 : i32
    return %c0_i32, %c0_i32_0 : i32, i32
  }
  func.func @transform_2(%arg0: i32) -> (i32, i32) {
    %c0_i32 = arith.constant 0 : i32
    %c0_i32_0 = arith.constant 0 : i32
    return %arg0, %c0_i32 : i32, i32
  }
  func.func @transform_3(%arg0: i32) -> (i32, i32, i32) {
    %c0_i32 = arith.constant 0 : i32
    %c0_i32_0 = arith.constant 0 : i32
    %c0_i32_1 = arith.constant 0 : i32
    return %arg0, %c0_i32, %c0_i32_0 : i32, i32, i32
  }
}

module attributes {stable_mosaic.version = 11 : i64} {
  func.func @_bn_lrelu_kernel(%arg0: i32, %arg1: memref<128x128xbf16, #tpu.memory_space<vmem>>, %arg2: memref<1x128xf32, #tpu.memory_space<vmem>>, %arg3: memref<1x128xf32, #tpu.memory_space<vmem>>, %arg4: memref<128x128xbf16, #tpu.memory_space<vmem>>) attributes {dimension_semantics = [#tpu.dimension_semantics<parallel>], iteration_bounds = array<i64: 1>, scalar_prefetch = 0 : i64, scratch_operands = 0 : i64, tpu.core_type = #tpu.core_type<tc>, window_params = [{transform_indices = @transform_0, window_bounds = array<i64: 128, 128>}, {pipeline_mode = #tpu.pipeline_mode<synchronous>, transform_indices = @transform_1, window_bounds = array<i64: 1, 128>}, {pipeline_mode = #tpu.pipeline_mode<synchronous>, transform_indices = @transform_2, window_bounds = array<i64: 1, 128>}, {transform_indices = @transform_3, window_bounds = array<i64: 128, 128>}]} {
    %c0 = arith.constant 0 : index
    %c0_0 = arith.constant 0 : index
    %0 = vector.load %arg1[%c0, %c0_0] : memref<128x128xbf16, #tpu.memory_space<vmem>>, vector<128x128xbf16>
    %c0_1 = arith.constant 0 : index
    %c0_2 = arith.constant 0 : index
    %1 = vector.load %arg2[%c0_1, %c0_2] : memref<1x128xf32, #tpu.memory_space<vmem>>, vector<1x128xf32>
    %2 = arith.extf %0 : vector<128x128xbf16> to vector<128x128xf32>
    %3 = vector.broadcast %1 : vector<1x128xf32> to vector<128x128xf32>
    %4 = arith.mulf %2, %3 : vector<128x128xf32>
    %c0_3 = arith.constant 0 : index
    %c0_4 = arith.constant 0 : index
    %5 = vector.load %arg3[%c0_3, %c0_4] : memref<1x128xf32, #tpu.memory_space<vmem>>, vector<1x128xf32>
    %6 = vector.broadcast %5 : vector<1x128xf32> to vector<128x128xf32>
    %7 = arith.addf %4, %6 : vector<128x128xf32>
    %cst = arith.constant 0.000000e+00 : f32
    %8 = vector.broadcast %cst : f32 to vector<128x128xf32>
    %9 = arith.cmpf ogt, %7, %8 : vector<128x128xf32>
    %cst_5 = arith.constant 2.000000e-01 : f32
    %10 = vector.broadcast %cst_5 : f32 to vector<128x128xf32>
    %11 = arith.mulf %10, %7 : vector<128x128xf32>
    %12 = arith.select %9, %7, %11 : vector<128x128xi1>, vector<128x128xf32>
    %13 = arith.truncf %12 : vector<128x128xf32> to vector<128x128xbf16>
    %c0_6 = arith.constant 0 : index
    %c0_7 = arith.constant 0 : index
    %14 = vector.load %arg4[%c0_6, %c0_7] : memref<128x128xbf16, #tpu.memory_space<vmem>>, vector<128x128xbf16>
    tpu.vector_store %arg4[%c0_6, %c0_7], %13 {strides = array<i32>} : memref<128x128xbf16, #tpu.memory_space<vmem>>, vector<128x128xbf16>,
    return
  }
  func.func @transform_0(%arg0: i32) -> (i32, i32) {
    %c0_i32 = arith.constant 0 : i32
    %c0_i32_0 = arith.constant 0 : i32
    return %arg0, %c0_i32 : i32, i32
  }
  func.func @transform_1(%arg0: i32) -> (i32, i32) {
    %c0_i32 = arith.constant 0 : i32
    %c0_i32_0 = arith.constant 0 : i32
    %c0_i32_1 = arith.constant 0 : i32
    return %c0_i32, %c0_i32_0 : i32, i32
  }
  func.func @transform_2(%arg0: i32) -> (i32, i32) {
    %c0_i32 = arith.constant 0 : i32
    %c0_i32_0 = arith.constant 0 : i32
    %c0_i32_1 = arith.constant 0 : i32
    return %c0_i32, %c0_i32_0 : i32, i32
  }
  func.func @transform_3(%arg0: i32) -> (i32, i32) {
    %c0_i32 = arith.constant 0 : i32
    %c0_i32_0 = arith.constant 0 : i32
    return %arg0, %c0_i32 : i32, i32
  }
}

module attributes {stable_mosaic.version = 11 : i64} {
  func.func @_bn_lrelu_kernel(%arg0: i32, %arg1: memref<32x128xbf16, #tpu.memory_space<vmem>>, %arg2: memref<1x128xf32, #tpu.memory_space<vmem>>, %arg3: memref<1x128xf32, #tpu.memory_space<vmem>>, %arg4: memref<32x128xbf16, #tpu.memory_space<vmem>>) attributes {dimension_semantics = [#tpu.dimension_semantics<parallel>], iteration_bounds = array<i64: 1>, scalar_prefetch = 0 : i64, scratch_operands = 0 : i64, tpu.core_type = #tpu.core_type<tc>, window_params = [{transform_indices = @transform_0, window_bounds = array<i64: 32, 128>}, {pipeline_mode = #tpu.pipeline_mode<synchronous>, transform_indices = @transform_1, window_bounds = array<i64: 1, 128>}, {pipeline_mode = #tpu.pipeline_mode<synchronous>, transform_indices = @transform_2, window_bounds = array<i64: 1, 128>}, {transform_indices = @transform_3, window_bounds = array<i64: 32, 128>}]} {
    %c0 = arith.constant 0 : index
    %c0_0 = arith.constant 0 : index
    %0 = vector.load %arg1[%c0, %c0_0] : memref<32x128xbf16, #tpu.memory_space<vmem>>, vector<32x128xbf16>
    %c0_1 = arith.constant 0 : index
    %c0_2 = arith.constant 0 : index
    %1 = vector.load %arg2[%c0_1, %c0_2] : memref<1x128xf32, #tpu.memory_space<vmem>>, vector<1x128xf32>
    %2 = arith.extf %0 : vector<32x128xbf16> to vector<32x128xf32>
    %3 = vector.broadcast %1 : vector<1x128xf32> to vector<32x128xf32>
    %4 = arith.mulf %2, %3 : vector<32x128xf32>
    %c0_3 = arith.constant 0 : index
    %c0_4 = arith.constant 0 : index
    %5 = vector.load %arg3[%c0_3, %c0_4] : memref<1x128xf32, #tpu.memory_space<vmem>>, vector<1x128xf32>
    %6 = vector.broadcast %5 : vector<1x128xf32> to vector<32x128xf32>
    %7 = arith.addf %4, %6 : vector<32x128xf32>
    %cst = arith.constant 0.000000e+00 : f32
    %8 = vector.broadcast %cst : f32 to vector<32x128xf32>
    %9 = arith.cmpf ogt, %7, %8 : vector<32x128xf32>
    %cst_5 = arith.constant 2.000000e-01 : f32
    %10 = vector.broadcast %cst_5 : f32 to vector<32x128xf32>
    %11 = arith.mulf %10, %7 : vector<32x128xf32>
    %12 = arith.select %9, %7, %11 : vector<32x128xi1>, vector<32x128xf32>
    %13 = arith.truncf %12 : vector<32x128xf32> to vector<32x128xbf16>
    %c0_6 = arith.constant 0 : index
    %c0_7 = arith.constant 0 : index
    %14 = vector.load %arg4[%c0_6, %c0_7] : memref<32x128xbf16, #tpu.memory_space<vmem>>, vector<32x128xbf16>
    tpu.vector_store %arg4[%c0_6, %c0_7], %13 {strides = array<i32>} : memref<32x128xbf16, #tpu.memory_space<vmem>>, vector<32x128xbf16>,
    return
  }
  func.func @transform_0(%arg0: i32) -> (i32, i32) {
    %c0_i32 = arith.constant 0 : i32
    %c0_i32_0 = arith.constant 0 : i32
    return %arg0, %c0_i32 : i32, i32
  }
  func.func @transform_1(%arg0: i32) -> (i32, i32) {
    %c0_i32 = arith.constant 0 : i32
    %c0_i32_0 = arith.constant 0 : i32
    %c0_i32_1 = arith.constant 0 : i32
    return %c0_i32, %c0_i32_0 : i32, i32
  }
  func.func @transform_2(%arg0: i32) -> (i32, i32) {
    %c0_i32 = arith.constant 0 : i32
    %c0_i32_0 = arith.constant 0 : i32
    %c0_i32_1 = arith.constant 0 : i32
    return %c0_i32, %c0_i32_0 : i32, i32
  }
  func.func @transform_3(%arg0: i32) -> (i32, i32) {
    %c0_i32 = arith.constant 0 : i32
    %c0_i32_0 = arith.constant 0 : i32
    return %arg0, %c0_i32 : i32, i32
  }
}

module attributes {stable_mosaic.version = 11 : i64} {
  func.func @_conv_stats_kernel(%arg0: i32, %arg1: memref<32x512xbf16, #tpu.memory_space<vmem>>, %arg2: memref<512x128xbf16, #tpu.memory_space<vmem>>, %arg3: memref<32x128xbf16, #tpu.memory_space<vmem>>, %arg4: memref<1x8x128xf32, #tpu.memory_space<vmem>>) attributes {dimension_semantics = [#tpu.dimension_semantics<parallel>], iteration_bounds = array<i64: 1>, scalar_prefetch = 0 : i64, scratch_operands = 0 : i64, tpu.core_type = #tpu.core_type<tc>, window_params = [{transform_indices = @transform_0, window_bounds = array<i64: 32, 512>}, {pipeline_mode = #tpu.pipeline_mode<synchronous>, transform_indices = @transform_1, window_bounds = array<i64: 512, 128>}, {transform_indices = @transform_2, window_bounds = array<i64: 32, 128>}, {transform_indices = @transform_3, window_bounds = array<i64: 1, 8, 128>}]} {
    %c0 = arith.constant 0 : index
    %c0_0 = arith.constant 0 : index
    %0 = vector.load %arg1[%c0, %c0_0] : memref<32x512xbf16, #tpu.memory_space<vmem>>, vector<32x512xbf16>
    %c0_1 = arith.constant 0 : index
    %c0_2 = arith.constant 0 : index
    %1 = vector.load %arg2[%c0_1, %c0_2] : memref<512x128xbf16, #tpu.memory_space<vmem>>, vector<512x128xbf16>
    %cst = arith.constant dense<0.000000e+00> : vector<32x128xf32>
    %2 = tpu.matmul %0, %1, %cst {dimension_numbers = #tpu.dot_dimension_numbers<[1], [0], [0], [1], [0, 0, 1, 1], [], []>} : vector<32x512xbf16>, vector<512x128xbf16>, vector<32x128xf32> -> vector<32x128xf32>
    %3 = arith.truncf %2 : vector<32x128xf32> to vector<32x128xbf16>
    %c0_3 = arith.constant 0 : index
    %c0_4 = arith.constant 0 : index
    %4 = vector.load %arg3[%c0_3, %c0_4] : memref<32x128xbf16, #tpu.memory_space<vmem>>, vector<32x128xbf16>
    tpu.vector_store %arg3[%c0_3, %c0_4], %3 {strides = array<i32>} : memref<32x128xbf16, #tpu.memory_space<vmem>>, vector<32x128xbf16>,
    %cst_5 = arith.constant dense<0.000000e+00> : vector<128xf32>
    %5 = vector.multi_reduction <add>, %2, %cst_5 [0] : vector<32x128xf32> to vector<128xf32>
    %6 = vector.shape_cast %5 : vector<128xf32> to vector<1x128xf32>
    %7 = arith.mulf %2, %2 : vector<32x128xf32>
    %cst_6 = arith.constant dense<0.000000e+00> : vector<128xf32>
    %8 = vector.multi_reduction <add>, %7, %cst_6 [0] : vector<32x128xf32> to vector<128xf32>
    %9 = vector.shape_cast %8 : vector<128xf32> to vector<1x128xf32>
    %10 = tpu.iota {dimensions = array<i32: 0>} : vector<8x128xi32>
    %c0_i32 = arith.constant 0 : i32
    %11 = vector.broadcast %c0_i32 : i32 to vector<8x128xi32>
    %12 = arith.cmpi eq, %10, %11 : vector<8x128xi32>
    %c1_i32 = arith.constant 1 : i32
    %13 = vector.broadcast %c1_i32 : i32 to vector<8x128xi32>
    %14 = arith.cmpi eq, %10, %13 : vector<8x128xi32>
    %cst_7 = arith.constant 0.000000e+00 : f32
    %15 = vector.shape_cast %9 : vector<1x128xf32> to vector<1x128xf32>
    %16 = vector.broadcast %15 : vector<1x128xf32> to vector<8x128xf32>
    %17 = vector.broadcast %cst_7 : f32 to vector<8x128xf32>
    %18 = arith.select %14, %16, %17 : vector<8x128xi1>, vector<8x128xf32>
    %19 = vector.shape_cast %6 : vector<1x128xf32> to vector<1x128xf32>
    %20 = vector.broadcast %19 : vector<1x128xf32> to vector<8x128xf32>
    %21 = arith.select %12, %20, %18 : vector<8x128xi1>, vector<8x128xf32>
    %22 = vector.shape_cast %21 : vector<8x128xf32> to vector<1x8x128xf32>
    %c0_8 = arith.constant 0 : index
    %c0_9 = arith.constant 0 : index
    %c0_10 = arith.constant 0 : index
    %23 = vector.load %arg4[%c0_8, %c0_9, %c0_10] : memref<1x8x128xf32, #tpu.memory_space<vmem>>, vector<1x8x128xf32>
    tpu.vector_store %arg4[%c0_8, %c0_9, %c0_10], %22 {strides = array<i32>} : memref<1x8x128xf32, #tpu.memory_space<vmem>>, vector<1x8x128xf32>,
    return
  }
  func.func @transform_0(%arg0: i32) -> (i32, i32) {
    %c0_i32 = arith.constant 0 : i32
    %c0_i32_0 = arith.constant 0 : i32
    return %arg0, %c0_i32 : i32, i32
  }
  func.func @transform_1(%arg0: i32) -> (i32, i32) {
    %c0_i32 = arith.constant 0 : i32
    %c0_i32_0 = arith.constant 0 : i32
    %c0_i32_1 = arith.constant 0 : i32
    return %c0_i32, %c0_i32_0 : i32, i32
  }
  func.func @transform_2(%arg0: i32) -> (i32, i32) {
    %c0_i32 = arith.constant 0 : i32
    %c0_i32_0 = arith.constant 0 : i32
    return %arg0, %c0_i32 : i32, i32
  }
  func.func @transform_3(%arg0: i32) -> (i32, i32, i32) {
    %c0_i32 = arith.constant 0 : i32
    %c0_i32_0 = arith.constant 0 : i32
    %c0_i32_1 = arith.constant 0 : i32
    return %arg0, %c0_i32, %c0_i32_0 : i32, i32, i32
  }
}

module attributes {stable_mosaic.version = 11 : i64} {
  func.func @_conv_sigmoid_kernel(%arg0: i32, %arg1: memref<8x1024xbf16, #tpu.memory_space<vmem>>, %arg2: memref<1024x128xbf16, #tpu.memory_space<vmem>>, %arg3: memref<8x128xf32, #tpu.memory_space<vmem>>) attributes {dimension_semantics = [#tpu.dimension_semantics<parallel>], iteration_bounds = array<i64: 1>, scalar_prefetch = 0 : i64, scratch_operands = 0 : i64, tpu.core_type = #tpu.core_type<tc>, window_params = [{transform_indices = @transform_0, window_bounds = array<i64: 8, 1024>}, {pipeline_mode = #tpu.pipeline_mode<synchronous>, transform_indices = @transform_1, window_bounds = array<i64: 1024, 128>}, {transform_indices = @transform_2, window_bounds = array<i64: 8, 128>}]} {
    %c0 = arith.constant 0 : index
    %c0_0 = arith.constant 0 : index
    %0 = vector.load %arg1[%c0, %c0_0] : memref<8x1024xbf16, #tpu.memory_space<vmem>>, vector<8x1024xbf16>
    %c0_1 = arith.constant 0 : index
    %c0_2 = arith.constant 0 : index
    %1 = vector.load %arg2[%c0_1, %c0_2] : memref<1024x128xbf16, #tpu.memory_space<vmem>>, vector<1024x128xbf16>
    %cst = arith.constant dense<0.000000e+00> : vector<8x128xf32>
    %2 = tpu.matmul %0, %1, %cst {dimension_numbers = #tpu.dot_dimension_numbers<[1], [0], [0], [1], [0, 0, 1, 1], [], []>} : vector<8x1024xbf16>, vector<1024x128xbf16>, vector<8x128xf32> -> vector<8x128xf32>
    %3 = arith.negf %2 : vector<8x128xf32>
    %4 = math.exp %3 : vector<8x128xf32>
    %cst_3 = arith.constant 1.000000e+00 : f32
    %5 = vector.broadcast %cst_3 : f32 to vector<8x128xf32>
    %6 = arith.addf %5, %4 : vector<8x128xf32>
    %7 = arith.divf %5, %6 : vector<8x128xf32>
    %c0_4 = arith.constant 0 : index
    %c0_5 = arith.constant 0 : index
    %8 = vector.load %arg3[%c0_4, %c0_5] : memref<8x128xf32, #tpu.memory_space<vmem>>, vector<8x128xf32>
    tpu.vector_store %arg3[%c0_4, %c0_5], %7 {strides = array<i32>} : memref<8x128xf32, #tpu.memory_space<vmem>>, vector<8x128xf32>,
    return
  }
  func.func @transform_0(%arg0: i32) -> (i32, i32) {
    %c0_i32 = arith.constant 0 : i32
    %c0_i32_0 = arith.constant 0 : i32
    return %arg0, %c0_i32 : i32, i32
  }
  func.func @transform_1(%arg0: i32) -> (i32, i32) {
    %c0_i32 = arith.constant 0 : i32
    %c0_i32_0 = arith.constant 0 : i32
    %c0_i32_1 = arith.constant 0 : i32
    return %c0_i32, %c0_i32_0 : i32, i32
  }
  func.func @transform_2(%arg0: i32) -> (i32, i32) {
    %c0_i32 = arith.constant 0 : i32
    %c0_i32_0 = arith.constant 0 : i32
    return %arg0, %c0_i32 : i32, i32
  }
}

</mosaic_0001>

<bundles_post_ra>
// kernel: discriminator_forward.8
= control target key start
LH: loop header
LB: loop body
LE: loop exit
PB: predicated region body
PF: predicated region fallthrough
CT: control target
= control target key end

     0   :  { %s1902_s9 = smov 0   ;;  %s2025_s0 = inlined_call_operand.vmem [shape: bf16[2048,128], index: 0, kind: input, shape index: {}]   ;;  %s2026_s1 = inlined_call_operand.vmem [shape: bf16[128,128], index: 1, kind: input, shape index: {}]   ;;  %s2027_s2 = inlined_call_operand.vmem [shape: bf16[2048,128], index: 2, kind: output, shape index: {}]  }
   0x1 LB: > { %s1325_s10 = sadd.s32 4294967295, %s1885_s9   ;;  %p1329_p0 = scmp.ge.s32.totalorder %s1885_s9, 1  ;;  %s1885_s9 = sphi %s1902_s9, %s12_s9  }
   0x2   : > { %p113_p1 = scmp.lt.s32.totalorder %s1885_s9, 5 }
   0x4   : > { %p114_p2 = pnand %p1329_p0, %p113_p1 }
   0x5   : > { %v1839_v0 = vld [vmem:[%s2026_s1] sm:$0xff] (!%p114_p2)   ;;  %s1330_s13 = sshll.u32 (!%p114_p2), %s1325_s10, 6  ;;  %v1840_v1 = vld [vmem:[%s2026_s1 + $0x8] sm:$0xff] (!%p114_p2)   ;;  %v1841_v2 = vld [vmem:[%s2026_s1 + $0x10] sm:$0xff] (!%p114_p2)  }
   0x6   : > { %117 = sbr.rel (%p114_p2) target bundleno = 317 (0x13d), region = 28  ;;  %p136_p3 = scmp.lt.s32.totalorder (!%p114_p2), %s1330_s13, 255  ;;  %1735 = vmatprep.subr.bf16.mxu0 (!%p114_p2), %v1839_v0  ;;  %1815 = vmatprep.subr.bf16.mxu1 (!%p114_p2), %v1839_v0  ;;  %v1842_v3 = vld [vmem:[%s2026_s1 + $0x18] sm:$0xff] (!%p114_p2)   ;;  %v1843_v6 = vld [vmem:[%s2026_s1 + $0x20] sm:$0xff] (!%p114_p2)   ;;  %v1844_v7 = vld [vmem:[%s2026_s1 + $0x28] sm:$0xff] (!%p114_p2)  }
   0x7   : > { %1736 = vmatpush3.bf16.msra.mxu0 (!%p114_p2), %v1839_v0  ;;  %1823 = vmatpush3.bf16.msra.mxu1 (!%p114_p2), %v1839_v0  ;;  %v1845_v8 = vld [vmem:[%s2026_s1 + $0x30] sm:$0xff] (!%p114_p2)   ;;  %v1846_v9 = vld [vmem:[%s2026_s1 + $0x38] sm:$0xff] (!%p114_p2)  }
   0x8   : > { %1737 = vmatprep.subr.bf16.mxu0 (!%p114_p2), %v1840_v1  ;;  %1816 = vmatprep.subr.bf16.mxu1 (!%p114_p2), %v1840_v1 }
   0xb   : > { %1738 = vmatpush3.bf16.msra.mxu0 (!%p114_p2), %v1840_v1  ;;  %1824 = vmatpush3.bf16.msra.mxu1 (!%p114_p2), %v1840_v1 }
   0xc   : > { %1739 = vmatprep.subr.bf16.mxu0 (!%p114_p2), %v1841_v2  ;;  %1817 = vmatprep.subr.bf16.mxu1 (!%p114_p2), %v1841_v2 }
   0xd   : > { %s2029_s13 = smov (!%p136_p3, %s1330_s13), 255 }
   0xe   : > { %s1331_s18 = sshll.u32 %s2029_s13, 2 }
   0xf   : > { %s1927_s21 = scalar_lea.vmem %s2025_s0, %s1331_s18  ;;  %1740 = vmatpush3.bf16.msra.mxu0 %v1841_v2  ;;  %1825 = vmatpush3.bf16.msra.mxu1 %v1841_v2  ;;  %s1981_s6 = scalar_lea.vmem %s2027_s2, %s1331_s18 }
  0x10   : > { %v1847_v4 = vld [vmem:[%s1927_s21] sm:$0xff]   ;;  %1741 = vmatprep.subr.bf16.mxu0 %v1842_v3  ;;  %1818 = vmatprep.subr.bf16.mxu1 %v1842_v3  ;;  %v1849_v10 = vld [vmem:[%s1927_s21 + $0x8] sm:$0xff]   ;;  %v1851_v12 = vld [vmem:[%s1927_s21 + $0x10] sm:$0xff]  }
  0x11   : > { %v1848_v5 = vld [vmem:[%s1927_s21 + $0x80] sm:$0xff]   ;;  %1751 = vmatprep.mubr.bf16.mxu0 %v1847_v4  ;;  %v1850_v11 = vld [vmem:[%s1927_s21 + $0x88] sm:$0xff]   ;;  %v1852_v13 = vld [vmem:[%s1927_s21 + $0x90] sm:$0xff]  }
  0x12   : > { %1783 = vmatprep.mubr.bf16.mxu1 %v1848_v5  ;;  %v1853_v14 = vld [vmem:[%s1927_s21 + $0x18] sm:$0xff]   ;;  %v1855_v16 = vld [vmem:[%s1927_s21 + $0x20] sm:$0xff]   ;;  %v1857_v18 = vld [vmem:[%s1927_s21 + $0x28] sm:$0xff]  }
  0x13   : > { %1742 = vmatpush3.bf16.msra.mxu0 %v1842_v3  ;;  %1826 = vmatpush3.bf16.msra.mxu1 %v1842_v3  ;;  %v1854_v15 = vld [vmem:[%s1927_s21 + $0x98] sm:$0xff]   ;;  %v1856_v17 = vld [vmem:[%s1927_s21 + $0xa0] sm:$0xff]   ;;  %v1858_v19 = vld [vmem:[%s1927_s21 + $0xa8] sm:$0xff]  }
  0x14   : > { %1743 = vmatprep.subr.bf16.mxu0 %v1843_v6  ;;  %1819 = vmatprep.subr.bf16.mxu1 %v1843_v6  ;;  %v1859_v20 = vld [vmem:[%s1927_s21 + $0x30] sm:$0xff]   ;;  %v1861_v22 = vld [vmem:[%s1927_s21 + $0x38] sm:$0xff]   ;;  %v1863_v24 = vld [vmem:[%s1927_s21 + $0x40] sm:$0xff]  }
  0x15   : > { %v1860_v21 = vld [vmem:[%s1927_s21 + $0xb0] sm:$0xff]   ;;  %v1862_v23 = vld [vmem:[%s1927_s21 + $0xb8] sm:$0xff]   ;;  %v1864_v25 = vld [vmem:[%s1927_s21 + $0xc0] sm:$0xff]  }
  0x16   : > { %v1865_v26 = vld [vmem:[%s1927_s21 + $0x48] sm:$0xff]   ;;  %v1867_v28 = vld [vmem:[%s1927_s21 + $0x50] sm:$0xff]   ;;  %v1869_v30 = vld [vmem:[%s1927_s21 + $0x58] sm:$0xff]  }
  0x17   : > { %1744 = vmatpush3.bf16.msra.mxu0 %v1843_v6  ;;  %1827 = vmatpush3.bf16.msra.mxu1 %v1843_v6  ;;  %v1866_v27 = vld [vmem:[%s1927_s21 + $0xc8] sm:$0xff]   ;;  %v1868_v29 = vld [vmem:[%s1927_s21 + $0xd0] sm:$0xff]   ;;  %v1870_v31 = vld [vmem:[%s1927_s21 + $0xd8] sm:$0xff]  }
  0x18   : > { %1745 = vmatprep.subr.bf16.mxu0 %v1844_v7  ;;  %1820 = vmatprep.subr.bf16.mxu1 %v1844_v7  ;;  %v1871_v32 = vld [vmem:[%s1927_s21 + $0x60] sm:$0xff]   ;;  %v1873_v34 = vld [vmem:[%s1927_s21 + $0x68] sm:$0xff]   ;;  %v1875_v36 = vld [vmem:[%s1927_s21 + $0x70] sm:$0xff]  }
  0x19   : > { %v1872_v33 = vld [vmem:[%s1927_s21 + $0xe0] sm:$0xff]   ;;  %v1874_v35 = vld [vmem:[%s1927_s21 + $0xe8] sm:$0xff]   ;;  %v1876_v37 = vld [vmem:[%s1927_s21 + $0xf0] sm:$0xff]  }
  0x1a   : > { %v1877_v38 = vld [vmem:[%s1927_s21 + $0x78] sm:$0xff]  }
  0x1b   : > { %1746 = vmatpush3.bf16.msra.mxu0 %v1844_v7  ;;  %1828 = vmatpush3.bf16.msra.mxu1 %v1844_v7  ;;  %v1878_v39 = vld [vmem:[%s1927_s21 + $0xf8] sm:$0xff]  }
  0x1c   : > { %1747 = vmatprep.subr.bf16.mxu0 %v1845_v8  ;;  %1821 = vmatprep.subr.bf16.mxu1 %v1845_v8 }
  0x1f   : > { %1748 = vmatpush3.bf16.msra.mxu0 %v1845_v8  ;;  %1829 = vmatpush3.bf16.msra.mxu1 %v1845_v8 }
  0x20   : > { %1749 = vmatprep.subr.bf16.mxu0 %v1846_v9  ;;  %1822 = vmatprep.subr.bf16.mxu1 %v1846_v9 }
  0x23   : > { %1750 = vmatpush3.bf16.msra.mxu0 %v1846_v9  ;;  %1830 = vmatpush3.bf16.msra.mxu1 %v1846_v9 }
  0x26   : > { %1752 = vmatmul.mubr.bf16.vlgmr.msra.gmra.mrb[0].mxu0 %v1849_v10  ;;  %1784 = vmatmul.mubr.bf16.vlgmr.msra.gmra.mrb[0].mxu1 %v1850_v11 }
  0x27   : > { %1755 = vmatprep.mubr.bf16.mxu0 %v1851_v12  ;;  %1787 = vmatprep.mubr.bf16.mxu1 %v1852_v13 }
  0x2e   : > { %1756 = vmatmul.mubr.bf16.gmra.mrb[4].mxu0 %v1853_v14  ;;  %1788 = vmatmul.mubr.bf16.gmra.mrb[4].mxu1 %v1854_v15 }
  0x2f   : > { %1759 = vmatprep.mubr.bf16.mxu0 %v1855_v16  ;;  %1791 = vmatprep.mubr.bf16.mxu1 %v1856_v17 }
  0x36   : > { %1760 = vmatmul.mubr.bf16.gmra.mrb[8].mxu0 %v1857_v18  ;;  %1792 = vmatmul.mubr.bf16.gmra.mrb[8].mxu1 %v1858_v19 }
  0x37   : > { %1763 = vmatprep.mubr.bf16.mxu0 %v1859_v20  ;;  %1795 = vmatprep.mubr.bf16.mxu1 %v1860_v21 }
  0x3e   : > { %1764 = vmatmul.mubr.bf16.gmra.mrb[12].mxu0 %v1861_v22  ;;  %1796 = vmatmul.mubr.bf16.gmra.mrb[12].mxu1 %v1862_v23 }
  0x3f   : > { %1767 = vmatprep.mubr.bf16.mxu0 %v1863_v24  ;;  %1799 = vmatprep.mubr.bf16.mxu1 %v1864_v25 }
  0x46   : > { %1768 = vmatmul.mubr.bf16.gmra.mrb[16].mxu0 %v1865_v26  ;;  %1800 = vmatmul.mubr.bf16.gmra.mrb[16].mxu1 %v1866_v27 }
  0x47   : > { %1771 = vmatprep.mubr.bf16.mxu0 %v1867_v28  ;;  %1803 = vmatprep.mubr.bf16.mxu1 %v1868_v29 }
  0x4e   : > { %1772 = vmatmul.mubr.bf16.gmra.mrb[20].mxu0 %v1869_v30  ;;  %1804 = vmatmul.mubr.bf16.gmra.mrb[20].mxu1 %v1870_v31 }
  0x4f   : > { %1775 = vmatprep.mubr.bf16.mxu0 %v1871_v32  ;;  %1807 = vmatprep.mubr.bf16.mxu1 %v1872_v33 }
  0x56   : > { %1776 = vmatmul.mubr.bf16.gmra.mrb[24].mxu0 %v1873_v34  ;;  %1808 = vmatmul.mubr.bf16.gmra.mrb[24].mxu1 %v1874_v35 }
  0x57   : > { %1779 = vmatprep.mubr.bf16.mxu0 %v1875_v36  ;;  %1811 = vmatprep.mubr.bf16.mxu1 %v1876_v37 }
  0x5e   : > { %1780 = vmatmul.mubr.bf16.gmra.mrb[28].mxu0 %v1877_v38  ;;  %1812 = vmatmul.mubr.bf16.gmra.mrb[28].mxu1 %v1878_v39 }
  0xf9   : > { %v1753_v40 = vpop.f32.mrb[0].mxu0  ;;  %v1785_v41 = vpop.f32.mrb[0].mxu1 }
  0xfa   : > { %vm759_vm0 = vcmp.gt.f32.partialorder %v1753_v40, 0.0  ;;  %v823_v42 = vmul.f32 0.2, %v1753_v40  ;;  %v855_v43 = vmul.f32 0.2, %v1785_v41  ;;  %vm791_vm1 = vcmp.gt.f32.partialorder %v1785_v41, 0.0 }
  0xfb   : > { %v502_v44 = vpop.f32.mrb[1].mxu0  ;;  %v630_v45 = vpop.f32.mrb[1].mxu1 }
  0xfc   : > { %v821_v46 = vmul.f32 0.2, %v502_v44  ;;  %v1754_v47 = vpop.f32.mrb[2].mxu0  ;;  %v1786_v48 = vpop.f32.mrb[2].mxu1  ;;  %v887_v49 = vsel %vm759_vm0, %v1753_v40, %v823_v42  ;;  %v853_v50 = vmul.f32 0.2, %v630_v45  ;;  %v919_v52 = vsel %vm791_vm1, %v1785_v41, %v855_v43 }
  0xfd   : > { %vm760_vm2 = vcmp.gt.f32.partialorder %v1754_v47, 0.0  ;;  %v824_v51 = vmul.f32 0.2, %v1754_v47  ;;  %vm757_vm3 = vcmp.gt.f32.partialorder %v502_v44, 0.0  ;;  %vm792_vm4 = vcmp.gt.f32.partialorder %v1786_v48, 0.0  ;;  %v505_v54 = vpop.f32.mrb[3].mxu0 }
  0xfe   : > { %v856_v53 = vmul.f32 0.2, %v1786_v48  ;;  %v633_v55 = vpop.f32.mrb[3].mxu1  ;;  %vm789_vm5 = vcmp.gt.f32.partialorder %v630_v45, 0.0  ;;  %vm758_vm6 = vcmp.gt.f32.partialorder %v505_v54, 0.0  ;;  %v885_v61 = vsel %vm757_vm3, %v502_v44, %v821_v46 }
  0xff   : > { %v888_v56 = vsel %vm760_vm2, %v1754_v47, %v824_v51  ;;  %v822_v57 = vmul.f32 0.2, %v505_v54  ;;  %vm790_vm7 = vcmp.gt.f32.partialorder %v633_v55, 0.0  ;;  %v854_v60 = vmul.f32 0.2, %v633_v55 }
 0x100   : > { %v1512_v58 = vpack.c.bf16 %v888_v56, %v887_v49  ;;  %v920_v59 = vsel %vm792_vm4, %v1786_v48, %v856_v53  ;;  %v917_v2 = vsel %vm789_vm5, %v630_v45, %v853_v50 }
 0x101   : > { %v1592_v62 = vpack.c.bf16 %v920_v59, %v919_v52  ;;  %v886_v63 = vsel %vm758_vm6, %v505_v54, %v822_v57  ;;  %v1757_v0 = vpop.f32.mrb[4].mxu0  ;;  %v1789_v1 = vpop.f32.mrb[4].mxu1  ;;  %v918_v4 = vsel %vm790_vm7, %v633_v55, %v854_v60 }
 0x102   : > { %1664 = vst [vmem:[%s1981_s6 + $0x8] sm:$0xff] %v1512_v58   ;;  %v1507_v3 = vpack.c.bf16 %v886_v63, %v885_v61  ;;  %v827_v5 = vmul.f32 0.2, %v1757_v0  ;;  %v518_v6 = vpop.f32.mrb[5].mxu0  ;;  %v646_v7 = vpop.f32.mrb[5].mxu1  ;;  %v1587_v8 = vpack.c.bf16 %v918_v4, %v917_v2  ;;  %vm763_vm8 = vcmp.gt.f32.partialorder %v1757_v0, 0.0 }
 0x103   : > { %1680 = vst [vmem:[%s1981_s6 + $0x88] sm:$0xff] %v1592_v62   ;;  %v859_v9 = vmul.f32 0.2, %v1789_v1  ;;  %v1758_v10 = vpop.f32.mrb[6].mxu0  ;;  %v1790_v11 = vpop.f32.mrb[6].mxu1  ;;  %vm795_vm9 = vcmp.gt.f32.partialorder %v1789_v1, 0.0 }
 0x104   : > { %1508 = vst [vmem:[%s1981_s6] sm:$0xff] %v1507_v3   ;;  %v825_v12 = vmul.f32 0.2, %v518_v6  ;;  %v857_v13 = vmul.f32 0.2, %v646_v7  ;;  %v521_v14 = vpop.f32.mrb[7].mxu0  ;;  %1679 = vst [vmem:[%s1981_s6 + $0x80] sm:$0xff] %v1587_v8   ;;  %v891_v17 = vsel %vm763_vm8, %v1757_v0, %v827_v5 }
 0x105   : > { %vm761_vm10 = vcmp.gt.f32.partialorder %v518_v6, 0.0  ;;  %vm764_vm11 = vcmp.gt.f32.partialorder %v1758_v10, 0.0  ;;  %v828_v15 = vmul.f32 0.2, %v1758_v10  ;;  %vm796_vm12 = vcmp.gt.f32.partialorder %v1790_v11, 0.0  ;;  %v649_v16 = vpop.f32.mrb[7].mxu1 }
 0x106   : > { %vm793_vm13 = vcmp.gt.f32.partialorder %v646_v7, 0.0  ;;  %v860_v18 = vmul.f32 0.2, %v1790_v11  ;;  %vm762_vm14 = vcmp.gt.f32.partialorder %v521_v14, 0.0  ;;  %v826_v20 = vmul.f32 0.2, %v521_v14 }
 0x107   : > { %v892_v19 = vsel %vm764_vm11, %v1758_v10, %v828_v15  ;;  %vm794_vm15 = vcmp.gt.f32.partialorder %v649_v16, 0.0  ;;  %v858_v21 = vmul.f32 0.2, %v649_v16  ;;  %v923_v22 = vsel %vm795_vm9, %v1789_v1, %v859_v9 }
 0x108   : > { %v889_v23 = vsel %vm761_vm10, %v518_v6, %v825_v12  ;;  %v1522_v24 = vpack.c.bf16 %v892_v19, %v891_v17  ;;  %v924_v25 = vsel %vm796_vm12, %v1790_v11, %v860_v18  ;;  %v921_v26 = vsel %vm793_vm13, %v646_v7, %v857_v13 }
 0x109   : > { %v1602_v27 = vpack.c.bf16 %v924_v25, %v923_v22  ;;  %v890_v28 = vsel %vm762_vm14, %v521_v14, %v826_v20  ;;  %v922_v29 = vsel %vm794_vm15, %v649_v16, %v858_v21  ;;  %v1761_v30 = vpop.f32.mrb[8].mxu0  ;;  %v1793_v31 = vpop.f32.mrb[8].mxu1 }
 0x10a   : > { %1666 = vst [vmem:[%s1981_s6 + $0x18] sm:$0xff] %v1522_v24   ;;  %v1517_v32 = vpack.c.bf16 %v890_v28, %v889_v23  ;;  %v1597_v33 = vpack.c.bf16 %v922_v29, %v921_v26  ;;  %vm767_vm0 = vcmp.gt.f32.partialorder %v1761_v30, 0.0  ;;  %v831_v34 = vmul.f32 0.2, %v1761_v30  ;;  %v534_v35 = vpop.f32.mrb[9].mxu0  ;;  %v662_v36 = vpop.f32.mrb[9].mxu1 }
 0x10b   : > { %1682 = vst [vmem:[%s1981_s6 + $0x98] sm:$0xff] %v1602_v27   ;;  %vm799_vm1 = vcmp.gt.f32.partialorder %v1793_v31, 0.0  ;;  %v863_v37 = vmul.f32 0.2, %v1793_v31  ;;  %v829_v38 = vmul.f32 0.2, %v534_v35 }
 0x10c   : > { %1665 = vst [vmem:[%s1981_s6 + $0x10] sm:$0xff] %v1517_v32   ;;  %1681 = vst [vmem:[%s1981_s6 + $0x90] sm:$0xff] %v1597_v33   ;;  %v861_v39 = vmul.f32 0.2, %v662_v36  ;;  %v1762_v40 = vpop.f32.mrb[10].mxu0  ;;  %v1794_v41 = vpop.f32.mrb[10].mxu1  ;;  %v895_v42 = vsel %vm767_vm0, %v1761_v30, %v831_v34 }
 0x10d   : > { %vm765_vm2 = vcmp.gt.f32.partialorder %v534_v35, 0.0  ;;  %vm768_vm3 = vcmp.gt.f32.partialorder %v1762_v40, 0.0  ;;  %v832_v43 = vmul.f32 0.2, %v1762_v40  ;;  %v537_v44 = vpop.f32.mrb[11].mxu0  ;;  %v665_v45 = vpop.f32.mrb[11].mxu1  ;;  %v927_v50 = vsel %vm799_vm1, %v1793_v31, %v863_v37 }
 0x10e   : > { %vm797_vm4 = vcmp.gt.f32.partialorder %v662_v36, 0.0  ;;  %vm800_vm5 = vcmp.gt.f32.partialorder %v1794_v41, 0.0  ;;  %v864_v46 = vmul.f32 0.2, %v1794_v41  ;;  %vm766_vm6 = vcmp.gt.f32.partialorder %v537_v44, 0.0 }
 0x10f   : > { %v896_v47 = vsel %vm768_vm3, %v1762_v40, %v832_v43  ;;  %v830_v48 = vmul.f32 0.2, %v537_v44  ;;  %vm798_vm7 = vcmp.gt.f32.partialorder %v665_v45, 0.0  ;;  %v862_v49 = vmul.f32 0.2, %v665_v45 }
 0x110   : > { %v893_v51 = vsel %vm765_vm2, %v534_v35, %v829_v38  ;;  %v1532_v52 = vpack.c.bf16 %v896_v47, %v895_v42  ;;  %v928_v53 = vsel %vm800_vm5, %v1794_v41, %v864_v46  ;;  %v925_v54 = vsel %vm797_vm4, %v662_v36, %v861_v39 }
 0x111   : > { %v1612_v55 = vpack.c.bf16 %v928_v53, %v927_v50  ;;  %v894_v56 = vsel %vm766_vm6, %v537_v44, %v830_v48  ;;  %v926_v57 = vsel %vm798_vm7, %v665_v45, %v862_v49  ;;  %v1765_v58 = vpop.f32.mrb[12].mxu0  ;;  %v1797_v59 = vpop.f32.mrb[12].mxu1 }
 0x112   : > { %1668 = vst [vmem:[%s1981_s6 + $0x28] sm:$0xff] %v1532_v52   ;;  %v1527_v60 = vpack.c.bf16 %v894_v56, %v893_v51  ;;  %v1607_v61 = vpack.c.bf16 %v926_v57, %v925_v54  ;;  %vm771_vm8 = vcmp.gt.f32.partialorder %v1765_v58, 0.0  ;;  %v835_v62 = vmul.f32 0.2, %v1765_v58  ;;  %v550_v63 = vpop.f32.mrb[13].mxu0  ;;  %v678_v0 = vpop.f32.mrb[13].mxu1 }
 0x113   : > { %1684 = vst [vmem:[%s1981_s6 + $0xa8] sm:$0xff] %v1612_v55   ;;  %vm803_vm9 = vcmp.gt.f32.partialorder %v1797_v59, 0.0  ;;  %v867_v1 = vmul.f32 0.2, %v1797_v59  ;;  %v833_v2 = vmul.f32 0.2, %v550_v63 }
 0x114   : > { %1667 = vst [vmem:[%s1981_s6 + $0x20] sm:$0xff] %v1527_v60   ;;  %1683 = vst [vmem:[%s1981_s6 + $0xa0] sm:$0xff] %v1607_v61   ;;  %v865_v3 = vmul.f32 0.2, %v678_v0  ;;  %v1766_v4 = vpop.f32.mrb[14].mxu0  ;;  %v1798_v5 = vpop.f32.mrb[14].mxu1  ;;  %v899_v6 = vsel %vm771_vm8, %v1765_v58, %v835_v62 }
 0x115   : > { %vm769_vm10 = vcmp.gt.f32.partialorder %v550_v63, 0.0  ;;  %vm772_vm11 = vcmp.gt.f32.partialorder %v1766_v4, 0.0  ;;  %v836_v7 = vmul.f32 0.2, %v1766_v4  ;;  %v553_v8 = vpop.f32.mrb[15].mxu0  ;;  %v681_v9 = vpop.f32.mrb[15].mxu1  ;;  %v931_v14 = vsel %vm803_vm9, %v1797_v59, %v867_v1 }
 0x116   : > { %vm801_vm12 = vcmp.gt.f32.partialorder %v678_v0, 0.0  ;;  %vm804_vm13 = vcmp.gt.f32.partialorder %v1798_v5, 0.0  ;;  %v868_v10 = vmul.f32 0.2, %v1798_v5  ;;  %vm770_vm14 = vcmp.gt.f32.partialorder %v553_v8, 0.0 }
 0x117   : > { %v900_v11 = vsel %vm772_vm11, %v1766_v4, %v836_v7  ;;  %v834_v12 = vmul.f32 0.2, %v553_v8  ;;  %vm802_vm15 = vcmp.gt.f32.partialorder %v681_v9, 0.0  ;;  %v866_v13 = vmul.f32 0.2, %v681_v9 }
 0x118   : > { %v897_v15 = vsel %vm769_vm10, %v550_v63, %v833_v2  ;;  %v1542_v16 = vpack.c.bf16 %v900_v11, %v899_v6  ;;  %v932_v17 = vsel %vm804_vm13, %v1798_v5, %v868_v10  ;;  %v929_v18 = vsel %vm801_vm12, %v678_v0, %v865_v3 }
 0x119   : > { %v1622_v19 = vpack.c.bf16 %v932_v17, %v931_v14  ;;  %v898_v20 = vsel %vm770_vm14, %v553_v8, %v834_v12  ;;  %v930_v21 = vsel %vm802_vm15, %v681_v9, %v866_v13  ;;  %v1769_v22 = vpop.f32.mrb[16].mxu0  ;;  %v1801_v23 = vpop.f32.mrb[16].mxu1 }
 0x11a   : > { %1670 = vst [vmem:[%s1981_s6 + $0x38] sm:$0xff] %v1542_v16   ;;  %v1537_v24 = vpack.c.bf16 %v898_v20, %v897_v15  ;;  %v1617_v25 = vpack.c.bf16 %v930_v21, %v929_v18  ;;  %vm775_vm0 = vcmp.gt.f32.partialorder %v1769_v22, 0.0  ;;  %v839_v26 = vmul.f32 0.2, %v1769_v22  ;;  %v566_v27 = vpop.f32.mrb[17].mxu0  ;;  %v694_v28 = vpop.f32.mrb[17].mxu1 }
 0x11b   : > { %1686 = vst [vmem:[%s1981_s6 + $0xb8] sm:$0xff] %v1622_v19   ;;  %vm807_vm1 = vcmp.gt.f32.partialorder %v1801_v23, 0.0  ;;  %v871_v29 = vmul.f32 0.2, %v1801_v23  ;;  %v837_v30 = vmul.f32 0.2, %v566_v27 }
 0x11c   : > { %1669 = vst [vmem:[%s1981_s6 + $0x30] sm:$0xff] %v1537_v24   ;;  %1685 = vst [vmem:[%s1981_s6 + $0xb0] sm:$0xff] %v1617_v25   ;;  %v869_v31 = vmul.f32 0.2, %v694_v28  ;;  %v1770_v32 = vpop.f32.mrb[18].mxu0  ;;  %v1802_v33 = vpop.f32.mrb[18].mxu1  ;;  %v903_v34 = vsel %vm775_vm0, %v1769_v22, %v839_v26 }
 0x11d   : > { %vm773_vm2 = vcmp.gt.f32.partialorder %v566_v27, 0.0  ;;  %vm776_vm3 = vcmp.gt.f32.partialorder %v1770_v32, 0.0  ;;  %v840_v35 = vmul.f32 0.2, %v1770_v32  ;;  %v569_v36 = vpop.f32.mrb[19].mxu0  ;;  %v697_v37 = vpop.f32.mrb[19].mxu1  ;;  %v935_v42 = vsel %vm807_vm1, %v1801_v23, %v871_v29 }
 0x11e   : > { %vm805_vm4 = vcmp.gt.f32.partialorder %v694_v28, 0.0  ;;  %vm808_vm5 = vcmp.gt.f32.partialorder %v1802_v33, 0.0  ;;  %v872_v38 = vmul.f32 0.2, %v1802_v33  ;;  %vm774_vm6 = vcmp.gt.f32.partialorder %v569_v36, 0.0 }
 0x11f   : > { %v904_v39 = vsel %vm776_vm3, %v1770_v32, %v840_v35  ;;  %v838_v40 = vmul.f32 0.2, %v569_v36  ;;  %vm806_vm7 = vcmp.gt.f32.partialorder %v697_v37, 0.0  ;;  %v870_v41 = vmul.f32 0.2, %v697_v37 }
 0x120   : > { %v901_v43 = vsel %vm773_vm2, %v566_v27, %v837_v30  ;;  %v1552_v44 = vpack.c.bf16 %v904_v39, %v903_v34  ;;  %v936_v45 = vsel %vm808_vm5, %v1802_v33, %v872_v38  ;;  %v933_v46 = vsel %vm805_vm4, %v694_v28, %v869_v31 }
 0x121   : > { %v1632_v47 = vpack.c.bf16 %v936_v45, %v935_v42  ;;  %v902_v48 = vsel %vm774_vm6, %v569_v36, %v838_v40  ;;  %v934_v49 = vsel %vm806_vm7, %v697_v37, %v870_v41  ;;  %v1773_v50 = vpop.f32.mrb[20].mxu0  ;;  %v1805_v51 = vpop.f32.mrb[20].mxu1 }
 0x122   : > { %1672 = vst [vmem:[%s1981_s6 + $0x48] sm:$0xff] %v1552_v44   ;;  %v1547_v52 = vpack.c.bf16 %v902_v48, %v901_v43  ;;  %v1627_v53 = vpack.c.bf16 %v934_v49, %v933_v46  ;;  %vm779_vm8 = vcmp.gt.f32.partialorder %v1773_v50, 0.0  ;;  %v843_v54 = vmul.f32 0.2, %v1773_v50  ;;  %v582_v55 = vpop.f32.mrb[21].mxu0  ;;  %v710_v56 = vpop.f32.mrb[21].mxu1 }
 0x123   : > { %1688 = vst [vmem:[%s1981_s6 + $0xc8] sm:$0xff] %v1632_v47   ;;  %vm811_vm9 = vcmp.gt.f32.partialorder %v1805_v51, 0.0  ;;  %v875_v57 = vmul.f32 0.2, %v1805_v51  ;;  %v841_v58 = vmul.f32 0.2, %v582_v55 }
 0x124   : > { %1671 = vst [vmem:[%s1981_s6 + $0x40] sm:$0xff] %v1547_v52   ;;  %1687 = vst [vmem:[%s1981_s6 + $0xc0] sm:$0xff] %v1627_v53   ;;  %v873_v59 = vmul.f32 0.2, %v710_v56  ;;  %v1774_v60 = vpop.f32.mrb[22].mxu0  ;;  %v1806_v61 = vpop.f32.mrb[22].mxu1  ;;  %v907_v62 = vsel %vm779_vm8, %v1773_v50, %v843_v54 }
 0x125   : > { %vm777_vm10 = vcmp.gt.f32.partialorder %v582_v55, 0.0  ;;  %vm780_vm11 = vcmp.gt.f32.partialorder %v1774_v60, 0.0  ;;  %v844_v63 = vmul.f32 0.2, %v1774_v60  ;;  %v585_v0 = vpop.f32.mrb[23].mxu0  ;;  %v713_v1 = vpop.f32.mrb[23].mxu1  ;;  %v939_v6 = vsel %vm811_vm9, %v1805_v51, %v875_v57 }
 0x126   : > { %vm809_vm12 = vcmp.gt.f32.partialorder %v710_v56, 0.0  ;;  %vm812_vm13 = vcmp.gt.f32.partialorder %v1806_v61, 0.0  ;;  %v876_v2 = vmul.f32 0.2, %v1806_v61  ;;  %vm778_vm14 = vcmp.gt.f32.partialorder %v585_v0, 0.0 }
 0x127   : > { %v908_v3 = vsel %vm780_vm11, %v1774_v60, %v844_v63  ;;  %v842_v4 = vmul.f32 0.2, %v585_v0  ;;  %vm810_vm15 = vcmp.gt.f32.partialorder %v713_v1, 0.0  ;;  %v874_v5 = vmul.f32 0.2, %v713_v1 }
 0x128   : > { %v905_v7 = vsel %vm777_vm10, %v582_v55, %v841_v58  ;;  %v1562_v8 = vpack.c.bf16 %v908_v3, %v907_v62  ;;  %v940_v9 = vsel %vm812_vm13, %v1806_v61, %v876_v2  ;;  %v937_v10 = vsel %vm809_vm12, %v710_v56, %v873_v59 }
 0x129   : > { %v1642_v11 = vpack.c.bf16 %v940_v9, %v939_v6  ;;  %v906_v12 = vsel %vm778_vm14, %v585_v0, %v842_v4  ;;  %v938_v13 = vsel %vm810_vm15, %v713_v1, %v874_v5  ;;  %v1777_v14 = vpop.f32.mrb[24].mxu0  ;;  %v1809_v15 = vpop.f32.mrb[24].mxu1 }
 0x12a   : > { %1674 = vst [vmem:[%s1981_s6 + $0x58] sm:$0xff] %v1562_v8   ;;  %v1557_v16 = vpack.c.bf16 %v906_v12, %v905_v7  ;;  %v1637_v17 = vpack.c.bf16 %v938_v13, %v937_v10  ;;  %vm783_vm0 = vcmp.gt.f32.partialorder %v1777_v14, 0.0  ;;  %v847_v18 = vmul.f32 0.2, %v1777_v14  ;;  %v598_v19 = vpop.f32.mrb[25].mxu0  ;;  %v726_v20 = vpop.f32.mrb[25].mxu1 }
 0x12b   : > { %1690 = vst [vmem:[%s1981_s6 + $0xd8] sm:$0xff] %v1642_v11   ;;  %vm815_vm1 = vcmp.gt.f32.partialorder %v1809_v15, 0.0  ;;  %v879_v21 = vmul.f32 0.2, %v1809_v15  ;;  %v845_v22 = vmul.f32 0.2, %v598_v19 }
 0x12c   : > { %1673 = vst [vmem:[%s1981_s6 + $0x50] sm:$0xff] %v1557_v16   ;;  %1689 = vst [vmem:[%s1981_s6 + $0xd0] sm:$0xff] %v1637_v17   ;;  %v877_v23 = vmul.f32 0.2, %v726_v20  ;;  %v1778_v24 = vpop.f32.mrb[26].mxu0  ;;  %v1810_v25 = vpop.f32.mrb[26].mxu1  ;;  %v911_v26 = vsel %vm783_vm0, %v1777_v14, %v847_v18 }
 0x12d   : > { %vm781_vm2 = vcmp.gt.f32.partialorder %v598_v19, 0.0  ;;  %vm784_vm3 = vcmp.gt.f32.partialorder %v1778_v24, 0.0  ;;  %v848_v27 = vmul.f32 0.2, %v1778_v24  ;;  %v601_v28 = vpop.f32.mrb[27].mxu0  ;;  %v729_v29 = vpop.f32.mrb[27].mxu1  ;;  %v943_v34 = vsel %vm815_vm1, %v1809_v15, %v879_v21 }
 0x12e   : > { %vm813_vm4 = vcmp.gt.f32.partialorder %v726_v20, 0.0  ;;  %vm816_vm5 = vcmp.gt.f32.partialorder %v1810_v25, 0.0  ;;  %v880_v30 = vmul.f32 0.2, %v1810_v25  ;;  %vm782_vm6 = vcmp.gt.f32.partialorder %v601_v28, 0.0 }
 0x12f   : > { %v912_v31 = vsel %vm784_vm3, %v1778_v24, %v848_v27  ;;  %v846_v32 = vmul.f32 0.2, %v601_v28  ;;  %vm814_vm7 = vcmp.gt.f32.partialorder %v729_v29, 0.0  ;;  %v878_v33 = vmul.f32 0.2, %v729_v29 }
 0x130   : > { %v909_v35 = vsel %vm781_vm2, %v598_v19, %v845_v22  ;;  %v1572_v36 = vpack.c.bf16 %v912_v31, %v911_v26  ;;  %v944_v37 = vsel %vm816_vm5, %v1810_v25, %v880_v30  ;;  %v941_v38 = vsel %vm813_vm4, %v726_v20, %v877_v23 }
 0x131   : > { %v1652_v39 = vpack.c.bf16 %v944_v37, %v943_v34  ;;  %v910_v40 = vsel %vm782_vm6, %v601_v28, %v846_v32  ;;  %v942_v41 = vsel %vm814_vm7, %v729_v29, %v878_v33  ;;  %v1781_v42 = vpop.f32.mrb[28].mxu0  ;;  %v1813_v43 = vpop.f32.mrb[28].mxu1 }
 0x132   : > { %1676 = vst [vmem:[%s1981_s6 + $0x68] sm:$0xff] %v1572_v36   ;;  %v1567_v44 = vpack.c.bf16 %v910_v40, %v909_v35  ;;  %v1647_v45 = vpack.c.bf16 %v942_v41, %v941_v38  ;;  %vm787_vm8 = vcmp.gt.f32.partialorder %v1781_v42, 0.0  ;;  %v851_v46 = vmul.f32 0.2, %v1781_v42  ;;  %v614_v47 = vpop.f32.mrb[29].mxu0  ;;  %v742_v48 = vpop.f32.mrb[29].mxu1 }
 0x133   : > { %1692 = vst [vmem:[%s1981_s6 + $0xe8] sm:$0xff] %v1652_v39   ;;  %vm819_vm9 = vcmp.gt.f32.partialorder %v1813_v43, 0.0  ;;  %v883_v49 = vmul.f32 0.2, %v1813_v43  ;;  %v849_v50 = vmul.f32 0.2, %v614_v47 }
 0x134   : > { %1675 = vst [vmem:[%s1981_s6 + $0x60] sm:$0xff] %v1567_v44   ;;  %1691 = vst [vmem:[%s1981_s6 + $0xe0] sm:$0xff] %v1647_v45   ;;  %v881_v51 = vmul.f32 0.2, %v742_v48  ;;  %v1782_v52 = vpop.f32.mrb[30].mxu0  ;;  %v1814_v53 = vpop.f32.mrb[30].mxu1  ;;  %v915_v54 = vsel %vm787_vm8, %v1781_v42, %v851_v46 }
 0x135   : > { %vm785_vm10 = vcmp.gt.f32.partialorder %v614_v47, 0.0  ;;  %vm788_vm11 = vcmp.gt.f32.partialorder %v1782_v52, 0.0  ;;  %v852_v55 = vmul.f32 0.2, %v1782_v52  ;;  %v617_v56 = vpop.f32.mrb[31].mxu0  ;;  %v745_v57 = vpop.f32.mrb[31].mxu1  ;;  %v947_v62 = vsel %vm819_vm9, %v1813_v43, %v883_v49 }
 0x136   : > { %vm817_vm12 = vcmp.gt.f32.partialorder %v742_v48, 0.0  ;;  %vm820_vm13 = vcmp.gt.f32.partialorder %v1814_v53, 0.0  ;;  %v884_v58 = vmul.f32 0.2, %v1814_v53  ;;  %vm786_vm14 = vcmp.gt.f32.partialorder %v617_v56, 0.0 }
 0x137   : > { %v916_v59 = vsel %vm788_vm11, %v1782_v52, %v852_v55  ;;  %v850_v60 = vmul.f32 0.2, %v617_v56  ;;  %vm818_vm15 = vcmp.gt.f32.partialorder %v745_v57, 0.0  ;;  %v882_v61 = vmul.f32 0.2, %v745_v57 }
 0x138   : > { %v913_v63 = vsel %vm785_vm10, %v614_v47, %v849_v50  ;;  %v1582_v0 = vpack.c.bf16 %v916_v59, %v915_v54  ;;  %v948_v1 = vsel %vm820_vm13, %v1814_v53, %v884_v58  ;;  %v945_v2 = vsel %vm817_vm12, %v742_v48, %v881_v51 }
 0x139   : > { %v1662_v3 = vpack.c.bf16 %v948_v1, %v947_v62  ;;  %v914_v4 = vsel %vm786_vm14, %v617_v56, %v850_v60  ;;  %v946_v5 = vsel %vm818_vm15, %v745_v57, %v882_v61 }
 0x13a   : > { %1678 = vst [vmem:[%s1981_s6 + $0x78] sm:$0xff] %v1582_v0   ;;  %v1577_v6 = vpack.c.bf16 %v914_v4, %v913_v63  ;;  %v1657_v7 = vpack.c.bf16 %v946_v5, %v945_v2 }
 0x13b   : > { %1694 = vst [vmem:[%s1981_s6 + $0xf8] sm:$0xff] %v1662_v3  }
 0x13c   : > { %1677 = vst [vmem:[%s1981_s6 + $0x70] sm:$0xff] %v1577_v6   ;;  %1693 = vst [vmem:[%s1981_s6 + $0xf0] sm:$0xff] %v1657_v7  }
 0x13d PF: > { %s12_s9 = sadd.s32 1, %s1885_s9  }
 0x13e   : > { %p9_p4 = scmp.ge.s32.totalorder %s12_s9, 6  }
 0x140   :  { %11 = sbr.rel (!%p9_p4) target bundleno = 1 (0x1), region = 58 }

// kernel: discriminator_forward.9
= control target key start
LH: loop header
LB: loop body
LE: loop exit
PB: predicated region body
PF: predicated region fallthrough
CT: control target
= control target key end

     0   :  { %s2126_s1 = inlined_call_operand.vmem [shape: bf16[128,128], index: 1, kind: input, shape index: {}]   ;;  %s2127_s0 = inlined_call_operand.vmem [shape: bf16[512,128], index: 0, kind: input, shape index: {}]   ;;  %s2128_s2 = inlined_call_operand.vmem [shape: bf16[512,128], index: 2, kind: output, shape index: {0}]   ;;  %s2129_s3 = inlined_call_operand.vmem [shape: f32[1,8,128], index: 3, kind: output, shape index: {1}]  }
   0x1   :  { %v1655_v0 = vld [vmem:[%s2126_s1] sm:$0xff]   ;;  %v1656_v1 = vld [vmem:[%s2126_s1 + $0x8] sm:$0xff]   ;;  %v1657_v2 = vld [vmem:[%s2126_s1 + $0x10] sm:$0xff]  }
   0x2   :  { %1559 = vmatprep.subr.bf16.mxu0 %v1655_v0  ;;  %1639 = vmatprep.subr.bf16.mxu1 %v1655_v0  ;;  %v1658_v3 = vld [vmem:[%s2126_s1 + $0x18] sm:$0xff]   ;;  %v1663_v4 = vld [vmem:[%s2127_s0] sm:$0xff]   ;;  %v1660_v6 = vld [vmem:[%s2126_s1 + $0x28] sm:$0xff]  }
   0x3   :  { %1560 = vmatpush3.bf16.msra.mxu0 %v1655_v0  ;;  %1647 = vmatpush3.bf16.msra.mxu1 %v1655_v0  ;;  %v1659_v5 = vld [vmem:[%s2126_s1 + $0x20] sm:$0xff]   ;;  %v1661_v7 = vld [vmem:[%s2126_s1 + $0x30] sm:$0xff]   ;;  %v1662_v8 = vld [vmem:[%s2126_s1 + $0x38] sm:$0xff]  }
   0x4   :  { %1561 = vmatprep.subr.bf16.mxu0 %v1656_v1  ;;  %1640 = vmatprep.subr.bf16.mxu1 %v1656_v1  ;;  %v1679_v9 = vld [vmem:[%s2127_s0 + $0x80] sm:$0xff]   ;;  %v1664_v10 = vld [vmem:[%s2127_s0 + $0x8] sm:$0xff]   ;;  %v1665_v11 = vld [vmem:[%s2127_s0 + $0x10] sm:$0xff]  }
   0x5   :  { %1575 = vmatprep.mubr.bf16.mxu0 %v1663_v4  ;;  %1607 = vmatprep.mubr.bf16.mxu1 %v1679_v9  ;;  %v1680_v12 = vld [vmem:[%s2127_s0 + $0x88] sm:$0xff]   ;;  %v1681_v13 = vld [vmem:[%s2127_s0 + $0x90] sm:$0xff]   ;;  %v1666_v14 = vld [vmem:[%s2127_s0 + $0x18] sm:$0xff]  }
   0x6   :  { %v1667_v15 = vld [vmem:[%s2127_s0 + $0x20] sm:$0xff]   ;;  %v1682_v16 = vld [vmem:[%s2127_s0 + $0x98] sm:$0xff]   ;;  %v1668_v18 = vld [vmem:[%s2127_s0 + $0x28] sm:$0xff]  }
   0x7   :  { %1562 = vmatpush3.bf16.msra.mxu0 %v1656_v1  ;;  %1648 = vmatpush3.bf16.msra.mxu1 %v1656_v1  ;;  %v1683_v17 = vld [vmem:[%s2127_s0 + $0xa0] sm:$0xff]   ;;  %v1684_v19 = vld [vmem:[%s2127_s0 + $0xa8] sm:$0xff]   ;;  %v1669_v20 = vld [vmem:[%s2127_s0 + $0x30] sm:$0xff]  }
   0x8   :  { %1563 = vmatprep.subr.bf16.mxu0 %v1657_v2  ;;  %1641 = vmatprep.subr.bf16.mxu1 %v1657_v2  ;;  %v1685_v21 = vld [vmem:[%s2127_s0 + $0xb0] sm:$0xff]   ;;  %v1670_v22 = vld [vmem:[%s2127_s0 + $0x38] sm:$0xff]   ;;  %v1671_v24 = vld [vmem:[%s2127_s0 + $0x40] sm:$0xff]  }
   0x9   :  { %v1686_v23 = vld [vmem:[%s2127_s0 + $0xb8] sm:$0xff]   ;;  %v1687_v25 = vld [vmem:[%s2127_s0 + $0xc0] sm:$0xff]   ;;  %v1672_v26 = vld [vmem:[%s2127_s0 + $0x48] sm:$0xff]  }
   0xa   :  { %v1688_v27 = vld [vmem:[%s2127_s0 + $0xc8] sm:$0xff]   ;;  %v1673_v28 = vld [vmem:[%s2127_s0 + $0x50] sm:$0xff]   ;;  %v1674_v30 = vld [vmem:[%s2127_s0 + $0x58] sm:$0xff]  }
   0xb   :  { %1564 = vmatpush3.bf16.msra.mxu0 %v1657_v2  ;;  %1649 = vmatpush3.bf16.msra.mxu1 %v1657_v2  ;;  %v1689_v29 = vld [vmem:[%s2127_s0 + $0xd0] sm:$0xff]   ;;  %v1690_v31 = vld [vmem:[%s2127_s0 + $0xd8] sm:$0xff]   ;;  %v1675_v32 = vld [vmem:[%s2127_s0 + $0x60] sm:$0xff]  }
   0xc   :  { %1565 = vmatprep.subr.bf16.mxu0 %v1658_v3  ;;  %1642 = vmatprep.subr.bf16.mxu1 %v1658_v3  ;;  %v1691_v33 = vld [vmem:[%s2127_s0 + $0xe0] sm:$0xff]   ;;  %v1676_v34 = vld [vmem:[%s2127_s0 + $0x68] sm:$0xff]   ;;  %v1677_v36 = vld [vmem:[%s2127_s0 + $0x70] sm:$0xff]  }
   0xd   :  { %v1692_v35 = vld [vmem:[%s2127_s0 + $0xe8] sm:$0xff]   ;;  %v1693_v37 = vld [vmem:[%s2127_s0 + $0xf0] sm:$0xff]   ;;  %v1678_v38 = vld [vmem:[%s2127_s0 + $0x78] sm:$0xff]  }
   0xe   :  { %v1694_v39 = vld [vmem:[%s2127_s0 + $0xf8] sm:$0xff]  }
   0xf   :  { %1566 = vmatpush3.bf16.msra.mxu0 %v1658_v3  ;;  %1650 = vmatpush3.bf16.msra.mxu1 %v1658_v3 }
  0x10   :  { %1567 = vmatprep.subr.bf16.mxu0 %v1659_v5  ;;  %1643 = vmatprep.subr.bf16.mxu1 %v1659_v5 }
  0x13   :  { %1568 = vmatpush3.bf16.msra.mxu0 %v1659_v5  ;;  %1651 = vmatpush3.bf16.msra.mxu1 %v1659_v5 }
  0x14   :  { %1569 = vmatprep.subr.bf16.mxu0 %v1660_v6  ;;  %1644 = vmatprep.subr.bf16.mxu1 %v1660_v6 }
  0x17   :  { %1570 = vmatpush3.bf16.msra.mxu0 %v1660_v6  ;;  %1652 = vmatpush3.bf16.msra.mxu1 %v1660_v6 }
  0x18   :  { %1571 = vmatprep.subr.bf16.mxu0 %v1661_v7  ;;  %1645 = vmatprep.subr.bf16.mxu1 %v1661_v7 }
  0x1b   :  { %1572 = vmatpush3.bf16.msra.mxu0 %v1661_v7  ;;  %1653 = vmatpush3.bf16.msra.mxu1 %v1661_v7 }
  0x1c   :  { %1573 = vmatprep.subr.bf16.mxu0 %v1662_v8  ;;  %1646 = vmatprep.subr.bf16.mxu1 %v1662_v8 }
  0x1f   :  { %1574 = vmatpush3.bf16.msra.mxu0 %v1662_v8  ;;  %1654 = vmatpush3.bf16.msra.mxu1 %v1662_v8 }
  0x22   :  { %1576 = vmatmul.mubr.bf16.vlgmr.msra.gmra.mrb[0].mxu0 %v1664_v10  ;;  %1608 = vmatmul.mubr.bf16.vlgmr.msra.gmra.mrb[0].mxu1 %v1680_v12 }
  0x23   :  { %1579 = vmatprep.mubr.bf16.mxu0 %v1665_v11  ;;  %1611 = vmatprep.mubr.bf16.mxu1 %v1681_v13 }
  0x2a   :  { %1580 = vmatmul.mubr.bf16.gmra.mrb[4].mxu0 %v1666_v14  ;;  %1612 = vmatmul.mubr.bf16.gmra.mrb[4].mxu1 %v1682_v16 }
  0x2b   :  { %1583 = vmatprep.mubr.bf16.mxu0 %v1667_v15  ;;  %1615 = vmatprep.mubr.bf16.mxu1 %v1683_v17 }
  0x32   :  { %1584 = vmatmul.mubr.bf16.gmra.mrb[8].mxu0 %v1668_v18  ;;  %1616 = vmatmul.mubr.bf16.gmra.mrb[8].mxu1 %v1684_v19 }
  0x33   :  { %1587 = vmatprep.mubr.bf16.mxu0 %v1669_v20  ;;  %1619 = vmatprep.mubr.bf16.mxu1 %v1685_v21 }
  0x3a   :  { %1588 = vmatmul.mubr.bf16.gmra.mrb[12].mxu0 %v1670_v22  ;;  %1620 = vmatmul.mubr.bf16.gmra.mrb[12].mxu1 %v1686_v23 }
  0x3b   :  { %1591 = vmatprep.mubr.bf16.mxu0 %v1671_v24  ;;  %1623 = vmatprep.mubr.bf16.mxu1 %v1687_v25 }
  0x42   :  { %1592 = vmatmul.mubr.bf16.gmra.mrb[16].mxu0 %v1672_v26  ;;  %1624 = vmatmul.mubr.bf16.gmra.mrb[16].mxu1 %v1688_v27 }
  0x43   :  { %1595 = vmatprep.mubr.bf16.mxu0 %v1673_v28  ;;  %1627 = vmatprep.mubr.bf16.mxu1 %v1689_v29 }
  0x4a   :  { %1596 = vmatmul.mubr.bf16.gmra.mrb[20].mxu0 %v1674_v30  ;;  %1628 = vmatmul.mubr.bf16.gmra.mrb[20].mxu1 %v1690_v31 }
  0x4b   :  { %1599 = vmatprep.mubr.bf16.mxu0 %v1675_v32  ;;  %1631 = vmatprep.mubr.bf16.mxu1 %v1691_v33 }
  0x52   :  { %1600 = vmatmul.mubr.bf16.gmra.mrb[24].mxu0 %v1676_v34  ;;  %1632 = vmatmul.mubr.bf16.gmra.mrb[24].mxu1 %v1692_v35 }
  0x53   :  { %1603 = vmatprep.mubr.bf16.mxu0 %v1677_v36  ;;  %1635 = vmatprep.mubr.bf16.mxu1 %v1693_v37 }
  0x5a   :  { %1604 = vmatmul.mubr.bf16.gmra.mrb[28].mxu0 %v1678_v38  ;;  %1636 = vmatmul.mubr.bf16.gmra.mrb[28].mxu1 %v1694_v39 }
  0xf5   :  { %v1577_v40 = vpop.f32.mrb[0].mxu0  ;;  %v1835_v41 = vpop.f32.mrb[0].mxu1 }
  0xf6   :  { %v368_v42 = vpop.f32.mrb[1].mxu0  ;;  %v1837_v43 = vpop.f32.mrb[1].mxu1  ;;  %v1014_v55 = vmul.f32 %v1577_v40, %v1577_v40 }
  0xf7   :  { %v1578_v44 = vpop.f32.mrb[2].mxu0  ;;  %v1839_v45 = vpop.f32.mrb[2].mxu1  ;;  %v1012_v46 = vmul.f32 %v368_v42, %v368_v42 }
  0xf8   :  { %v1336_v47 = vpack.c.bf16 %v1578_v44, %v1577_v40  ;;  %v371_v48 = vpop.f32.mrb[3].mxu0  ;;  %v1416_v49 = vpack.c.bf16 %v1839_v45, %v1835_v41  ;;  %v1843_v50 = vpop.f32.mrb[3].mxu1  ;;  %v1015_v58 = vmul.f32 %v1578_v44, %v1578_v44 }
  0xf9   :  { %v1331_v51 = vpack.c.bf16 %v371_v48, %v368_v42  ;;  %v943_v52 = vadd.f32 %v371_v48, %v368_v42  ;;  %v1013_v53 = vmul.f32 %v371_v48, %v371_v48  ;;  %v1411_v54 = vpack.c.bf16 %v1843_v50, %v1837_v43 }
  0xfa   :  { %1488 = vst [vmem:[%s2128_s2 + $0x8] sm:$0xff] %v1336_v47   ;;  %1504 = vst [vmem:[%s2128_s2 + $0x88] sm:$0xff] %v1416_v49  }
  0xfb   :  { %1332 = vst [vmem:[%s2128_s2] sm:$0xff] %v1331_v51   ;;  %v944_v56 = vadd.f32 %v1577_v40, %v943_v52  ;;  %v1076_v57 = vadd.f32 %v1013_v53, %v1012_v46  ;;  %1503 = vst [vmem:[%s2128_s2 + $0x80] sm:$0xff] %v1411_v54  }
  0xfd   :  { %v1077_v59 = vadd.f32 %v1076_v57, %v1014_v55  ;;  %v1581_v60 = vpop.f32.mrb[4].mxu0  ;;  %v945_v61 = vadd.f32 %v1578_v44, %v944_v56  ;;  %v1859_v62 = vpop.f32.mrb[4].mxu1 }
  0xfe   :  { %v384_v63 = vpop.f32.mrb[5].mxu0  ;;  %v1861_v0 = vpop.f32.mrb[5].mxu1  ;;  %v1018_v15 = vmul.f32 %v1581_v60, %v1581_v60 }
  0xff   :  { %v946_v1 = vadd.f32 %v945_v61, %v384_v63  ;;  %v1016_v2 = vmul.f32 %v384_v63, %v384_v63  ;;  %v1078_v3 = vadd.f32 %v1077_v59, %v1015_v58  ;;  %v1582_v4 = vpop.f32.mrb[6].mxu0  ;;  %v1863_v5 = vpop.f32.mrb[6].mxu1 }
 0x100   :  { %v1346_v6 = vpack.c.bf16 %v1582_v4, %v1581_v60  ;;  %v387_v7 = vpop.f32.mrb[7].mxu0  ;;  %v1426_v8 = vpack.c.bf16 %v1863_v5, %v1859_v62  ;;  %v1867_v9 = vpop.f32.mrb[7].mxu1  ;;  %v1019_v18 = vmul.f32 %v1582_v4, %v1582_v4 }
 0x101   :  { %v1079_v10 = vadd.f32 %v1078_v3, %v1016_v2  ;;  %v1341_v11 = vpack.c.bf16 %v387_v7, %v384_v63  ;;  %v947_v12 = vadd.f32 %v946_v1, %v387_v7  ;;  %v1017_v13 = vmul.f32 %v387_v7, %v387_v7 }
 0x102   :  { %1490 = vst [vmem:[%s2128_s2 + $0x18] sm:$0xff] %v1346_v6   ;;  %1506 = vst [vmem:[%s2128_s2 + $0x98] sm:$0xff] %v1426_v8   ;;  %v1421_v14 = vpack.c.bf16 %v1867_v9, %v1861_v0 }
 0x103   :  { %1489 = vst [vmem:[%s2128_s2 + $0x10] sm:$0xff] %v1341_v11   ;;  %v948_v16 = vadd.f32 %v1581_v60, %v947_v12  ;;  %v1080_v17 = vadd.f32 %v1079_v10, %v1017_v13 }
 0x104   :  { %1505 = vst [vmem:[%s2128_s2 + $0x90] sm:$0xff] %v1421_v14  }
 0x105   :  { %v1081_v19 = vadd.f32 %v1080_v17, %v1018_v15  ;;  %v1585_v20 = vpop.f32.mrb[8].mxu0  ;;  %v949_v21 = vadd.f32 %v1582_v4, %v948_v16  ;;  %v1883_v22 = vpop.f32.mrb[8].mxu1 }
 0x106   :  { %v400_v23 = vpop.f32.mrb[9].mxu0  ;;  %v1885_v24 = vpop.f32.mrb[9].mxu1  ;;  %v1022_v39 = vmul.f32 %v1585_v20, %v1585_v20 }
 0x107   :  { %v950_v25 = vadd.f32 %v949_v21, %v400_v23  ;;  %v1020_v26 = vmul.f32 %v400_v23, %v400_v23  ;;  %v1082_v27 = vadd.f32 %v1081_v19, %v1019_v18  ;;  %v1586_v28 = vpop.f32.mrb[10].mxu0  ;;  %v1887_v29 = vpop.f32.mrb[10].mxu1 }
 0x108   :  { %v1356_v30 = vpack.c.bf16 %v1586_v28, %v1585_v20  ;;  %v403_v31 = vpop.f32.mrb[11].mxu0  ;;  %v1436_v32 = vpack.c.bf16 %v1887_v29, %v1883_v22  ;;  %v1891_v33 = vpop.f32.mrb[11].mxu1  ;;  %v1023_v44 = vmul.f32 %v1586_v28, %v1586_v28 }
 0x109   :  { %v1083_v34 = vadd.f32 %v1082_v27, %v1020_v26  ;;  %v1351_v35 = vpack.c.bf16 %v403_v31, %v400_v23  ;;  %v951_v36 = vadd.f32 %v950_v25, %v403_v31  ;;  %v1021_v37 = vmul.f32 %v403_v31, %v403_v31 }
 0x10a   :  { %1492 = vst [vmem:[%s2128_s2 + $0x28] sm:$0xff] %v1356_v30   ;;  %1508 = vst [vmem:[%s2128_s2 + $0xa8] sm:$0xff] %v1436_v32   ;;  %v1431_v38 = vpack.c.bf16 %v1891_v33, %v1885_v24 }
 0x10b   :  { %1491 = vst [vmem:[%s2128_s2 + $0x20] sm:$0xff] %v1351_v35   ;;  %v952_v40 = vadd.f32 %v1585_v20, %v951_v36  ;;  %v1084_v42 = vadd.f32 %v1083_v34, %v1021_v37 }
 0x10c   :  { %1507 = vst [vmem:[%s2128_s2 + $0xa0] sm:$0xff] %v1431_v38  }
 0x10d   :  { %v1085_v46 = vadd.f32 %v1084_v42, %v1022_v39  ;;  %v1589_v47 = vpop.f32.mrb[12].mxu0  ;;  %v953_v48 = vadd.f32 %v1586_v28, %v952_v40  ;;  %v1907_v49 = vpop.f32.mrb[12].mxu1 }
 0x10e   :  { %v416_v51 = vpop.f32.mrb[13].mxu0  ;;  %v1909_v52 = vpop.f32.mrb[13].mxu1  ;;  %v1026_v6 = vmul.f32 %v1589_v47, %v1589_v47 }
 0x10f   :  { %v954_v53 = vadd.f32 %v953_v48, %v416_v51  ;;  %v1024_v54 = vmul.f32 %v416_v51, %v416_v51  ;;  %v1086_v55 = vadd.f32 %v1085_v46, %v1023_v44  ;;  %v1590_v56 = vpop.f32.mrb[14].mxu0  ;;  %v1911_v57 = vpop.f32.mrb[14].mxu1 }
 0x110   :  { %v1366_v58 = vpack.c.bf16 %v1590_v56, %v1589_v47  ;;  %v419_v59 = vpop.f32.mrb[15].mxu0  ;;  %v1446_v60 = vpack.c.bf16 %v1911_v57, %v1907_v49  ;;  %v1915_v61 = vpop.f32.mrb[15].mxu1  ;;  %v1027_v10 = vmul.f32 %v1590_v56, %v1590_v56 }
 0x111   :  { %v1087_v63 = vadd.f32 %v1086_v55, %v1024_v54  ;;  %v1361_v1 = vpack.c.bf16 %v419_v59, %v416_v51  ;;  %v955_v2 = vadd.f32 %v954_v53, %v419_v59  ;;  %v1025_v3 = vmul.f32 %v419_v59, %v419_v59 }
 0x112   :  { %1494 = vst [vmem:[%s2128_s2 + $0x38] sm:$0xff] %v1366_v58   ;;  %1510 = vst [vmem:[%s2128_s2 + $0xb8] sm:$0xff] %v1446_v60   ;;  %v1441_v4 = vpack.c.bf16 %v1915_v61, %v1909_v52 }
 0x113   :  { %1493 = vst [vmem:[%s2128_s2 + $0x30] sm:$0xff] %v1361_v1   ;;  %v956_v7 = vadd.f32 %v1589_v47, %v955_v2  ;;  %v1088_v8 = vadd.f32 %v1087_v63, %v1025_v3 }
 0x114   :  { %1509 = vst [vmem:[%s2128_s2 + $0xb0] sm:$0xff] %v1441_v4  }
 0x115   :  { %v1089_v11 = vadd.f32 %v1088_v8, %v1026_v6  ;;  %v1593_v12 = vpop.f32.mrb[16].mxu0  ;;  %v957_v13 = vadd.f32 %v1590_v56, %v956_v7  ;;  %v1931_v14 = vpop.f32.mrb[16].mxu1 }
 0x116   :  { %v432_v15 = vpop.f32.mrb[17].mxu0  ;;  %v1933_v16 = vpop.f32.mrb[17].mxu1  ;;  %v1030_v35 = vmul.f32 %v1593_v12, %v1593_v12 }
 0x117   :  { %v958_v17 = vadd.f32 %v957_v13, %v432_v15  ;;  %v1028_v18 = vmul.f32 %v432_v15, %v432_v15  ;;  %v1090_v19 = vadd.f32 %v1089_v11, %v1027_v10  ;;  %v1594_v20 = vpop.f32.mrb[18].mxu0  ;;  %v1935_v21 = vpop.f32.mrb[18].mxu1 }
 0x118   :  { %v1376_v23 = vpack.c.bf16 %v1594_v20, %v1593_v12  ;;  %v435_v25 = vpop.f32.mrb[19].mxu0  ;;  %v1456_v26 = vpack.c.bf16 %v1935_v21, %v1931_v14  ;;  %v1939_v27 = vpop.f32.mrb[19].mxu1  ;;  %v1031_v38 = vmul.f32 %v1594_v20, %v1594_v20 }
 0x119   :  { %v1091_v28 = vadd.f32 %v1090_v19, %v1028_v18  ;;  %v1371_v30 = vpack.c.bf16 %v435_v25, %v432_v15  ;;  %v959_v31 = vadd.f32 %v958_v17, %v435_v25  ;;  %v1029_v32 = vmul.f32 %v435_v25, %v435_v25 }
 0x11a   :  { %1496 = vst [vmem:[%s2128_s2 + $0x48] sm:$0xff] %v1376_v23   ;;  %1512 = vst [vmem:[%s2128_s2 + $0xc8] sm:$0xff] %v1456_v26   ;;  %v1451_v34 = vpack.c.bf16 %v1939_v27, %v1933_v16 }
 0x11b   :  { %1495 = vst [vmem:[%s2128_s2 + $0x40] sm:$0xff] %v1371_v30   ;;  %v960_v36 = vadd.f32 %v1593_v12, %v959_v31  ;;  %v1092_v37 = vadd.f32 %v1091_v28, %v1029_v32 }
 0x11c   :  { %1511 = vst [vmem:[%s2128_s2 + $0xc0] sm:$0xff] %v1451_v34  }
 0x11d   :  { %v1093_v39 = vadd.f32 %v1092_v37, %v1030_v35  ;;  %v1597_v40 = vpop.f32.mrb[20].mxu0  ;;  %v961_v42 = vadd.f32 %v1594_v20, %v960_v36  ;;  %v1955_v44 = vpop.f32.mrb[20].mxu1 }
 0x11e   :  { %v448_v46 = vpop.f32.mrb[21].mxu0  ;;  %v1957_v47 = vpop.f32.mrb[21].mxu1  ;;  %v1034_v6 = vmul.f32 %v1597_v40, %v1597_v40 }
 0x11f   :  { %v962_v48 = vadd.f32 %v961_v42, %v448_v46  ;;  %v1032_v51 = vmul.f32 %v448_v46, %v448_v46  ;;  %v1094_v53 = vadd.f32 %v1093_v39, %v1031_v38  ;;  %v1598_v54 = vpop.f32.mrb[22].mxu0  ;;  %v1959_v55 = vpop.f32.mrb[22].mxu1 }
 0x120   :  { %v1386_v56 = vpack.c.bf16 %v1598_v54, %v1597_v40  ;;  %v451_v58 = vpop.f32.mrb[23].mxu0  ;;  %v1466_v59 = vpack.c.bf16 %v1959_v55, %v1955_v44  ;;  %v1963_v60 = vpop.f32.mrb[23].mxu1  ;;  %v1035_v10 = vmul.f32 %v1598_v54, %v1598_v54 }
 0x121   :  { %v1095_v63 = vadd.f32 %v1094_v53, %v1032_v51  ;;  %v1381_v1 = vpack.c.bf16 %v451_v58, %v448_v46  ;;  %v963_v2 = vadd.f32 %v962_v48, %v451_v58  ;;  %v1033_v3 = vmul.f32 %v451_v58, %v451_v58 }
 0x122   :  { %1498 = vst [vmem:[%s2128_s2 + $0x58] sm:$0xff] %v1386_v56   ;;  %1514 = vst [vmem:[%s2128_s2 + $0xd8] sm:$0xff] %v1466_v59   ;;  %v1461_v4 = vpack.c.bf16 %v1963_v60, %v1957_v47 }
 0x123   :  { %1497 = vst [vmem:[%s2128_s2 + $0x50] sm:$0xff] %v1381_v1   ;;  %v964_v7 = vadd.f32 %v1597_v40, %v963_v2  ;;  %v1096_v8 = vadd.f32 %v1095_v63, %v1033_v3 }
 0x124   :  { %1513 = vst [vmem:[%s2128_s2 + $0xd0] sm:$0xff] %v1461_v4  }
 0x125   :  { %v1097_v11 = vadd.f32 %v1096_v8, %v1034_v6  ;;  %v1601_v12 = vpop.f32.mrb[24].mxu0  ;;  %v965_v13 = vadd.f32 %v1598_v54, %v964_v7  ;;  %v1979_v15 = vpop.f32.mrb[24].mxu1 }
 0x126   :  { %v464_v17 = vpop.f32.mrb[25].mxu0  ;;  %v1981_v18 = vpop.f32.mrb[25].mxu1  ;;  %v1038_v39 = vmul.f32 %v1601_v12, %v1601_v12 }
 0x127   :  { %v966_v19 = vadd.f32 %v965_v13, %v464_v17  ;;  %v1036_v20 = vmul.f32 %v464_v17, %v464_v17  ;;  %v1098_v23 = vadd.f32 %v1097_v11, %v1035_v10  ;;  %v1602_v25 = vpop.f32.mrb[26].mxu0  ;;  %v1983_v26 = vpop.f32.mrb[26].mxu1 }
 0x128   :  { %v1396_v28 = vpack.c.bf16 %v1602_v25, %v1601_v12  ;;  %v467_v30 = vpop.f32.mrb[27].mxu0  ;;  %v1476_v31 = vpack.c.bf16 %v1983_v26, %v1979_v15  ;;  %v1987_v32 = vpop.f32.mrb[27].mxu1  ;;  %v1039_v46 = vmul.f32 %v1602_v25, %v1602_v25 }
 0x129   :  { %v1099_v34 = vadd.f32 %v1098_v23, %v1036_v20  ;;  %v1391_v35 = vpack.c.bf16 %v467_v30, %v464_v17  ;;  %v967_v36 = vadd.f32 %v966_v19, %v467_v30  ;;  %v1037_v37 = vmul.f32 %v467_v30, %v467_v30 }
 0x12a   :  { %1500 = vst [vmem:[%s2128_s2 + $0x68] sm:$0xff] %v1396_v28   ;;  %1516 = vst [vmem:[%s2128_s2 + $0xe8] sm:$0xff] %v1476_v31   ;;  %v1471_v38 = vpack.c.bf16 %v1987_v32, %v1981_v18  ;;  %v1044_v31 = vmul.f32 %v1837_v43, %v1837_v43 }
 0x12b   :  { %1499 = vst [vmem:[%s2128_s2 + $0x60] sm:$0xff] %v1391_v35   ;;  %v968_v40 = vadd.f32 %v1601_v12, %v967_v36  ;;  %v1100_v42 = vadd.f32 %v1099_v34, %v1037_v37 }
 0x12c   :  { %1515 = vst [vmem:[%s2128_s2 + $0xe0] sm:$0xff] %v1471_v38   ;;  %v1045_v38 = vmul.f32 %v1843_v50, %v1843_v50 }
 0x12d   :  { %v1101_v48 = vadd.f32 %v1100_v42, %v1038_v39  ;;  %v1605_v51 = vpop.f32.mrb[28].mxu0  ;;  %v969_v53 = vadd.f32 %v1602_v25, %v968_v40  ;;  %v2003_v54 = vpop.f32.mrb[28].mxu1  ;;  %v1046_v39 = vmul.f32 %v1835_v41, %v1835_v41 }
 0x12e   :  { %v480_v56 = vpop.f32.mrb[29].mxu0  ;;  %v2005_v58 = vpop.f32.mrb[29].mxu1  ;;  %v1042_v19 = vmul.f32 %v1605_v51, %v1605_v51 }
 0x12f   :  { %v970_v59 = vadd.f32 %v969_v53, %v480_v56  ;;  %v1040_v63 = vmul.f32 %v480_v56, %v480_v56  ;;  %v1102_v1 = vadd.f32 %v1101_v48, %v1039_v46  ;;  %v1606_v2 = vpop.f32.mrb[30].mxu0  ;;  %v2007_v3 = vpop.f32.mrb[30].mxu1  ;;  %v1047_v46 = vmul.f32 %v1839_v45, %v1839_v45 }
 0x130   :  { %v1406_v4 = vpack.c.bf16 %v1606_v2, %v1605_v51  ;;  %v483_v6 = vpop.f32.mrb[31].mxu0  ;;  %v1486_v7 = vpack.c.bf16 %v2007_v3, %v2003_v54  ;;  %v2011_v8 = vpop.f32.mrb[31].mxu1  ;;  %v1043_v25 = vmul.f32 %v1606_v2, %v1606_v2 }
 0x131   :  { %v1103_v10 = vadd.f32 %v1102_v1, %v1040_v63  ;;  %v1401_v11 = vpack.c.bf16 %v483_v6, %v480_v56  ;;  %v971_v12 = vadd.f32 %v970_v59, %v483_v6  ;;  %v1041_v13 = vmul.f32 %v483_v6, %v483_v6 }
 0x132   :  { %1502 = vst [vmem:[%s2128_s2 + $0x78] sm:$0xff] %v1406_v4   ;;  %1518 = vst [vmem:[%s2128_s2 + $0xf8] sm:$0xff] %v1486_v7   ;;  %v1481_v17 = vpack.c.bf16 %v2011_v8, %v2005_v58  ;;  %v1049_v63 = vmul.f32 %v1867_v9, %v1867_v9 }
 0x133   :  { %1501 = vst [vmem:[%s2128_s2 + $0x70] sm:$0xff] %v1401_v11   ;;  %v972_v20 = vadd.f32 %v1605_v51, %v971_v12  ;;  %v1104_v23 = vadd.f32 %v1103_v10, %v1041_v13  ;;  %v1053_v12 = vmul.f32 %v1891_v33, %v1891_v33 }
 0x134   :  { %1517 = vst [vmem:[%s2128_s2 + $0xf0] sm:$0xff] %v1481_v17  }
 0x135   :  { %v1105_v28 = vadd.f32 %v1104_v23, %v1042_v19  ;;  %v973_v30 = vadd.f32 %v1606_v2, %v972_v20 }
 0x137   :  { %v974_v34 = vadd.f32 %v973_v30, %v1837_v43  ;;  %v1106_v35 = vadd.f32 %v1105_v28, %v1043_v25  ;;  %v1048_v43 = vmul.f32 %v1861_v0, %v1861_v0  ;;  %v1057_v30 = vmul.f32 %v1915_v61, %v1915_v61 }
 0x139   :  { %v1107_v36 = vadd.f32 %v1106_v35, %v1044_v31  ;;  %v975_v37 = vadd.f32 %v974_v34, %v1843_v50 }
 0x13b   :  { %v976_v40 = vadd.f32 %v1835_v41, %v975_v37  ;;  %v1108_v42 = vadd.f32 %v1107_v36, %v1045_v38  ;;  %v1050_v41 = vmul.f32 %v1859_v62, %v1859_v62 }
 0x13d   :  { %v1109_v48 = vadd.f32 %v1108_v42, %v1046_v39  ;;  %v977_v51 = vadd.f32 %v1839_v45, %v976_v40  ;;  %v1051_v45 = vmul.f32 %v1863_v5, %v1863_v5  ;;  %v1061_v40 = vmul.f32 %v1939_v27, %v1939_v27 }
 0x13f   :  { %v978_v53 = vadd.f32 %v977_v51, %v1861_v0  ;;  %v1110_v56 = vadd.f32 %v1109_v48, %v1047_v46  ;;  %v1052_v0 = vmul.f32 %v1885_v24, %v1885_v24 }
 0x141   :  { %v1111_v59 = vadd.f32 %v1110_v56, %v1048_v43  ;;  %v979_v50 = vadd.f32 %v978_v53, %v1867_v9 }
 0x143   :  { %v980_v1 = vadd.f32 %v1859_v62, %v979_v50  ;;  %v1112_v2 = vadd.f32 %v1111_v59, %v1049_v63  ;;  %v1054_v62 = vmul.f32 %v1883_v22, %v1883_v22  ;;  %v1065_v59 = vmul.f32 %v1963_v60, %v1963_v60 }
 0x145   :  { %v1113_v4 = vadd.f32 %v1112_v2, %v1050_v41  ;;  %v981_v6 = vadd.f32 %v1863_v5, %v980_v1  ;;  %v1055_v5 = vmul.f32 %v1887_v29, %v1887_v29 }
 0x147   :  { %v982_v7 = vadd.f32 %v981_v6, %v1885_v24  ;;  %v1114_v10 = vadd.f32 %v1113_v4, %v1051_v45  ;;  %v1056_v24 = vmul.f32 %v1909_v52, %v1909_v52  ;;  %v1069_v6 = vmul.f32 %v1987_v32, %v1987_v32 }
 0x149   :  { %v1115_v11 = vadd.f32 %v1114_v10, %v1052_v0  ;;  %v983_v9 = vadd.f32 %v982_v7, %v1891_v33 }
 0x14b   :  { %v984_v13 = vadd.f32 %v1883_v22, %v983_v9  ;;  %v1116_v17 = vadd.f32 %v1115_v11, %v1053_v12  ;;  %v1058_v22 = vmul.f32 %v1907_v49, %v1907_v49 }
 0x14d   :  { %v1117_v19 = vadd.f32 %v1116_v17, %v1054_v62  ;;  %v985_v20 = vadd.f32 %v1887_v29, %v984_v13  ;;  %v1059_v29 = vmul.f32 %v1911_v57, %v1911_v57  ;;  %v1073_v13 = vmul.f32 %v2011_v8, %v2011_v8 }
 0x14f   :  { %v986_v23 = vadd.f32 %v985_v20, %v1909_v52  ;;  %v1118_v25 = vadd.f32 %v1117_v19, %v1055_v5  ;;  %v1060_v52 = vmul.f32 %v1933_v16, %v1933_v16 }
 0x151   :  { %v1119_v28 = vadd.f32 %v1118_v25, %v1056_v24  ;;  %v987_v33 = vadd.f32 %v986_v23, %v1915_v61 }
 0x153   :  { %v988_v31 = vadd.f32 %v1907_v49, %v987_v33  ;;  %v1120_v34 = vadd.f32 %v1119_v28, %v1057_v30  ;;  %v1062_v49 = vmul.f32 %v1931_v14, %v1931_v14  ;;  %v1145_v28 = vlaneseq }
 0x155   :  { %v1121_v35 = vadd.f32 %v1120_v34, %v1058_v22  ;;  %v989_v36 = vadd.f32 %v1911_v57, %v988_v31  ;;  %v1063_v57 = vmul.f32 %v1935_v21, %v1935_v21  ;;  %v1146_v31 = vshrl.u32 %v1145_v28, 7 }
 0x157   :  { %v990_v37 = vadd.f32 %v989_v36, %v1933_v16  ;;  %v1122_v38 = vadd.f32 %v1121_v35, %v1059_v29  ;;  %v1064_v16 = vmul.f32 %v1957_v47, %v1957_v47  ;;  %vm1148_vm0 = vcmp.eq.s32.totalorder %v1146_v31, 1 }
 0x158   :  { %vm1147_vm1 = vcmp.eq.s32.totalorder %v1146_v31, 0 }
 0x159   :  { %v1123_v39 = vadd.f32 %v1122_v38, %v1060_v52  ;;  %v991_v61 = vadd.f32 %v990_v37, %v1939_v27 }
 0x15b   :  { %v992_v42 = vadd.f32 %v1931_v14, %v991_v61  ;;  %v1124_v46 = vadd.f32 %v1123_v39, %v1061_v40  ;;  %v1066_v14 = vmul.f32 %v1955_v44, %v1955_v44 }
 0x15d   :  { %v1125_v48 = vadd.f32 %v1124_v46, %v1062_v49  ;;  %v993_v51 = vadd.f32 %v1935_v21, %v992_v42  ;;  %v1067_v21 = vmul.f32 %v1959_v55, %v1959_v55 }
 0x15f   :  { %v994_v43 = vadd.f32 %v993_v51, %v1957_v47  ;;  %v1126_v53 = vadd.f32 %v1125_v48, %v1063_v57  ;;  %v1068_v47 = vmul.f32 %v1981_v18, %v1981_v18 }
 0x161   :  { %v1127_v56 = vadd.f32 %v1126_v53, %v1064_v16  ;;  %v995_v27 = vadd.f32 %v994_v43, %v1963_v60 }
 0x163   :  { %v996_v50 = vadd.f32 %v1955_v44, %v995_v27  ;;  %v1128_v63 = vadd.f32 %v1127_v56, %v1065_v59  ;;  %v1070_v44 = vmul.f32 %v1979_v15, %v1979_v15 }
 0x165   :  { %v1129_v41 = vadd.f32 %v1128_v63, %v1066_v14  ;;  %v997_v1 = vadd.f32 %v1959_v55, %v996_v50  ;;  %v1071_v55 = vmul.f32 %v1983_v26, %v1983_v26 }
 0x167   :  { %v998_v2 = vadd.f32 %v997_v1, %v1981_v18  ;;  %v1130_v45 = vadd.f32 %v1129_v41, %v1067_v21  ;;  %v1072_v18 = vmul.f32 %v2005_v58, %v2005_v58 }
 0x169   :  { %v1131_v4 = vadd.f32 %v1130_v45, %v1068_v47  ;;  %v999_v60 = vadd.f32 %v998_v2, %v1987_v32 }
 0x16b   :  { %v1000_v0 = vadd.f32 %v1979_v15, %v999_v60  ;;  %v1132_v7 = vadd.f32 %v1131_v4, %v1069_v6  ;;  %v1074_v15 = vmul.f32 %v2003_v54, %v2003_v54 }
 0x16d   :  { %v1133_v10 = vadd.f32 %v1132_v7, %v1070_v44  ;;  %v1001_v11 = vadd.f32 %v1983_v26, %v1000_v0  ;;  %v1075_v26 = vmul.f32 %v2007_v3, %v2007_v3 }
 0x16f   :  { %v1002_v9 = vadd.f32 %v1001_v11, %v2005_v58  ;;  %v1134_v12 = vadd.f32 %v1133_v10, %v1071_v55 }
 0x171   :  { %v1135_v62 = vadd.f32 %v1134_v12, %v1072_v18  ;;  %v1003_v32 = vadd.f32 %v1002_v9, %v2011_v8 }
 0x173   :  { %v1004_v17 = vadd.f32 %v2003_v54, %v1003_v32  ;;  %v1136_v5 = vadd.f32 %v1135_v62, %v1073_v13 }
 0x175   :  { %v1005_v19 = vadd.f32 %v2007_v3, %v1004_v17  ;;  %v1137_v20 = vadd.f32 %v1136_v5, %v1074_v15 }
 0x177   :  { %v1006_v58 = vrot.slane %v1005_v19, 4  ;;  %v1138_v24 = vadd.f32 %v1137_v20, %v1075_v26 }
 0x179   :  { %v1007_v23 = vadd.f32 %v1006_v58, %v1005_v19  ;;  %v1139_v25 = vrot.slane %v1138_v24, 4 }
 0x17b   :  { %v1008_v33 = vrot.slane %v1007_v23, 2  ;;  %v1140_v30 = vadd.f32 %v1139_v25, %v1138_v24 }
 0x17d   :  { %v1009_v8 = vadd.f32 %v1008_v33, %v1007_v23  ;;  %v1141_v22 = vrot.slane %v1140_v30, 2 }
 0x17f   :  { %v1142_v34 = vadd.f32 %v1141_v22, %v1140_v30  ;;  %v1010_v29 = vrot.slane %v1009_v8, 1 }
 0x181   :  { %v1143_v54 = vrot.slane %v1142_v34, 1  ;;  %v1011_v36 = vadd.f32 %v1010_v29, %v1009_v8 }
 0x183   :  { %v1144_v35 = vadd.f32 %v1143_v54, %v1142_v34 }
 0x185   :  { %v1149_v52 = vsel %vm1148_vm0, %v1144_v35, 0.0 }
 0x186   :  { %v1150_v3 = vsel %vm1147_vm1, %v1011_v36, %v1149_v52 }
 0x187   :  { %1151 = vst [vmem:[%s2129_s3] sm:$0xff] %v1150_v3 }

// kernel: discriminator_forward.10
= control target key start
LH: loop header
LB: loop body
LE: loop exit
PB: predicated region body
PF: predicated region fallthrough
CT: control target
= control target key end

     0   :  { %s1631_s0 = inlined_call_operand.vmem [shape: bf16[512,128], index: 0, kind: input, shape index: {}]   ;;  %s1632_s1 = inlined_call_operand.vmem [shape: f32[1,128], index: 1, kind: input, shape index: {}]   ;;  %s1633_s2 = inlined_call_operand.vmem [shape: f32[1,128], index: 2, kind: input, shape index: {}]   ;;  %s1634_s3 = inlined_call_operand.vmem [shape: bf16[512,128], index: 3, kind: output, shape index: {}]  }
   0x1   :  { %v931_v0 = vld [vmem:[%s1631_s0] sm:$0xff]   ;;  %v1218_v4 = vld [vmem:[%s1631_s0 + $0x8] sm:$0xff]   ;;  %v1219_v5 = vld [vmem:[%s1631_s0 + $0x10] sm:$0xff]  }
   0x2   :  { %v1306_v1 = vld [vmem:[%s1632_s1] ss:$0 sm:$0xff]  ;;  %v932_v2 = vunpack.c.l.bf16 %v931_v0  ;;  %v933_v3 = vunpack.c.h.bf16 %v931_v0  ;;  %v1220_v6 = vld [vmem:[%s1631_s0 + $0x18] sm:$0xff]   ;;  %v936_v8 = vunpack.c.l.bf16 %v1218_v4  ;;  %v937_v9 = vunpack.c.h.bf16 %v1218_v4  ;;  %v1222_v35 = vld [vmem:[%s1631_s0 + $0x28] sm:$0xff]  }
   0x3   :  { %v1320_v7 = vld [vmem:[%s1633_s2] ss:$0 sm:$0xff]  ;;  %v940_v10 = vunpack.c.l.bf16 %v1219_v5  ;;  %v941_v11 = vunpack.c.h.bf16 %v1219_v5  ;;  %v944_v14 = vunpack.c.l.bf16 %v1220_v6  ;;  %v945_v15 = vunpack.c.h.bf16 %v1220_v6  ;;  %v1223_v48 = vld [vmem:[%s1631_s0 + $0x30] sm:$0xff]   ;;  %v1224_v4 = vld [vmem:[%s1631_s0 + $0x38] sm:$0xff]  }
   0x4   :  { %v149_v12 = vmul.f32 %v932_v2, %v1306_v1  ;;  %v150_v13 = vmul.f32 %v933_v3, %v1306_v1  ;;  %v151_v16 = vmul.f32 %v936_v8, %v1306_v1  ;;  %v152_v17 = vmul.f32 %v937_v9, %v1306_v1  ;;  %v1221_v34 = vld [vmem:[%s1631_s0 + $0x20] sm:$0xff]  }
   0x5   :  { %v153_v18 = vmul.f32 %v940_v10, %v1306_v1  ;;  %v154_v19 = vmul.f32 %v941_v11, %v1306_v1  ;;  %v155_v22 = vmul.f32 %v944_v14, %v1306_v1  ;;  %v156_v23 = vmul.f32 %v945_v15, %v1306_v1  ;;  %v1225_v15 = vld [vmem:[%s1631_s0 + $0x40] sm:$0xff]  }
   0x6   :  { %v220_v20 = vadd.f32 %v1320_v7, %v149_v12  ;;  %v221_v21 = vadd.f32 %v1320_v7, %v150_v13  ;;  %v222_v24 = vadd.f32 %v1320_v7, %v151_v16  ;;  %v223_v25 = vadd.f32 %v1320_v7, %v152_v17 }
   0x7   :  { %v224_v26 = vadd.f32 %v1320_v7, %v153_v18  ;;  %v225_v27 = vadd.f32 %v1320_v7, %v154_v19  ;;  %v226_v42 = vadd.f32 %v1320_v7, %v155_v22  ;;  %v227_v43 = vadd.f32 %v1320_v7, %v156_v23 }
   0x8   :  { %vm284_vm0 = vcmp.gt.f32.partialorder %v220_v20, 0.0  ;;  %vm285_vm1 = vcmp.gt.f32.partialorder %v221_v21, 0.0  ;;  %v348_v28 = vmul.f32 0.2, %v220_v20  ;;  %v349_v29 = vmul.f32 0.2, %v221_v21 }
   0x9   :  { %vm286_vm2 = vcmp.gt.f32.partialorder %v222_v24, 0.0  ;;  %vm287_vm3 = vcmp.gt.f32.partialorder %v223_v25, 0.0  ;;  %v350_v30 = vmul.f32 0.2, %v222_v24  ;;  %v351_v31 = vmul.f32 0.2, %v223_v25 }
   0xa   :  { %v412_v32 = vsel %vm284_vm0, %v220_v20, %v348_v28  ;;  %v413_v33 = vsel %vm285_vm1, %v221_v21, %v349_v29  ;;  %vm288_vm4 = vcmp.gt.f32.partialorder %v224_v26, 0.0  ;;  %vm289_vm5 = vcmp.gt.f32.partialorder %v225_v27, 0.0 }
   0xb   :  { %v1061_v36 = vpack.c.bf16 %v413_v33, %v412_v32  ;;  %v414_v37 = vsel %vm286_vm2, %v222_v24, %v350_v30  ;;  %v415_v38 = vsel %vm287_vm3, %v223_v25, %v351_v31  ;;  %v352_v39 = vmul.f32 0.2, %v224_v26 }
   0xc   :  { %v1066_v40 = vpack.c.bf16 %v415_v38, %v414_v37  ;;  %v353_v41 = vmul.f32 0.2, %v225_v27  ;;  %v948_v45 = vunpack.c.l.bf16 %v1221_v34  ;;  %v949_v46 = vunpack.c.h.bf16 %v1221_v34 }
   0xd   :  { %1062 = vst [vmem:[%s1634_s3] sm:$0xff] %v1061_v36   ;;  %v416_v44 = vsel %vm288_vm4, %v224_v26, %v352_v39  ;;  %v952_v47 = vunpack.c.l.bf16 %v1222_v35  ;;  %vm290_vm6 = vcmp.gt.f32.partialorder %v226_v42, 0.0  ;;  %vm291_vm7 = vcmp.gt.f32.partialorder %v227_v43, 0.0  ;;  %v1226_v26 = vld [vmem:[%s1631_s0 + $0x48] sm:$0xff]  }
   0xe   :  { %1249 = vst [vmem:[%s1634_s3 + $0x8] sm:$0xff] %v1066_v40   ;;  %v417_v49 = vsel %vm289_vm5, %v225_v27, %v353_v41  ;;  %v354_v50 = vmul.f32 0.2, %v226_v42  ;;  %v355_v52 = vmul.f32 0.2, %v227_v43  ;;  %v157_v53 = vmul.f32 %v948_v45, %v1306_v1  ;;  %v1227_v27 = vld [vmem:[%s1631_s0 + $0x50] sm:$0xff]  }
   0xf   :  { %v1071_v51 = vpack.c.bf16 %v417_v49, %v416_v44  ;;  %v158_v54 = vmul.f32 %v949_v46, %v1306_v1  ;;  %v953_v56 = vunpack.c.h.bf16 %v1222_v35  ;;  %v159_v57 = vmul.f32 %v952_v47, %v1306_v1 }
  0x10   :  { %v418_v55 = vsel %vm290_vm6, %v226_v42, %v354_v50  ;;  %v956_v58 = vunpack.c.l.bf16 %v1223_v48  ;;  %v419_v59 = vsel %vm291_vm7, %v227_v43, %v355_v52  ;;  %v228_v60 = vadd.f32 %v1320_v7, %v157_v53 }
  0x11   :  { %1250 = vst [vmem:[%s1634_s3 + $0x10] sm:$0xff] %v1071_v51   ;;  %v229_v61 = vadd.f32 %v1320_v7, %v158_v54  ;;  %v957_v62 = vunpack.c.h.bf16 %v1223_v48  ;;  %v1076_v63 = vpack.c.bf16 %v419_v59, %v418_v55  ;;  %v160_v0 = vmul.f32 %v953_v56, %v1306_v1  ;;  %v1228_v55 = vld [vmem:[%s1631_s0 + $0x58] sm:$0xff]  }
  0x12   :  { %v230_v2 = vadd.f32 %v1320_v7, %v159_v57  ;;  %v161_v3 = vmul.f32 %v956_v58, %v1306_v1  ;;  %vm292_vm8 = vcmp.gt.f32.partialorder %v228_v60, 0.0  ;;  %v356_v5 = vmul.f32 0.2, %v228_v60 }
  0x13   :  { %vm293_vm9 = vcmp.gt.f32.partialorder %v229_v61, 0.0  ;;  %v357_v6 = vmul.f32 0.2, %v229_v61  ;;  %1251 = vst [vmem:[%s1634_s3 + $0x18] sm:$0xff] %v1076_v63   ;;  %v231_v8 = vadd.f32 %v1320_v7, %v160_v0  ;;  %v162_v10 = vmul.f32 %v957_v62, %v1306_v1 }
  0x14   :  { %vm294_vm10 = vcmp.gt.f32.partialorder %v230_v2, 0.0  ;;  %v358_v9 = vmul.f32 0.2, %v230_v2  ;;  %v420_v11 = vsel %vm292_vm8, %v228_v60, %v356_v5  ;;  %v232_v13 = vadd.f32 %v1320_v7, %v161_v3  ;;  %v1229_v60 = vld [vmem:[%s1631_s0 + $0x60] sm:$0xff]  }
  0x15   :  { %v421_v12 = vsel %vm293_vm9, %v229_v61, %v357_v6  ;;  %v960_v14 = vunpack.c.l.bf16 %v1224_v4  ;;  %vm295_vm11 = vcmp.gt.f32.partialorder %v231_v8, 0.0  ;;  %v359_v17 = vmul.f32 0.2, %v231_v8 }
  0x16   :  { %v1081_v16 = vpack.c.bf16 %v421_v12, %v420_v11  ;;  %v422_v18 = vsel %vm294_vm10, %v230_v2, %v358_v9  ;;  %v233_v19 = vadd.f32 %v1320_v7, %v162_v10  ;;  %vm296_vm12 = vcmp.gt.f32.partialorder %v232_v13, 0.0  ;;  %v1230_v9 = vld [vmem:[%s1631_s0 + $0x68] sm:$0xff]  }
  0x17   :  { %v360_v20 = vmul.f32 0.2, %v232_v13  ;;  %v961_v21 = vunpack.c.h.bf16 %v1224_v4  ;;  %v423_v22 = vsel %vm295_vm11, %v231_v8, %v359_v17  ;;  %v163_v23 = vmul.f32 %v960_v14, %v1306_v1 }
  0x18   :  { %1252 = vst [vmem:[%s1634_s3 + $0x20] sm:$0xff] %v1081_v16   ;;  %v964_v24 = vunpack.c.l.bf16 %v1225_v15  ;;  %v965_v25 = vunpack.c.h.bf16 %v1225_v15  ;;  %v1086_v28 = vpack.c.bf16 %v423_v22, %v422_v18  ;;  %vm297_vm13 = vcmp.gt.f32.partialorder %v233_v19, 0.0 }
  0x19   :  { %v361_v29 = vmul.f32 0.2, %v233_v19  ;;  %v424_v30 = vsel %vm296_vm12, %v232_v13, %v360_v20  ;;  %v164_v31 = vmul.f32 %v961_v21, %v1306_v1  ;;  %v234_v32 = vadd.f32 %v1320_v7, %v163_v23 }
  0x1a   :  { %v165_v33 = vmul.f32 %v964_v24, %v1306_v1  ;;  %v166_v34 = vmul.f32 %v965_v25, %v1306_v1  ;;  %1253 = vst [vmem:[%s1634_s3 + $0x28] sm:$0xff] %v1086_v28   ;;  %v968_v36 = vunpack.c.l.bf16 %v1226_v26  ;;  %v969_v37 = vunpack.c.h.bf16 %v1226_v26  ;;  %v1231_v28 = vld [vmem:[%s1631_s0 + $0x70] sm:$0xff]  }
  0x1b   :  { %v425_v35 = vsel %vm297_vm13, %v233_v19, %v361_v29  ;;  %v972_v38 = vunpack.c.l.bf16 %v1227_v27  ;;  %v235_v40 = vadd.f32 %v1320_v7, %v164_v31  ;;  %vm298_vm14 = vcmp.gt.f32.partialorder %v234_v32, 0.0 }
  0x1c   :  { %v1091_v39 = vpack.c.bf16 %v425_v35, %v424_v30  ;;  %v362_v41 = vmul.f32 0.2, %v234_v32  ;;  %v236_v42 = vadd.f32 %v1320_v7, %v165_v33  ;;  %v237_v43 = vadd.f32 %v1320_v7, %v166_v34 }
  0x1d   :  { %v167_v44 = vmul.f32 %v968_v36, %v1306_v1  ;;  %v168_v45 = vmul.f32 %v969_v37, %v1306_v1  ;;  %vm299_vm15 = vcmp.gt.f32.partialorder %v235_v40, 0.0  ;;  %v363_v46 = vmul.f32 0.2, %v235_v40  ;;  %v1232_v37 = vld [vmem:[%s1631_s0 + $0x78] sm:$0xff]  }
  0x1e   :  { %1254 = vst [vmem:[%s1634_s3 + $0x30] sm:$0xff] %v1091_v39   ;;  %v426_v47 = vsel %vm298_vm14, %v234_v32, %v362_v41  ;;  %v973_v48 = vunpack.c.h.bf16 %v1227_v27  ;;  %vm300_vm0 = vcmp.gt.f32.partialorder %v236_v42, 0.0  ;;  %vm301_vm1 = vcmp.gt.f32.partialorder %v237_v43, 0.0 }
  0x1f   :  { %v364_v49 = vmul.f32 0.2, %v236_v42  ;;  %v365_v50 = vmul.f32 0.2, %v237_v43  ;;  %v427_v51 = vsel %vm299_vm15, %v235_v40, %v363_v46  ;;  %v238_v52 = vadd.f32 %v1320_v7, %v167_v44 }
  0x20   :  { %v239_v53 = vadd.f32 %v1320_v7, %v168_v45  ;;  %v169_v54 = vmul.f32 %v972_v38, %v1306_v1  ;;  %v1096_v56 = vpack.c.bf16 %v427_v51, %v426_v47  ;;  %v170_v59 = vmul.f32 %v973_v48, %v1306_v1 }
  0x21   :  { %v428_v57 = vsel %vm300_vm0, %v236_v42, %v364_v49  ;;  %v429_v58 = vsel %vm301_vm1, %v237_v43, %v365_v50  ;;  %vm302_vm2 = vcmp.gt.f32.partialorder %v238_v52, 0.0  ;;  %v366_v62 = vmul.f32 0.2, %v238_v52  ;;  %v1233_v42 = vld [vmem:[%s1631_s0 + $0x80] sm:$0xff]   ;;  %v1234_v50 = vld [vmem:[%s1631_s0 + $0x88] sm:$0xff]  }
  0x22   :  { %v1101_v61 = vpack.c.bf16 %v429_v58, %v428_v57  ;;  %vm303_vm3 = vcmp.gt.f32.partialorder %v239_v53, 0.0  ;;  %1255 = vst [vmem:[%s1634_s3 + $0x38] sm:$0xff] %v1096_v56   ;;  %v367_v63 = vmul.f32 0.2, %v239_v53  ;;  %v240_v0 = vadd.f32 %v1320_v7, %v169_v54 }
  0x23   :  { %v241_v2 = vadd.f32 %v1320_v7, %v170_v59  ;;  %v976_v3 = vunpack.c.l.bf16 %v1228_v55  ;;  %v430_v4 = vsel %vm302_vm2, %v238_v52, %v366_v62  ;;  %v977_v5 = vunpack.c.h.bf16 %v1228_v55 }
  0x24   :  { %1256 = vst [vmem:[%s1634_s3 + $0x40] sm:$0xff] %v1101_v61   ;;  %v980_v6 = vunpack.c.l.bf16 %v1229_v60  ;;  %v981_v8 = vunpack.c.h.bf16 %v1229_v60  ;;  %v431_v10 = vsel %vm303_vm3, %v239_v53, %v367_v63  ;;  %vm304_vm4 = vcmp.gt.f32.partialorder %v240_v0, 0.0 }
  0x25   :  { %vm305_vm5 = vcmp.gt.f32.partialorder %v241_v2, 0.0  ;;  %v368_v11 = vmul.f32 0.2, %v240_v0  ;;  %v1106_v12 = vpack.c.bf16 %v431_v10, %v430_v4  ;;  %v369_v13 = vmul.f32 0.2, %v241_v2 }
  0x26   :  { %v171_v14 = vmul.f32 %v976_v3, %v1306_v1  ;;  %v172_v15 = vmul.f32 %v977_v5, %v1306_v1  ;;  %v173_v17 = vmul.f32 %v980_v6, %v1306_v1  ;;  %v174_v18 = vmul.f32 %v981_v8, %v1306_v1 }
  0x27   :  { %v432_v16 = vsel %vm304_vm4, %v240_v0, %v368_v11  ;;  %v984_v19 = vunpack.c.l.bf16 %v1230_v9  ;;  %1257 = vst [vmem:[%s1634_s3 + $0x48] sm:$0xff] %v1106_v12   ;;  %v433_v20 = vsel %vm305_vm5, %v241_v2, %v369_v13  ;;  %v985_v23 = vunpack.c.h.bf16 %v1230_v9 }
  0x28   :  { %v242_v21 = vadd.f32 %v1320_v7, %v171_v14  ;;  %v243_v22 = vadd.f32 %v1320_v7, %v172_v15  ;;  %v1111_v24 = vpack.c.bf16 %v433_v20, %v432_v16  ;;  %v244_v25 = vadd.f32 %v1320_v7, %v173_v17  ;;  %v1235_v15 = vld [vmem:[%s1631_s0 + $0x90] sm:$0xff]   ;;  %v1236_v20 = vld [vmem:[%s1631_s0 + $0x98] sm:$0xff]  }
  0x29   :  { %v245_v26 = vadd.f32 %v1320_v7, %v174_v18  ;;  %v175_v27 = vmul.f32 %v984_v19, %v1306_v1  ;;  %v176_v35 = vmul.f32 %v985_v23, %v1306_v1  ;;  %v988_v41 = vunpack.c.l.bf16 %v1231_v28 }
  0x2a   :  { %vm306_vm6 = vcmp.gt.f32.partialorder %v242_v21, 0.0  ;;  %vm307_vm7 = vcmp.gt.f32.partialorder %v243_v22, 0.0  ;;  %v370_v29 = vmul.f32 0.2, %v242_v21  ;;  %v371_v30 = vmul.f32 0.2, %v243_v22 }
  0x2b   :  { %1258 = vst [vmem:[%s1634_s3 + $0x50] sm:$0xff] %v1111_v24   ;;  %vm308_vm8 = vcmp.gt.f32.partialorder %v244_v25, 0.0  ;;  %vm309_vm9 = vcmp.gt.f32.partialorder %v245_v26, 0.0  ;;  %v372_v31 = vmul.f32 0.2, %v244_v25  ;;  %v246_v36 = vadd.f32 %v1320_v7, %v175_v27 }
  0x2c   :  { %v373_v32 = vmul.f32 0.2, %v245_v26  ;;  %v434_v33 = vsel %vm306_vm6, %v242_v21, %v370_v29  ;;  %v435_v34 = vsel %vm307_vm7, %v243_v22, %v371_v30  ;;  %v247_v44 = vadd.f32 %v1320_v7, %v176_v35  ;;  %v1237_v21 = vld [vmem:[%s1631_s0 + $0xa0] sm:$0xff]  }
  0x2d   :  { %v1116_v38 = vpack.c.bf16 %v435_v34, %v434_v33  ;;  %v436_v39 = vsel %vm308_vm8, %v244_v25, %v372_v31  ;;  %vm310_vm10 = vcmp.gt.f32.partialorder %v246_v36, 0.0  ;;  %v374_v45 = vmul.f32 0.2, %v246_v36 }
  0x2e   :  { %v437_v40 = vsel %vm309_vm9, %v245_v26, %v373_v32  ;;  %v989_v46 = vunpack.c.h.bf16 %v1231_v28  ;;  %v177_v47 = vmul.f32 %v988_v41, %v1306_v1  ;;  %v992_v48 = vunpack.c.l.bf16 %v1232_v37 }
  0x2f   :  { %v1121_v43 = vpack.c.bf16 %v437_v40, %v436_v39  ;;  %1259 = vst [vmem:[%s1634_s3 + $0x58] sm:$0xff] %v1116_v38   ;;  %v993_v49 = vunpack.c.h.bf16 %v1232_v37  ;;  %vm311_vm11 = vcmp.gt.f32.partialorder %v247_v44, 0.0  ;;  %v375_v51 = vmul.f32 0.2, %v247_v44  ;;  %v1238_v40 = vld [vmem:[%s1631_s0 + $0xa8] sm:$0xff]  }
  0x30   :  { %v438_v52 = vsel %vm310_vm10, %v246_v36, %v374_v45  ;;  %v996_v53 = vunpack.c.l.bf16 %v1233_v42  ;;  %v178_v54 = vmul.f32 %v989_v46, %v1306_v1  ;;  %v248_v55 = vadd.f32 %v1320_v7, %v177_v47 }
  0x31   :  { %1260 = vst [vmem:[%s1634_s3 + $0x60] sm:$0xff] %v1121_v43   ;;  %v179_v56 = vmul.f32 %v992_v48, %v1306_v1  ;;  %v180_v57 = vmul.f32 %v993_v49, %v1306_v1  ;;  %v439_v58 = vsel %vm311_vm11, %v247_v44, %v375_v51  ;;  %v997_v59 = vunpack.c.h.bf16 %v1233_v42 }
  0x32   :  { %v181_v60 = vmul.f32 %v996_v53, %v1306_v1  ;;  %v1000_v61 = vunpack.c.l.bf16 %v1234_v50  ;;  %v1126_v62 = vpack.c.bf16 %v439_v58, %v438_v52  ;;  %v249_v63 = vadd.f32 %v1320_v7, %v178_v54 }
  0x33   :  { %vm312_vm12 = vcmp.gt.f32.partialorder %v248_v55, 0.0  ;;  %v376_v0 = vmul.f32 0.2, %v248_v55  ;;  %v250_v2 = vadd.f32 %v1320_v7, %v179_v56  ;;  %v251_v3 = vadd.f32 %v1320_v7, %v180_v57 }
  0x34   :  { %v182_v4 = vmul.f32 %v997_v59, %v1306_v1  ;;  %v252_v5 = vadd.f32 %v1320_v7, %v181_v60  ;;  %1261 = vst [vmem:[%s1634_s3 + $0x68] sm:$0xff] %v1126_v62   ;;  %vm313_vm13 = vcmp.gt.f32.partialorder %v249_v63, 0.0  ;;  %v377_v6 = vmul.f32 0.2, %v249_v63 }
  0x35   :  { %v440_v8 = vsel %vm312_vm12, %v248_v55, %v376_v0  ;;  %v1001_v9 = vunpack.c.h.bf16 %v1234_v50  ;;  %vm314_vm14 = vcmp.gt.f32.partialorder %v250_v2, 0.0  ;;  %vm315_vm15 = vcmp.gt.f32.partialorder %v251_v3, 0.0  ;;  %v1239_v0 = vld [vmem:[%s1631_s0 + $0xb0] sm:$0xff]  }
  0x36   :  { %v378_v10 = vmul.f32 0.2, %v250_v2  ;;  %v379_v11 = vmul.f32 0.2, %v251_v3  ;;  %v441_v12 = vsel %vm313_vm13, %v249_v63, %v377_v6  ;;  %v253_v13 = vadd.f32 %v1320_v7, %v182_v4 }
  0x37   :  { %vm316_vm0 = vcmp.gt.f32.partialorder %v252_v5, 0.0  ;;  %v380_v14 = vmul.f32 0.2, %v252_v5  ;;  %v1131_v16 = vpack.c.bf16 %v441_v12, %v440_v8  ;;  %v183_v19 = vmul.f32 %v1000_v61, %v1306_v1 }
  0x38   :  { %v442_v17 = vsel %vm314_vm14, %v250_v2, %v378_v10  ;;  %v443_v18 = vsel %vm315_vm15, %v251_v3, %v379_v11  ;;  %vm317_vm1 = vcmp.gt.f32.partialorder %v253_v13, 0.0  ;;  %v381_v23 = vmul.f32 0.2, %v253_v13  ;;  %v1240_v2 = vld [vmem:[%s1631_s0 + $0xb8] sm:$0xff]  }
  0x39   :  { %v1136_v22 = vpack.c.bf16 %v443_v18, %v442_v17  ;;  %v444_v24 = vsel %vm316_vm0, %v252_v5, %v380_v14  ;;  %1262 = vst [vmem:[%s1634_s3 + $0x70] sm:$0xff] %v1131_v16   ;;  %v184_v25 = vmul.f32 %v1001_v9, %v1306_v1  ;;  %v254_v26 = vadd.f32 %v1320_v7, %v183_v19  ;;  %v1241_v18 = vld [vmem:[%s1631_s0 + $0xc0] sm:$0xff]  }
  0x3a   :  { %v1004_v27 = vunpack.c.l.bf16 %v1235_v15  ;;  %v1005_v28 = vunpack.c.h.bf16 %v1235_v15  ;;  %v445_v29 = vsel %vm317_vm1, %v253_v13, %v381_v23  ;;  %v1008_v30 = vunpack.c.l.bf16 %v1236_v20 }
  0x3b   :  { %1263 = vst [vmem:[%s1634_s3 + $0x78] sm:$0xff] %v1136_v22   ;;  %v1009_v31 = vunpack.c.h.bf16 %v1236_v20  ;;  %v1012_v32 = vunpack.c.l.bf16 %v1237_v21  ;;  %v1141_v33 = vpack.c.bf16 %v445_v29, %v444_v24  ;;  %v255_v34 = vadd.f32 %v1320_v7, %v184_v25 }
  0x3c   :  { %vm318_vm2 = vcmp.gt.f32.partialorder %v254_v26, 0.0  ;;  %v382_v35 = vmul.f32 0.2, %v254_v26  ;;  %v185_v36 = vmul.f32 %v1004_v27, %v1306_v1  ;;  %v186_v37 = vmul.f32 %v1005_v28, %v1306_v1 }
  0x3d   :  { %v187_v38 = vmul.f32 %v1008_v30, %v1306_v1  ;;  %v188_v39 = vmul.f32 %v1009_v31, %v1306_v1  ;;  %1264 = vst [vmem:[%s1634_s3 + $0x80] sm:$0xff] %v1141_v33   ;;  %vm319_vm3 = vcmp.gt.f32.partialorder %v255_v34, 0.0  ;;  %v383_v41 = vmul.f32 0.2, %v255_v34 }
  0x3e   :  { %v446_v42 = vsel %vm318_vm2, %v254_v26, %v382_v35  ;;  %v1013_v43 = vunpack.c.h.bf16 %v1237_v21  ;;  %v256_v44 = vadd.f32 %v1320_v7, %v185_v36  ;;  %v257_v45 = vadd.f32 %v1320_v7, %v186_v37  ;;  %v1242_v36 = vld [vmem:[%s1631_s0 + $0xc8] sm:$0xff]  }
  0x3f   :  { %v258_v46 = vadd.f32 %v1320_v7, %v187_v38  ;;  %v259_v47 = vadd.f32 %v1320_v7, %v188_v39  ;;  %v447_v48 = vsel %vm319_vm3, %v255_v34, %v383_v41  ;;  %v189_v49 = vmul.f32 %v1012_v32, %v1306_v1 }
  0x40   :  { %v190_v50 = vmul.f32 %v1013_v43, %v1306_v1  ;;  %v1016_v51 = vunpack.c.l.bf16 %v1238_v40  ;;  %v1146_v52 = vpack.c.bf16 %v447_v48, %v446_v42  ;;  %vm320_vm4 = vcmp.gt.f32.partialorder %v256_v44, 0.0  ;;  %v1243_v42 = vld [vmem:[%s1631_s0 + $0xd0] sm:$0xff]  }
  0x41   :  { %vm321_vm5 = vcmp.gt.f32.partialorder %v257_v45, 0.0  ;;  %v384_v53 = vmul.f32 0.2, %v256_v44  ;;  %v385_v54 = vmul.f32 0.2, %v257_v45  ;;  %vm322_vm6 = vcmp.gt.f32.partialorder %v258_v46, 0.0 }
  0x42   :  { %vm323_vm7 = vcmp.gt.f32.partialorder %v259_v47, 0.0  ;;  %v386_v55 = vmul.f32 0.2, %v258_v46  ;;  %1265 = vst [vmem:[%s1634_s3 + $0x88] sm:$0xff] %v1146_v52   ;;  %v387_v57 = vmul.f32 0.2, %v259_v47  ;;  %v260_v58 = vadd.f32 %v1320_v7, %v189_v49 }
  0x43   :  { %v448_v56 = vsel %vm320_vm4, %v256_v44, %v384_v53  ;;  %v261_v59 = vadd.f32 %v1320_v7, %v190_v50  ;;  %v449_v60 = vsel %vm321_vm5, %v257_v45, %v385_v54  ;;  %v1017_v62 = vunpack.c.h.bf16 %v1238_v40 }
  0x44   :  { %v450_v61 = vsel %vm322_vm6, %v258_v46, %v386_v55  ;;  %v191_v63 = vmul.f32 %v1016_v51, %v1306_v1  ;;  %v1151_v3 = vpack.c.bf16 %v449_v60, %v448_v56  ;;  %v451_v4 = vsel %vm323_vm7, %v259_v47, %v387_v57  ;;  %v1244_v55 = vld [vmem:[%s1631_s0 + $0xd8] sm:$0xff]  }
  0x45   :  { %vm324_vm8 = vcmp.gt.f32.partialorder %v260_v58, 0.0  ;;  %vm325_vm9 = vcmp.gt.f32.partialorder %v261_v59, 0.0  ;;  %v1156_v5 = vpack.c.bf16 %v451_v4, %v450_v61  ;;  %v388_v6 = vmul.f32 0.2, %v260_v58 }
  0x46   :  { %v389_v8 = vmul.f32 0.2, %v261_v59  ;;  %v192_v9 = vmul.f32 %v1017_v62, %v1306_v1  ;;  %1266 = vst [vmem:[%s1634_s3 + $0x90] sm:$0xff] %v1151_v3   ;;  %v262_v10 = vadd.f32 %v1320_v7, %v191_v63  ;;  %v1020_v11 = vunpack.c.l.bf16 %v1239_v0 }
  0x47   :  { %v1021_v12 = vunpack.c.h.bf16 %v1239_v0  ;;  %v1024_v13 = vunpack.c.l.bf16 %v1240_v2  ;;  %1267 = vst [vmem:[%s1634_s3 + $0x98] sm:$0xff] %v1156_v5   ;;  %v452_v14 = vsel %vm324_vm8, %v260_v58, %v388_v6  ;;  %v1025_v17 = vunpack.c.h.bf16 %v1240_v2 }
  0x48   :  { %v453_v15 = vsel %vm325_vm9, %v261_v59, %v389_v8  ;;  %v263_v16 = vadd.f32 %v1320_v7, %v192_v9  ;;  %vm326_vm10 = vcmp.gt.f32.partialorder %v262_v10, 0.0  ;;  %v390_v20 = vmul.f32 0.2, %v262_v10 }
  0x49   :  { %v1161_v19 = vpack.c.bf16 %v453_v15, %v452_v14  ;;  %v193_v21 = vmul.f32 %v1020_v11, %v1306_v1  ;;  %v194_v23 = vmul.f32 %v1021_v12, %v1306_v1  ;;  %v195_v24 = vmul.f32 %v1024_v13, %v1306_v1  ;;  %v1246_v14 = vld [vmem:[%s1631_s0 + $0xe8] sm:$0xff]  }
  0x4a   :  { %vm327_vm11 = vcmp.gt.f32.partialorder %v263_v16, 0.0  ;;  %v391_v22 = vmul.f32 0.2, %v263_v16  ;;  %v454_v25 = vsel %vm326_vm10, %v262_v10, %v390_v20  ;;  %v196_v27 = vmul.f32 %v1025_v17, %v1306_v1  ;;  %v1245_v10 = vld [vmem:[%s1631_s0 + $0xe0] sm:$0xff]  }
  0x4b   :  { %1268 = vst [vmem:[%s1634_s3 + $0xa0] sm:$0xff] %v1161_v19   ;;  %v264_v26 = vadd.f32 %v1320_v7, %v193_v21  ;;  %v1028_v28 = vunpack.c.l.bf16 %v1241_v18  ;;  %v265_v30 = vadd.f32 %v1320_v7, %v194_v23  ;;  %v266_v31 = vadd.f32 %v1320_v7, %v195_v24 }
  0x4c   :  { %v455_v29 = vsel %vm327_vm11, %v263_v16, %v391_v22  ;;  %v1029_v32 = vunpack.c.h.bf16 %v1241_v18  ;;  %v267_v35 = vadd.f32 %v1320_v7, %v196_v27  ;;  %v1032_v46 = vunpack.c.l.bf16 %v1242_v36 }
  0x4d   :  { %v1166_v33 = vpack.c.bf16 %v455_v29, %v454_v25  ;;  %vm328_vm12 = vcmp.gt.f32.partialorder %v264_v26, 0.0  ;;  %v392_v34 = vmul.f32 0.2, %v264_v26  ;;  %vm329_vm13 = vcmp.gt.f32.partialorder %v265_v30, 0.0 }
  0x4e   :  { %v393_v37 = vmul.f32 0.2, %v265_v30  ;;  %vm330_vm14 = vcmp.gt.f32.partialorder %v266_v31, 0.0  ;;  %v394_v38 = vmul.f32 0.2, %v266_v31  ;;  %vm331_vm15 = vcmp.gt.f32.partialorder %v267_v35, 0.0 }
  0x4f   :  { %1269 = vst [vmem:[%s1634_s3 + $0xa8] sm:$0xff] %v1166_v33   ;;  %v456_v39 = vsel %vm328_vm12, %v264_v26, %v392_v34  ;;  %v395_v40 = vmul.f32 0.2, %v267_v35  ;;  %v197_v41 = vmul.f32 %v1028_v28, %v1306_v1  ;;  %v198_v45 = vmul.f32 %v1029_v32, %v1306_v1 }
  0x50   :  { %v457_v43 = vsel %vm329_vm13, %v265_v30, %v393_v37  ;;  %v458_v44 = vsel %vm330_vm14, %v266_v31, %v394_v38  ;;  %v1033_v50 = vunpack.c.h.bf16 %v1242_v36  ;;  %v199_v53 = vmul.f32 %v1032_v46, %v1306_v1  ;;  %v1247_v30 = vld [vmem:[%s1631_s0 + $0xf0] sm:$0xff]  }
  0x51   :  { %v1171_v47 = vpack.c.bf16 %v457_v43, %v456_v39  ;;  %v459_v48 = vsel %vm331_vm15, %v267_v35, %v395_v40  ;;  %v268_v49 = vadd.f32 %v1320_v7, %v197_v41  ;;  %v269_v52 = vadd.f32 %v1320_v7, %v198_v45 }
  0x52   :  { %v1176_v51 = vpack.c.bf16 %v459_v48, %v458_v44  ;;  %v1036_v54 = vunpack.c.l.bf16 %v1243_v42  ;;  %v200_v57 = vmul.f32 %v1033_v50, %v1306_v1  ;;  %v1037_v58 = vunpack.c.h.bf16 %v1243_v42  ;;  %v1248_v44 = vld [vmem:[%s1631_s0 + $0xf8] sm:$0xff]  }
  0x53   :  { %1270 = vst [vmem:[%s1634_s3 + $0xb0] sm:$0xff] %v1171_v47   ;;  %vm332_vm0 = vcmp.gt.f32.partialorder %v268_v49, 0.0  ;;  %v396_v56 = vmul.f32 0.2, %v268_v49  ;;  %vm333_vm1 = vcmp.gt.f32.partialorder %v269_v52, 0.0  ;;  %v270_v60 = vadd.f32 %v1320_v7, %v199_v53 }
  0x54   :  { %1271 = vst [vmem:[%s1634_s3 + $0xb8] sm:$0xff] %v1176_v51   ;;  %v397_v59 = vmul.f32 0.2, %v269_v52  ;;  %v201_v61 = vmul.f32 %v1036_v54, %v1306_v1  ;;  %v271_v63 = vadd.f32 %v1320_v7, %v200_v57  ;;  %v202_v0 = vmul.f32 %v1037_v58, %v1306_v1 }
  0x55   :  { %v460_v62 = vsel %vm332_vm0, %v268_v49, %v396_v56  ;;  %v1040_v2 = vunpack.c.l.bf16 %v1244_v55  ;;  %vm334_vm2 = vcmp.gt.f32.partialorder %v270_v60, 0.0  ;;  %v398_v4 = vmul.f32 0.2, %v270_v60 }
  0x56   :  { %v461_v3 = vsel %vm333_vm1, %v269_v52, %v397_v59  ;;  %v272_v5 = vadd.f32 %v1320_v7, %v201_v61  ;;  %vm335_vm3 = vcmp.gt.f32.partialorder %v271_v63, 0.0  ;;  %v399_v8 = vmul.f32 0.2, %v271_v63 }
  0x57   :  { %v1181_v6 = vpack.c.bf16 %v461_v3, %v460_v62  ;;  %v273_v9 = vadd.f32 %v1320_v7, %v202_v0  ;;  %v462_v11 = vsel %vm334_vm2, %v270_v60, %v398_v4  ;;  %v1041_v13 = vunpack.c.h.bf16 %v1244_v55 }
  0x58   :  { %vm336_vm4 = vcmp.gt.f32.partialorder %v272_v5, 0.0  ;;  %v400_v12 = vmul.f32 0.2, %v272_v5  ;;  %v463_v15 = vsel %vm335_vm3, %v271_v63, %v399_v8  ;;  %v203_v17 = vmul.f32 %v1040_v2, %v1306_v1 }
  0x59   :  { %1272 = vst [vmem:[%s1634_s3 + $0xc0] sm:$0xff] %v1181_v6   ;;  %vm337_vm5 = vcmp.gt.f32.partialorder %v273_v9, 0.0  ;;  %v401_v16 = vmul.f32 0.2, %v273_v9  ;;  %v1186_v18 = vpack.c.bf16 %v463_v15, %v462_v11  ;;  %v204_v20 = vmul.f32 %v1041_v13, %v1306_v1 }
  0x5a   :  { %v464_v19 = vsel %vm336_vm4, %v272_v5, %v400_v12  ;;  %v1044_v21 = vunpack.c.l.bf16 %v1245_v10  ;;  %v274_v23 = vadd.f32 %v1320_v7, %v203_v17  ;;  %v1045_v24 = vunpack.c.h.bf16 %v1245_v10 }
  0x5b   :  { %v465_v22 = vsel %vm337_vm5, %v273_v9, %v401_v16  ;;  %v1048_v25 = vunpack.c.l.bf16 %v1246_v14  ;;  %1273 = vst [vmem:[%s1634_s3 + $0xc8] sm:$0xff] %v1186_v18   ;;  %v275_v27 = vadd.f32 %v1320_v7, %v204_v20  ;;  %v1049_v29 = vunpack.c.h.bf16 %v1246_v14 }
  0x5c   :  { %v1191_v26 = vpack.c.bf16 %v465_v22, %v464_v19  ;;  %v205_v28 = vmul.f32 %v1044_v21, %v1306_v1  ;;  %vm338_vm6 = vcmp.gt.f32.partialorder %v274_v23, 0.0  ;;  %v402_v31 = vmul.f32 0.2, %v274_v23 }
  0x5d   :  { %v206_v32 = vmul.f32 %v1045_v24, %v1306_v1  ;;  %v207_v33 = vmul.f32 %v1048_v25, %v1306_v1  ;;  %vm339_vm7 = vcmp.gt.f32.partialorder %v275_v27, 0.0  ;;  %v403_v34 = vmul.f32 0.2, %v275_v27 }
  0x5e   :  { %1274 = vst [vmem:[%s1634_s3 + $0xd0] sm:$0xff] %v1191_v26   ;;  %v276_v35 = vadd.f32 %v1320_v7, %v205_v28  ;;  %v208_v36 = vmul.f32 %v1049_v29, %v1306_v1  ;;  %v466_v37 = vsel %vm338_vm6, %v274_v23, %v402_v31  ;;  %v1052_v40 = vunpack.c.l.bf16 %v1247_v30 }
  0x5f   :  { %v277_v38 = vadd.f32 %v1320_v7, %v206_v32  ;;  %v278_v39 = vadd.f32 %v1320_v7, %v207_v33  ;;  %v467_v41 = vsel %vm339_vm7, %v275_v27, %v403_v34  ;;  %v1053_v51 = vunpack.c.h.bf16 %v1247_v30 }
  0x60   :  { %vm340_vm8 = vcmp.gt.f32.partialorder %v276_v35, 0.0  ;;  %v404_v42 = vmul.f32 0.2, %v276_v35  ;;  %v279_v43 = vadd.f32 %v1320_v7, %v208_v36  ;;  %v1196_v45 = vpack.c.bf16 %v467_v41, %v466_v37 }
  0x61   :  { %vm341_vm9 = vcmp.gt.f32.partialorder %v277_v38, 0.0  ;;  %v405_v46 = vmul.f32 0.2, %v277_v38  ;;  %vm342_vm10 = vcmp.gt.f32.partialorder %v278_v39, 0.0  ;;  %v406_v48 = vmul.f32 0.2, %v278_v39 }
  0x62   :  { %v468_v47 = vsel %vm340_vm8, %v276_v35, %v404_v42  ;;  %vm343_vm11 = vcmp.gt.f32.partialorder %v279_v43, 0.0  ;;  %v407_v49 = vmul.f32 0.2, %v279_v43  ;;  %1275 = vst [vmem:[%s1634_s3 + $0xd8] sm:$0xff] %v1196_v45   ;;  %v209_v52 = vmul.f32 %v1052_v40, %v1306_v1 }
  0x63   :  { %v469_v50 = vsel %vm341_vm9, %v277_v38, %v405_v46  ;;  %v1056_v53 = vunpack.c.l.bf16 %v1248_v44  ;;  %v470_v55 = vsel %vm342_vm10, %v278_v39, %v406_v48  ;;  %v1057_v57 = vunpack.c.h.bf16 %v1248_v44 }
  0x64   :  { %v1201_v54 = vpack.c.bf16 %v469_v50, %v468_v47  ;;  %v471_v56 = vsel %vm343_vm11, %v279_v43, %v407_v49  ;;  %v210_v59 = vmul.f32 %v1053_v51, %v1306_v1  ;;  %v280_v60 = vadd.f32 %v1320_v7, %v209_v52 }
  0x65   :  { %v1206_v58 = vpack.c.bf16 %v471_v56, %v470_v55  ;;  %v211_v61 = vmul.f32 %v1056_v53, %v1306_v1  ;;  %v212_v62 = vmul.f32 %v1057_v57, %v1306_v1 }
  0x66   :  { %1276 = vst [vmem:[%s1634_s3 + $0xe0] sm:$0xff] %v1201_v54   ;;  %v281_v63 = vadd.f32 %v1320_v7, %v210_v59  ;;  %vm344_vm12 = vcmp.gt.f32.partialorder %v280_v60, 0.0  ;;  %v408_v0 = vmul.f32 0.2, %v280_v60 }
  0x67   :  { %1277 = vst [vmem:[%s1634_s3 + $0xe8] sm:$0xff] %v1206_v58   ;;  %v282_v2 = vadd.f32 %v1320_v7, %v211_v61  ;;  %v283_v3 = vadd.f32 %v1320_v7, %v212_v62 }
  0x68   :  { %vm345_vm13 = vcmp.gt.f32.partialorder %v281_v63, 0.0  ;;  %v409_v4 = vmul.f32 0.2, %v281_v63  ;;  %v472_v5 = vsel %vm344_vm12, %v280_v60, %v408_v0 }
  0x69   :  { %vm346_vm14 = vcmp.gt.f32.partialorder %v282_v2, 0.0  ;;  %vm347_vm15 = vcmp.gt.f32.partialorder %v283_v3, 0.0  ;;  %v410_v6 = vmul.f32 0.2, %v282_v2  ;;  %v411_v8 = vmul.f32 0.2, %v283_v3 }
  0x6a   :  { %v473_v1 = vsel %vm345_vm13, %v281_v63, %v409_v4 }
  0x6b   :  { %v1211_v9 = vpack.c.bf16 %v473_v1, %v472_v5  ;;  %v474_v10 = vsel %vm346_vm14, %v282_v2, %v410_v6  ;;  %v475_v11 = vsel %vm347_vm15, %v283_v3, %v411_v8 }
  0x6c   :  { %v1216_v12 = vpack.c.bf16 %v475_v11, %v474_v10 }
  0x6d   :  { %1278 = vst [vmem:[%s1634_s3 + $0xf0] sm:$0xff] %v1211_v9  }
  0x6e   :  { %1279 = vst [vmem:[%s1634_s3 + $0xf8] sm:$0xff] %v1216_v12  }

// kernel: discriminator_forward.11
= control target key start
LH: loop header
LB: loop body
LE: loop exit
PB: predicated region body
PF: predicated region fallthrough
CT: control target
= control target key end

     0   :  { %s880_s1 = inlined_call_operand.vmem [shape: bf16[256,128], index: 1, kind: input, shape index: {}]   ;;  %s881_s0 = inlined_call_operand.vmem [shape: bf16[128,256], index: 0, kind: input, shape index: {}]   ;;  %s882_s2 = inlined_call_operand.vmem [shape: bf16[128,128], index: 2, kind: output, shape index: {0}]   ;;  %s883_s3 = inlined_call_operand.vmem [shape: f32[1,8,128], index: 3, kind: output, shape index: {1}]  }
   0x1   :  { %v679_v0 = vld [vmem:[%s880_s1 + $0x40] sm:$0xff]   ;;  %v681_v2 = vld [vmem:[%s880_s1 + $0x48] sm:$0xff]   ;;  %v683_v4 = vld [vmem:[%s880_s1 + $0x50] sm:$0xff]  }
   0x2   :  { %v680_v1 = vld [vmem:[%s880_s1] sm:$0xff]   ;;  %599 = vmatprep.subr.bf16.mxu0 %v679_v0  ;;  %663 = vmatprep.subr.bf16.mxu1 %v679_v0  ;;  %v682_v3 = vld [vmem:[%s880_s1 + $0x8] sm:$0xff]   ;;  %v684_v5 = vld [vmem:[%s880_s1 + $0x10] sm:$0xff]  }
   0x3   :  { %600 = vmatpush3.bf16.msra.mxu0 %v680_v1  ;;  %671 = vmatpush3.bf16.msra.mxu1 %v680_v1  ;;  %v685_v6 = vld [vmem:[%s880_s1 + $0x58] sm:$0xff]   ;;  %v687_v8 = vld [vmem:[%s880_s1 + $0x60] sm:$0xff]   ;;  %v689_v10 = vld [vmem:[%s880_s1 + $0x68] sm:$0xff]  }
   0x4   :  { %601 = vmatprep.subr.bf16.mxu0 %v681_v2  ;;  %664 = vmatprep.subr.bf16.mxu1 %v681_v2  ;;  %v686_v7 = vld [vmem:[%s880_s1 + $0x18] sm:$0xff]   ;;  %v688_v9 = vld [vmem:[%s880_s1 + $0x20] sm:$0xff]   ;;  %v690_v12 = vld [vmem:[%s880_s1 + $0x28] sm:$0xff]  }
   0x5   :  { %v697_v11 = vld [vmem:[%s881_s0 + $0x4] ss:$8 sps:$4 sm:$0xff]   ;;  %v691_v14 = vld [vmem:[%s880_s1 + $0x70] sm:$0xff]   ;;  %v693_v16 = vld [vmem:[%s880_s1 + $0x78] sm:$0xff]  }
   0x6   :  { %v703_v13 = vld [vmem:[%s881_s0 + $0x44] ss:$8 sps:$4 sm:$0xff]   ;;  %270 = vmatprep.mubr.bf16.mxu0 %v697_v11  ;;  %v692_v15 = vld [vmem:[%s880_s1 + $0x30] sm:$0xff]   ;;  %v694_v17 = vld [vmem:[%s880_s1 + $0x38] sm:$0xff]  }
   0x7   :  { %602 = vmatpush3.bf16.msra.mxu0 %v682_v3  ;;  %672 = vmatpush3.bf16.msra.mxu1 %v682_v3  ;;  %v695_v18 = vld [vmem:[%s881_s0] ss:$8 sps:$4 sm:$0xff]   ;;  %v698_v20 = vld [vmem:[%s881_s0 + $0x14] ss:$8 sps:$4 sm:$0xff]   ;;  %v700_v22 = vld [vmem:[%s881_s0 + $0x10] ss:$8 sps:$4 sm:$0xff]  }
   0x8   :  { %603 = vmatprep.subr.bf16.mxu0 %v683_v4  ;;  %665 = vmatprep.subr.bf16.mxu1 %v683_v4  ;;  %v701_v19 = vld [vmem:[%s881_s0 + $0x40] ss:$8 sps:$4 sm:$0xff]   ;;  %v707_v21 = vld [vmem:[%s881_s0 + $0x54] ss:$8 sps:$4 sm:$0xff]   ;;  %v709_v23 = vld [vmem:[%s881_s0 + $0x50] ss:$8 sps:$4 sm:$0xff]  }
   0x9   :  { %302 = vmatprep.mubr.bf16.mxu1 %v703_v13  ;;  %v704_v24 = vld [vmem:[%s881_s0 + $0x24] ss:$8 sps:$4 sm:$0xff]   ;;  %v706_v26 = vld [vmem:[%s881_s0 + $0x20] ss:$8 sps:$4 sm:$0xff]   ;;  %v710_v28 = vld [vmem:[%s881_s0 + $0x34] ss:$8 sps:$4 sm:$0xff]  }
   0xa   :  { %v713_v25 = vld [vmem:[%s881_s0 + $0x64] ss:$8 sps:$4 sm:$0xff]   ;;  %v715_v27 = vld [vmem:[%s881_s0 + $0x60] ss:$8 sps:$4 sm:$0xff]   ;;  %v716_v29 = vld [vmem:[%s881_s0 + $0x74] ss:$8 sps:$4 sm:$0xff]  }
   0xb   :  { %604 = vmatpush3.bf16.msra.mxu0 %v684_v5  ;;  %673 = vmatpush3.bf16.msra.mxu1 %v684_v5  ;;  %v712_v30 = vld [vmem:[%s881_s0 + $0x30] ss:$8 sps:$4 sm:$0xff]  }
   0xc   :  { %605 = vmatprep.subr.bf16.mxu0 %v685_v6  ;;  %666 = vmatprep.subr.bf16.mxu1 %v685_v6  ;;  %v718_v31 = vld [vmem:[%s881_s0 + $0x70] ss:$8 sps:$4 sm:$0xff]  }
   0xf   :  { %606 = vmatpush3.bf16.msra.mxu0 %v686_v7  ;;  %674 = vmatpush3.bf16.msra.mxu1 %v686_v7 }
  0x10   :  { %607 = vmatprep.subr.bf16.mxu0 %v687_v8  ;;  %667 = vmatprep.subr.bf16.mxu1 %v687_v8 }
  0x13   :  { %608 = vmatpush3.bf16.msra.mxu0 %v688_v9  ;;  %675 = vmatpush3.bf16.msra.mxu1 %v688_v9 }
  0x14   :  { %609 = vmatprep.subr.bf16.mxu0 %v689_v10  ;;  %668 = vmatprep.subr.bf16.mxu1 %v689_v10 }
  0x17   :  { %610 = vmatpush3.bf16.msra.mxu0 %v690_v12  ;;  %676 = vmatpush3.bf16.msra.mxu1 %v690_v12 }
  0x18   :  { %611 = vmatprep.subr.bf16.mxu0 %v691_v14  ;;  %669 = vmatprep.subr.bf16.mxu1 %v691_v14 }
  0x1b   :  { %612 = vmatpush3.bf16.msra.mxu0 %v692_v15  ;;  %677 = vmatpush3.bf16.msra.mxu1 %v692_v15 }
  0x1c   :  { %613 = vmatprep.subr.bf16.mxu0 %v693_v16  ;;  %670 = vmatprep.subr.bf16.mxu1 %v693_v16 }
  0x1f   :  { %614 = vmatpush3.bf16.msra.mxu0 %v694_v17  ;;  %678 = vmatpush3.bf16.msra.mxu1 %v694_v17 }
  0x22   :  { %271 = vmatmul.mubr.bf16.vlgmr.msra.gmra.mrb[0].mxu0 %v695_v18  ;;  %303 = vmatmul.mubr.bf16.vlgmr.msra.gmra.mrb[0].mxu1 %v701_v19 }
  0x23   :  { %278 = vmatprep.mubr.bf16.mxu0 %v698_v20  ;;  %310 = vmatprep.mubr.bf16.mxu1 %v707_v21 }
  0x2a   :  { %279 = vmatmul.mubr.bf16.gmra.mrb[4].mxu0 %v700_v22  ;;  %311 = vmatmul.mubr.bf16.gmra.mrb[4].mxu1 %v709_v23 }
  0x2b   :  { %286 = vmatprep.mubr.bf16.mxu0 %v704_v24  ;;  %318 = vmatprep.mubr.bf16.mxu1 %v713_v25 }
  0x32   :  { %287 = vmatmul.mubr.bf16.gmra.mrb[8].mxu0 %v706_v26  ;;  %319 = vmatmul.mubr.bf16.gmra.mrb[8].mxu1 %v715_v27 }
  0x33   :  { %294 = vmatprep.mubr.bf16.mxu0 %v710_v28  ;;  %326 = vmatprep.mubr.bf16.mxu1 %v716_v29 }
  0x3a   :  { %295 = vmatmul.mubr.bf16.gmra.mrb[12].mxu0 %v712_v30  ;;  %327 = vmatmul.mubr.bf16.gmra.mrb[12].mxu1 %v718_v31 }
  0xf5   :  { %v615_v32 = vpop.f32.mrb[0].mxu0  ;;  %v639_v33 = vpop.f32.mrb[0].mxu1 }
  0xf6   :  { %v616_v34 = vpop.f32.mrb[1].mxu0  ;;  %v640_v35 = vpop.f32.mrb[1].mxu1 }
  0xf7   :  { %v617_v36 = vadd.f32 %v616_v34, %v615_v32  ;;  %v618_v37 = vpop.f32.mrb[2].mxu0  ;;  %v835_v38 = vadd.f32 %v640_v35, %v639_v33  ;;  %v642_v39 = vpop.f32.mrb[2].mxu1 }
  0xf8   :  { %v619_v40 = vpop.f32.mrb[3].mxu0  ;;  %v643_v41 = vpop.f32.mrb[3].mxu1 }
  0xf9   :  { %v620_v42 = vadd.f32 %v619_v40, %v618_v37  ;;  %v837_v43 = vadd.f32 %v643_v41, %v642_v39  ;;  %v436_v44 = vmul.f32 %v617_v36, %v617_v36 }
  0xfb   :  { %v555_v45 = vpack.c.bf16 %v620_v42, %v617_v36  ;;  %v415_v46 = vadd.f32 %v620_v42, %v617_v36  ;;  %v437_v47 = vmul.f32 %v620_v42, %v620_v42  ;;  %v575_v48 = vpack.c.bf16 %v837_v43, %v835_v38 }
  0xfd   :  { %556 = vst [vmem:[%s882_s2] sm:$0xff] %v555_v45   ;;  %v452_v49 = vadd.f32 %v437_v47, %v436_v44  ;;  %v621_v50 = vpop.f32.mrb[4].mxu0  ;;  %595 = vst [vmem:[%s882_s2 + $0x20] sm:$0xff] %v575_v48   ;;  %v645_v51 = vpop.f32.mrb[4].mxu1  ;;  %v444_v47 = vmul.f32 %v835_v38, %v835_v38 }
  0xfe   :  { %v622_v52 = vpop.f32.mrb[5].mxu0  ;;  %v646_v53 = vpop.f32.mrb[5].mxu1 }
  0xff   :  { %v623_v54 = vadd.f32 %v622_v52, %v621_v50  ;;  %v624_v55 = vpop.f32.mrb[6].mxu0  ;;  %v847_v56 = vadd.f32 %v646_v53, %v645_v51  ;;  %v648_v57 = vpop.f32.mrb[6].mxu1  ;;  %v445_v50 = vmul.f32 %v837_v43, %v837_v43 }
 0x100   :  { %v625_v58 = vpop.f32.mrb[7].mxu0  ;;  %v649_v59 = vpop.f32.mrb[7].mxu1 }
 0x101   :  { %v416_v60 = vadd.f32 %v623_v54, %v415_v46  ;;  %v438_v61 = vmul.f32 %v623_v54, %v623_v54  ;;  %v626_v62 = vadd.f32 %v625_v58, %v624_v55  ;;  %v650_v63 = vadd.f32 %v649_v59, %v648_v57 }
 0x102   :  { %v446_v53 = vmul.f32 %v847_v56, %v847_v56 }
 0x103   :  { %v453_v0 = vadd.f32 %v452_v49, %v438_v61  ;;  %v560_v1 = vpack.c.bf16 %v626_v62, %v623_v54  ;;  %v417_v2 = vadd.f32 %v626_v62, %v416_v60  ;;  %v439_v3 = vmul.f32 %v626_v62, %v626_v62 }
 0x104   :  { %v580_v4 = vpack.c.bf16 %v650_v63, %v847_v56  ;;  %v447_v57 = vmul.f32 %v650_v63, %v650_v63 }
 0x105   :  { %592 = vst [vmem:[%s882_s2 + $0x8] sm:$0xff] %v560_v1   ;;  %v454_v5 = vadd.f32 %v453_v0, %v439_v3  ;;  %v627_v6 = vpop.f32.mrb[8].mxu0  ;;  %v651_v7 = vpop.f32.mrb[8].mxu1 }
 0x106   :  { %v628_v8 = vpop.f32.mrb[9].mxu0  ;;  %596 = vst [vmem:[%s882_s2 + $0x28] sm:$0xff] %v580_v4   ;;  %v652_v9 = vpop.f32.mrb[9].mxu1 }
 0x107   :  { %v629_v10 = vadd.f32 %v628_v8, %v627_v6  ;;  %v630_v11 = vpop.f32.mrb[10].mxu0  ;;  %v653_v12 = vadd.f32 %v652_v9, %v651_v7  ;;  %v654_v13 = vpop.f32.mrb[10].mxu1 }
 0x108   :  { %v631_v14 = vpop.f32.mrb[11].mxu0  ;;  %v655_v15 = vpop.f32.mrb[11].mxu1 }
 0x109   :  { %v418_v16 = vadd.f32 %v629_v10, %v417_v2  ;;  %v440_v17 = vmul.f32 %v629_v10, %v629_v10  ;;  %v632_v18 = vadd.f32 %v631_v14, %v630_v11  ;;  %v656_v19 = vadd.f32 %v655_v15, %v654_v13 }
 0x10a   :  { %v448_v60 = vmul.f32 %v653_v12, %v653_v12 }
 0x10b   :  { %v455_v20 = vadd.f32 %v454_v5, %v440_v17  ;;  %v565_v21 = vpack.c.bf16 %v632_v18, %v629_v10  ;;  %v419_v22 = vadd.f32 %v632_v18, %v418_v16  ;;  %v441_v23 = vmul.f32 %v632_v18, %v632_v18 }
 0x10c   :  { %v585_v24 = vpack.c.bf16 %v656_v19, %v653_v12  ;;  %v449_v1 = vmul.f32 %v656_v19, %v656_v19 }
 0x10d   :  { %593 = vst [vmem:[%s882_s2 + $0x10] sm:$0xff] %v565_v21   ;;  %v456_v25 = vadd.f32 %v455_v20, %v441_v23  ;;  %v633_v26 = vpop.f32.mrb[12].mxu0  ;;  %v657_v27 = vpop.f32.mrb[12].mxu1 }
 0x10e   :  { %v634_v28 = vpop.f32.mrb[13].mxu0  ;;  %597 = vst [vmem:[%s882_s2 + $0x30] sm:$0xff] %v585_v24   ;;  %v658_v29 = vpop.f32.mrb[13].mxu1 }
 0x10f   :  { %v635_v30 = vadd.f32 %v634_v28, %v633_v26  ;;  %v636_v31 = vpop.f32.mrb[14].mxu0  ;;  %v659_v32 = vadd.f32 %v658_v29, %v657_v27  ;;  %v660_v33 = vpop.f32.mrb[14].mxu1 }
 0x110   :  { %v637_v34 = vpop.f32.mrb[15].mxu0  ;;  %v661_v35 = vpop.f32.mrb[15].mxu1 }
 0x111   :  { %v420_v36 = vadd.f32 %v635_v30, %v419_v22  ;;  %v442_v37 = vmul.f32 %v635_v30, %v635_v30  ;;  %v638_v39 = vadd.f32 %v637_v34, %v636_v31  ;;  %v662_v40 = vadd.f32 %v661_v35, %v660_v33 }
 0x112   :  { %v450_v2 = vmul.f32 %v659_v32, %v659_v32 }
 0x113   :  { %v457_v41 = vadd.f32 %v456_v25, %v442_v37  ;;  %v570_v42 = vpack.c.bf16 %v638_v39, %v635_v30  ;;  %v421_v44 = vadd.f32 %v638_v39, %v420_v36  ;;  %v443_v45 = vmul.f32 %v638_v39, %v638_v39 }
 0x114   :  { %v590_v46 = vpack.c.bf16 %v662_v40, %v659_v32  ;;  %v451_v6 = vmul.f32 %v662_v40, %v662_v40 }
 0x115   :  { %594 = vst [vmem:[%s882_s2 + $0x18] sm:$0xff] %v570_v42   ;;  %v422_v48 = vadd.f32 %v835_v38, %v421_v44  ;;  %v458_v49 = vadd.f32 %v457_v41, %v443_v45 }
 0x116   :  { %598 = vst [vmem:[%s882_s2 + $0x38] sm:$0xff] %v590_v46  }
 0x117   :  { %v423_v51 = vadd.f32 %v837_v43, %v422_v48  ;;  %v459_v52 = vadd.f32 %v458_v49, %v444_v47 }
 0x119   :  { %v460_v54 = vadd.f32 %v459_v52, %v445_v50  ;;  %v424_v55 = vadd.f32 %v847_v56, %v423_v51  ;;  %v473_v56 = vlaneseq }
 0x11b   :  { %v425_v58 = vadd.f32 %v650_v63, %v424_v55  ;;  %v461_v38 = vadd.f32 %v460_v54, %v446_v53 }
 0x11d   :  { %v426_v59 = vadd.f32 %v653_v12, %v425_v58  ;;  %v462_v61 = vadd.f32 %v461_v38, %v447_v57  ;;  %v474_v12 = vshrl.u32 %v473_v56, 7 }
 0x11f   :  { %v463_v62 = vadd.f32 %v462_v61, %v448_v60  ;;  %v427_v0 = vadd.f32 %v656_v19, %v426_v59  ;;  %vm476_vm0 = vcmp.eq.s32.totalorder %v474_v12, 1  ;;  %vm475_vm1 = vcmp.eq.s32.totalorder %v474_v12, 0 }
 0x121   :  { %v464_v3 = vadd.f32 %v463_v62, %v449_v1  ;;  %v428_v4 = vadd.f32 %v659_v32, %v427_v0 }
 0x123   :  { %v465_v43 = vadd.f32 %v464_v3, %v450_v2  ;;  %v429_v5 = vadd.f32 %v662_v40, %v428_v4 }
 0x125   :  { %v430_v7 = vrot.slane %v429_v5, 4  ;;  %v466_v8 = vadd.f32 %v465_v43, %v451_v6 }
 0x127   :  { %v431_v9 = vadd.f32 %v430_v7, %v429_v5  ;;  %v467_v10 = vrot.slane %v466_v8, 4 }
 0x129   :  { %v432_v11 = vrot.slane %v431_v9, 2  ;;  %v468_v63 = vadd.f32 %v467_v10, %v466_v8 }
 0x12b   :  { %v433_v13 = vadd.f32 %v432_v11, %v431_v9  ;;  %v469_v14 = vrot.slane %v468_v63, 2 }
 0x12d   :  { %v470_v15 = vadd.f32 %v469_v14, %v468_v63  ;;  %v434_v16 = vrot.slane %v433_v13, 1 }
 0x12f   :  { %v471_v17 = vrot.slane %v470_v15, 1  ;;  %v435_v19 = vadd.f32 %v434_v16, %v433_v13 }
 0x131   :  { %v472_v18 = vadd.f32 %v471_v17, %v470_v15 }
 0x133   :  { %v477_v20 = vsel %vm476_vm0, %v472_v18, 0.0 }
 0x134   :  { %v478_v21 = vsel %vm475_vm1, %v435_v19, %v477_v20 }
 0x135   :  { %479 = vst [vmem:[%s883_s3] sm:$0xff] %v478_v21 }

// kernel: discriminator_forward.12
= control target key start
LH: loop header
LB: loop body
LE: loop exit
PB: predicated region body
PF: predicated region fallthrough
CT: control target
= control target key end

     0   :  { %s455_s0 = inlined_call_operand.vmem [shape: bf16[128,128], index: 0, kind: input, shape index: {}]   ;;  %s456_s1 = inlined_call_operand.vmem [shape: f32[1,128], index: 1, kind: input, shape index: {}]   ;;  %s457_s2 = inlined_call_operand.vmem [shape: f32[1,128], index: 2, kind: input, shape index: {}]   ;;  %s458_s3 = inlined_call_operand.vmem [shape: bf16[128,128], index: 3, kind: output, shape index: {}]  }
   0x1   :  { %v259_v0 = vld [vmem:[%s455_s0] sm:$0xff]   ;;  %v330_v4 = vld [vmem:[%s455_s0 + $0x8] sm:$0xff]   ;;  %v331_v5 = vld [vmem:[%s455_s0 + $0x10] sm:$0xff]  }
   0x2   :  { %v370_v1 = vld [vmem:[%s456_s1] ss:$0 sm:$0xff]  ;;  %v260_v2 = vunpack.c.l.bf16 %v259_v0  ;;  %v261_v3 = vunpack.c.h.bf16 %v259_v0  ;;  %v332_v6 = vld [vmem:[%s455_s0 + $0x18] sm:$0xff]   ;;  %v264_v8 = vunpack.c.l.bf16 %v330_v4  ;;  %v265_v9 = vunpack.c.h.bf16 %v330_v4  ;;  %v334_v35 = vld [vmem:[%s455_s0 + $0x28] sm:$0xff]  }
   0x3   :  { %v384_v7 = vld [vmem:[%s457_s2] ss:$0 sm:$0xff]  ;;  %v268_v10 = vunpack.c.l.bf16 %v331_v5  ;;  %v269_v11 = vunpack.c.h.bf16 %v331_v5  ;;  %v272_v14 = vunpack.c.l.bf16 %v332_v6  ;;  %v273_v15 = vunpack.c.h.bf16 %v332_v6  ;;  %v335_v48 = vld [vmem:[%s455_s0 + $0x30] sm:$0xff]   ;;  %v336_v4 = vld [vmem:[%s455_s0 + $0x38] sm:$0xff]  }
   0x4   :  { %v53_v12 = vmul.f32 %v260_v2, %v370_v1  ;;  %v54_v13 = vmul.f32 %v261_v3, %v370_v1  ;;  %v55_v16 = vmul.f32 %v264_v8, %v370_v1  ;;  %v56_v17 = vmul.f32 %v265_v9, %v370_v1  ;;  %v333_v34 = vld [vmem:[%s455_s0 + $0x20] sm:$0xff]  }
   0x5   :  { %v57_v18 = vmul.f32 %v268_v10, %v370_v1  ;;  %v58_v19 = vmul.f32 %v269_v11, %v370_v1  ;;  %v59_v22 = vmul.f32 %v272_v14, %v370_v1  ;;  %v60_v23 = vmul.f32 %v273_v15, %v370_v1 }
   0x6   :  { %v76_v20 = vadd.f32 %v384_v7, %v53_v12  ;;  %v77_v21 = vadd.f32 %v384_v7, %v54_v13  ;;  %v78_v24 = vadd.f32 %v384_v7, %v55_v16  ;;  %v79_v25 = vadd.f32 %v384_v7, %v56_v17 }
   0x7   :  { %v80_v26 = vadd.f32 %v384_v7, %v57_v18  ;;  %v81_v27 = vadd.f32 %v384_v7, %v58_v19  ;;  %v82_v42 = vadd.f32 %v384_v7, %v59_v22  ;;  %v83_v43 = vadd.f32 %v384_v7, %v60_v23 }
   0x8   :  { %vm92_vm0 = vcmp.gt.f32.partialorder %v76_v20, 0.0  ;;  %vm93_vm1 = vcmp.gt.f32.partialorder %v77_v21, 0.0  ;;  %v108_v28 = vmul.f32 0.2, %v76_v20  ;;  %v109_v29 = vmul.f32 0.2, %v77_v21 }
   0x9   :  { %vm94_vm2 = vcmp.gt.f32.partialorder %v78_v24, 0.0  ;;  %vm95_vm3 = vcmp.gt.f32.partialorder %v79_v25, 0.0  ;;  %v110_v30 = vmul.f32 0.2, %v78_v24  ;;  %v111_v31 = vmul.f32 0.2, %v79_v25 }
   0xa   :  { %v124_v32 = vsel %vm92_vm0, %v76_v20, %v108_v28  ;;  %v125_v33 = vsel %vm93_vm1, %v77_v21, %v109_v29  ;;  %vm96_vm4 = vcmp.gt.f32.partialorder %v80_v26, 0.0  ;;  %vm97_vm5 = vcmp.gt.f32.partialorder %v81_v27, 0.0 }
   0xb   :  { %v293_v36 = vpack.c.bf16 %v125_v33, %v124_v32  ;;  %v126_v37 = vsel %vm94_vm2, %v78_v24, %v110_v30  ;;  %v127_v38 = vsel %vm95_vm3, %v79_v25, %v111_v31  ;;  %v112_v39 = vmul.f32 0.2, %v80_v26 }
   0xc   :  { %v298_v40 = vpack.c.bf16 %v127_v38, %v126_v37  ;;  %v113_v41 = vmul.f32 0.2, %v81_v27  ;;  %v276_v45 = vunpack.c.l.bf16 %v333_v34  ;;  %v277_v46 = vunpack.c.h.bf16 %v333_v34 }
   0xd   :  { %294 = vst [vmem:[%s458_s3] sm:$0xff] %v293_v36   ;;  %v128_v44 = vsel %vm96_vm4, %v80_v26, %v112_v39  ;;  %v280_v47 = vunpack.c.l.bf16 %v334_v35  ;;  %vm98_vm6 = vcmp.gt.f32.partialorder %v82_v42, 0.0  ;;  %vm99_vm7 = vcmp.gt.f32.partialorder %v83_v43, 0.0 }
   0xe   :  { %337 = vst [vmem:[%s458_s3 + $0x8] sm:$0xff] %v298_v40   ;;  %v129_v49 = vsel %vm97_vm5, %v81_v27, %v113_v41  ;;  %v114_v50 = vmul.f32 0.2, %v82_v42  ;;  %v115_v52 = vmul.f32 0.2, %v83_v43  ;;  %v61_v53 = vmul.f32 %v276_v45, %v370_v1 }
   0xf   :  { %v303_v51 = vpack.c.bf16 %v129_v49, %v128_v44  ;;  %v62_v54 = vmul.f32 %v277_v46, %v370_v1  ;;  %v281_v56 = vunpack.c.h.bf16 %v334_v35  ;;  %v63_v57 = vmul.f32 %v280_v47, %v370_v1 }
  0x10   :  { %v130_v55 = vsel %vm98_vm6, %v82_v42, %v114_v50  ;;  %v284_v58 = vunpack.c.l.bf16 %v335_v48  ;;  %v131_v59 = vsel %vm99_vm7, %v83_v43, %v115_v52  ;;  %v84_v60 = vadd.f32 %v384_v7, %v61_v53 }
  0x11   :  { %338 = vst [vmem:[%s458_s3 + $0x10] sm:$0xff] %v303_v51   ;;  %v85_v61 = vadd.f32 %v384_v7, %v62_v54  ;;  %v285_v62 = vunpack.c.h.bf16 %v335_v48  ;;  %v308_v63 = vpack.c.bf16 %v131_v59, %v130_v55  ;;  %v64_v0 = vmul.f32 %v281_v56, %v370_v1 }
  0x12   :  { %v86_v2 = vadd.f32 %v384_v7, %v63_v57  ;;  %v65_v3 = vmul.f32 %v284_v58, %v370_v1  ;;  %vm100_vm8 = vcmp.gt.f32.partialorder %v84_v60, 0.0  ;;  %v116_v5 = vmul.f32 0.2, %v84_v60 }
  0x13   :  { %vm101_vm9 = vcmp.gt.f32.partialorder %v85_v61, 0.0  ;;  %v117_v6 = vmul.f32 0.2, %v85_v61  ;;  %339 = vst [vmem:[%s458_s3 + $0x18] sm:$0xff] %v308_v63   ;;  %v87_v8 = vadd.f32 %v384_v7, %v64_v0  ;;  %v66_v10 = vmul.f32 %v285_v62, %v370_v1 }
  0x14   :  { %vm102_vm10 = vcmp.gt.f32.partialorder %v86_v2, 0.0  ;;  %v118_v9 = vmul.f32 0.2, %v86_v2  ;;  %v132_v11 = vsel %vm100_vm8, %v84_v60, %v116_v5  ;;  %v88_v13 = vadd.f32 %v384_v7, %v65_v3 }
  0x15   :  { %v133_v12 = vsel %vm101_vm9, %v85_v61, %v117_v6  ;;  %v288_v14 = vunpack.c.l.bf16 %v336_v4  ;;  %vm103_vm11 = vcmp.gt.f32.partialorder %v87_v8, 0.0  ;;  %v119_v16 = vmul.f32 0.2, %v87_v8 }
  0x16   :  { %v313_v15 = vpack.c.bf16 %v133_v12, %v132_v11  ;;  %v134_v17 = vsel %vm102_vm10, %v86_v2, %v118_v9  ;;  %v89_v18 = vadd.f32 %v384_v7, %v66_v10  ;;  %vm104_vm12 = vcmp.gt.f32.partialorder %v88_v13, 0.0 }
  0x17   :  { %v120_v19 = vmul.f32 0.2, %v88_v13  ;;  %v289_v20 = vunpack.c.h.bf16 %v336_v4  ;;  %v135_v21 = vsel %vm103_vm11, %v87_v8, %v119_v16  ;;  %v67_v22 = vmul.f32 %v288_v14, %v370_v1 }
  0x18   :  { %340 = vst [vmem:[%s458_s3 + $0x20] sm:$0xff] %v313_v15   ;;  %v318_v23 = vpack.c.bf16 %v135_v21, %v134_v17  ;;  %vm105_vm13 = vcmp.gt.f32.partialorder %v89_v18, 0.0  ;;  %v121_v24 = vmul.f32 0.2, %v89_v18 }
  0x19   :  { %v136_v25 = vsel %vm104_vm12, %v88_v13, %v120_v19  ;;  %v68_v26 = vmul.f32 %v289_v20, %v370_v1  ;;  %v90_v27 = vadd.f32 %v384_v7, %v67_v22 }
  0x1a   :  { %341 = vst [vmem:[%s458_s3 + $0x28] sm:$0xff] %v318_v23   ;;  %v137_v28 = vsel %vm105_vm13, %v89_v18, %v121_v24 }
  0x1b   :  { %v323_v29 = vpack.c.bf16 %v137_v28, %v136_v25  ;;  %v91_v30 = vadd.f32 %v384_v7, %v68_v26  ;;  %vm106_vm14 = vcmp.gt.f32.partialorder %v90_v27, 0.0  ;;  %v122_v31 = vmul.f32 0.2, %v90_v27 }
  0x1d   :  { %342 = vst [vmem:[%s458_s3 + $0x30] sm:$0xff] %v323_v29   ;;  %vm107_vm15 = vcmp.gt.f32.partialorder %v91_v30, 0.0  ;;  %v123_v32 = vmul.f32 0.2, %v91_v30  ;;  %v138_v33 = vsel %vm106_vm14, %v90_v27, %v122_v31 }
  0x1f   :  { %v139_v1 = vsel %vm107_vm15, %v91_v30, %v123_v32 }
  0x20   :  { %v328_v34 = vpack.c.bf16 %v139_v1, %v138_v33 }
  0x22   :  { %343 = vst [vmem:[%s458_s3 + $0x38] sm:$0xff] %v328_v34  }

// kernel: discriminator_forward.14
= control target key start
LH: loop header
LB: loop body
LE: loop exit
PB: predicated region body
PF: predicated region fallthrough
CT: control target
= control target key end

     0   :  { %s148_s0 = inlined_call_operand.vmem [shape: bf16[32,128], index: 0, kind: input, shape index: {}]   ;;  %s149_s1 = inlined_call_operand.vmem [shape: f32[1,128], index: 1, kind: input, shape index: {}]   ;;  %s150_s2 = inlined_call_operand.vmem [shape: f32[1,128], index: 2, kind: input, shape index: {}]   ;;  %s151_s3 = inlined_call_operand.vmem [shape: bf16[32,128], index: 3, kind: output, shape index: {}]  }
   0x1   :  { %v91_v0 = vld [vmem:[%s148_s0] sm:$0xff]   ;;  %v108_v4 = vld [vmem:[%s148_s0 + $0x8] sm:$0xff]  }
   0x2   :  { %v80_v1 = vld [vmem:[%s149_s1] ss:$0 sm:$0xff]  ;;  %v92_v2 = vunpack.c.l.bf16 %v91_v0  ;;  %v93_v3 = vunpack.c.h.bf16 %v91_v0  ;;  %v96_v6 = vunpack.c.l.bf16 %v108_v4  ;;  %v97_v7 = vunpack.c.h.bf16 %v108_v4 }
   0x3   :  { %v81_v5 = vld [vmem:[%s150_s2] ss:$0 sm:$0xff] }
   0x4   :  { %v29_v8 = vmul.f32 %v92_v2, %v80_v1  ;;  %v30_v9 = vmul.f32 %v93_v3, %v80_v1  ;;  %v31_v10 = vmul.f32 %v96_v6, %v80_v1  ;;  %v32_v11 = vmul.f32 %v97_v7, %v80_v1 }
   0x6   :  { %v40_v12 = vadd.f32 %v81_v5, %v29_v8  ;;  %v41_v13 = vadd.f32 %v81_v5, %v30_v9  ;;  %v42_v14 = vadd.f32 %v81_v5, %v31_v10  ;;  %v43_v15 = vadd.f32 %v81_v5, %v32_v11 }
   0x8   :  { %vm44_vm0 = vcmp.gt.f32.partialorder %v40_v12, 0.0  ;;  %vm45_vm1 = vcmp.gt.f32.partialorder %v41_v13, 0.0  ;;  %v48_v16 = vmul.f32 0.2, %v40_v12  ;;  %v49_v17 = vmul.f32 0.2, %v41_v13 }
   0x9   :  { %vm46_vm2 = vcmp.gt.f32.partialorder %v42_v14, 0.0  ;;  %vm47_vm3 = vcmp.gt.f32.partialorder %v43_v15, 0.0  ;;  %v50_v18 = vmul.f32 0.2, %v42_v14  ;;  %v51_v19 = vmul.f32 0.2, %v43_v15 }
   0xa   :  { %v52_v20 = vsel %vm44_vm0, %v40_v12, %v48_v16  ;;  %v53_v21 = vsel %vm45_vm1, %v41_v13, %v49_v17 }
   0xb   :  { %v101_v22 = vpack.c.bf16 %v53_v21, %v52_v20  ;;  %v54_v23 = vsel %vm46_vm2, %v42_v14, %v50_v18  ;;  %v55_v24 = vsel %vm47_vm3, %v43_v15, %v51_v19 }
   0xc   :  { %v106_v25 = vpack.c.bf16 %v55_v24, %v54_v23 }
   0xd   :  { %102 = vst [vmem:[%s151_s3] sm:$0xff] %v101_v22  }
   0xe   :  { %109 = vst [vmem:[%s151_s3 + $0x8] sm:$0xff] %v106_v25  }

// kernel: discriminator_forward.13
= control target key start
LH: loop header
LB: loop body
LE: loop exit
PB: predicated region body
PF: predicated region fallthrough
CT: control target
= control target key end

     0   :  { %s781_s1 = inlined_call_operand.vmem [shape: bf16[512,128], index: 1, kind: input, shape index: {}]   ;;  %s782_s0 = inlined_call_operand.vmem [shape: bf16[32,512], index: 0, kind: input, shape index: {}]   ;;  %s783_s2 = inlined_call_operand.vmem [shape: bf16[32,128], index: 2, kind: output, shape index: {0}]   ;;  %s784_s3 = inlined_call_operand.vmem [shape: f32[1,8,128], index: 3, kind: output, shape index: {1}]  }
   0x1   :  { %v588_v0 = vld [vmem:[%s781_s1 + $0x40] sm:$0xff]   ;;  %v592_v4 = vld [vmem:[%s781_s1 + $0x48] sm:$0xff]   ;;  %v596_v8 = vld [vmem:[%s781_s1 + $0x50] sm:$0xff]  }
   0x2   :  { %v589_v1 = vld [vmem:[%s781_s1 + $0xc0] sm:$0xff]   ;;  %532 = vmatprep.subr.bf16.mxu0 %v588_v0  ;;  %v593_v5 = vld [vmem:[%s781_s1 + $0xc8] sm:$0xff]   ;;  %v597_v9 = vld [vmem:[%s781_s1 + $0xd0] sm:$0xff]  }
   0x3   :  { %v590_v2 = vld [vmem:[%s781_s1] sm:$0xff]   ;;  %560 = vmatprep.subr.bf16.mxu1 %v589_v1  ;;  %v594_v6 = vld [vmem:[%s781_s1 + $0x8] sm:$0xff]   ;;  %v598_v10 = vld [vmem:[%s781_s1 + $0x10] sm:$0xff]  }
   0x4   :  { %v591_v3 = vld [vmem:[%s781_s1 + $0x80] sm:$0xff]   ;;  %533 = vmatpush3.bf16.msra.mxu0 %v590_v2  ;;  %v595_v7 = vld [vmem:[%s781_s1 + $0x88] sm:$0xff]   ;;  %v599_v11 = vld [vmem:[%s781_s1 + $0x90] sm:$0xff]  }
   0x5   :  { %561 = vmatpush3.bf16.msra.mxu1 %v591_v3  ;;  %534 = vmatprep.subr.bf16.mxu0 %v592_v4  ;;  %v600_v12 = vld [vmem:[%s781_s1 + $0x58] sm:$0xff]   ;;  %v604_v16 = vld [vmem:[%s781_s1 + $0x60] sm:$0xff]   ;;  %v608_v20 = vld [vmem:[%s781_s1 + $0x68] sm:$0xff]  }
   0x6   :  { %562 = vmatprep.subr.bf16.mxu1 %v593_v5  ;;  %v601_v13 = vld [vmem:[%s781_s1 + $0xd8] sm:$0xff]   ;;  %v605_v17 = vld [vmem:[%s781_s1 + $0xe0] sm:$0xff]   ;;  %v609_v21 = vld [vmem:[%s781_s1 + $0xe8] sm:$0xff]  }
   0x7   :  { %v602_v14 = vld [vmem:[%s781_s1 + $0x18] sm:$0xff]   ;;  %v606_v18 = vld [vmem:[%s781_s1 + $0x20] sm:$0xff]   ;;  %v610_v22 = vld [vmem:[%s781_s1 + $0x28] sm:$0xff]  }
   0x8   :  { %535 = vmatpush3.bf16.msra.mxu0 %v594_v6  ;;  %v603_v15 = vld [vmem:[%s781_s1 + $0x98] sm:$0xff]   ;;  %v607_v19 = vld [vmem:[%s781_s1 + $0xa0] sm:$0xff]   ;;  %v611_v23 = vld [vmem:[%s781_s1 + $0xa8] sm:$0xff]  }
   0x9   :  { %563 = vmatpush3.bf16.msra.mxu1 %v595_v7  ;;  %536 = vmatprep.subr.bf16.mxu0 %v596_v8  ;;  %v612_v24 = vld [vmem:[%s781_s1 + $0x70] sm:$0xff]   ;;  %v616_v28 = vld [vmem:[%s781_s1 + $0x78] sm:$0xff]  }
   0xa   :  { %564 = vmatprep.subr.bf16.mxu1 %v597_v9  ;;  %v613_v25 = vld [vmem:[%s781_s1 + $0xf0] sm:$0xff]   ;;  %v617_v29 = vld [vmem:[%s781_s1 + $0xf8] sm:$0xff]  }
   0xb   :  { %v614_v26 = vld [vmem:[%s781_s1 + $0x30] sm:$0xff]   ;;  %v618_v30 = vld [vmem:[%s781_s1 + $0x38] sm:$0xff]  }
   0xc   :  { %537 = vmatpush3.bf16.msra.mxu0 %v598_v10  ;;  %v615_v27 = vld [vmem:[%s781_s1 + $0xb0] sm:$0xff]   ;;  %v619_v31 = vld [vmem:[%s781_s1 + $0xb8] sm:$0xff]  }
   0xd   :  { %565 = vmatpush3.bf16.msra.mxu1 %v599_v11  ;;  %538 = vmatprep.subr.bf16.mxu0 %v600_v12  ;;  %v620_v32 = vld [vmem:[%s782_s0] ss:$16 sps:$4 sm:$0xff]   ;;  %v622_v33 = vld [vmem:[%s782_s0 + $0x4] ss:$16 sps:$4 sm:$0xff]   ;;  %v623_v34 = vld [vmem:[%s782_s0 + $0x8] ss:$16 sps:$4 sm:$0xff]  }
   0xe   :  { %566 = vmatprep.subr.bf16.mxu1 %v601_v13  ;;  %v625_v35 = vld [vmem:[%s782_s0 + $0xc] ss:$16 sps:$4 sm:$0xff]   ;;  %350 = vmatprep.mubr.bf16.mxu0 %v622_v33  ;;  %v626_v36 = vld [vmem:[%s782_s0 + $0x24] ss:$16 sps:$4 sm:$0xff]   ;;  %v630_v38 = vld [vmem:[%s782_s0 + $0x20] ss:$16 sps:$4 sm:$0xff]  }
   0xf   :  { %399 = vmatprep.mubr.bf16.mxu1 %v625_v35  ;;  %v628_v37 = vld [vmem:[%s782_s0 + $0x2c] ss:$16 sps:$4 sm:$0xff]   ;;  %v631_v39 = vld [vmem:[%s782_s0 + $0x28] ss:$16 sps:$4 sm:$0xff]  }
  0x10   :  { %539 = vmatpush3.bf16.msra.mxu0 %v602_v14 }
  0x11   :  { %567 = vmatpush3.bf16.msra.mxu1 %v603_v15  ;;  %540 = vmatprep.subr.bf16.mxu0 %v604_v16 }
  0x12   :  { %568 = vmatprep.subr.bf16.mxu1 %v605_v17 }
  0x14   :  { %541 = vmatpush3.bf16.msra.mxu0 %v606_v18 }
  0x15   :  { %569 = vmatpush3.bf16.msra.mxu1 %v607_v19  ;;  %542 = vmatprep.subr.bf16.mxu0 %v608_v20  ;;  %v458_v19 = vlaneseq }
  0x16   :  { %570 = vmatprep.subr.bf16.mxu1 %v609_v21 }
  0x18   :  { %543 = vmatpush3.bf16.msra.mxu0 %v610_v22 }
  0x19   :  { %571 = vmatpush3.bf16.msra.mxu1 %v611_v23  ;;  %544 = vmatprep.subr.bf16.mxu0 %v612_v24  ;;  %v459_v24 = vshrl.u32 %v458_v19, 7 }
  0x1a   :  { %572 = vmatprep.subr.bf16.mxu1 %v613_v25 }
  0x1b   :  { %vm461_vm0 = vcmp.eq.s32.totalorder %v459_v24, 1  ;;  %vm460_vm1 = vcmp.eq.s32.totalorder %v459_v24, 0 }
  0x1c   :  { %545 = vmatpush3.bf16.msra.mxu0 %v614_v26 }
  0x1d   :  { %573 = vmatpush3.bf16.msra.mxu1 %v615_v27  ;;  %546 = vmatprep.subr.bf16.mxu0 %v616_v28 }
  0x1e   :  { %574 = vmatprep.subr.bf16.mxu1 %v617_v29 }
  0x20   :  { %547 = vmatpush3.bf16.msra.mxu0 %v618_v30 }
  0x21   :  { %575 = vmatpush3.bf16.msra.mxu1 %v619_v31 }
  0x23   :  { %351 = vmatmul.mubr.bf16.vlgmr.msra.gmra.mrb[0].mxu0 %v620_v32 }
  0x24   :  { %400 = vmatmul.mubr.bf16.vlgmr.msra.gmra.mrb[0].mxu1 %v623_v34  ;;  %358 = vmatprep.mubr.bf16.mxu0 %v626_v36 }
  0x25   :  { %407 = vmatprep.mubr.bf16.mxu1 %v628_v37 }
  0x2b   :  { %359 = vmatmul.mubr.bf16.gmra.mrb[4].mxu0 %v630_v38 }
  0x2c   :  { %408 = vmatmul.mubr.bf16.gmra.mrb[4].mxu1 %v631_v39 }
  0xf6   :  { %v548_v40 = vpop.f32.mrb[0].mxu0 }
  0xf7   :  { %v576_v41 = vpop.f32.mrb[0].mxu1  ;;  %v549_v42 = vpop.f32.mrb[1].mxu0 }
  0xf8   :  { %v550_v43 = vadd.f32 %v549_v42, %v548_v40  ;;  %v577_v44 = vpop.f32.mrb[1].mxu1  ;;  %v551_v45 = vpop.f32.mrb[2].mxu0 }
  0xf9   :  { %v578_v46 = vadd.f32 %v577_v44, %v576_v41  ;;  %v579_v47 = vpop.f32.mrb[2].mxu1  ;;  %v552_v48 = vpop.f32.mrb[3].mxu0 }
  0xfa   :  { %v553_v49 = vadd.f32 %v552_v48, %v551_v45  ;;  %v580_v50 = vpop.f32.mrb[3].mxu1 }
  0xfb   :  { %v402_v51 = vadd.f32 %v578_v46, %v550_v43  ;;  %v581_v52 = vadd.f32 %v580_v50, %v579_v47 }
  0xfd   :  { %v405_v53 = vadd.f32 %v581_v52, %v553_v49  ;;  %v445_v55 = vmul.f32 %v402_v51, %v402_v51 }
  0xfe   :  { %v554_v54 = vpop.f32.mrb[4].mxu0 }
  0xff   :  { %v524_v56 = vpack.c.bf16 %v405_v53, %v402_v51  ;;  %v436_v57 = vadd.f32 %v405_v53, %v402_v51  ;;  %v446_v58 = vmul.f32 %v405_v53, %v405_v53  ;;  %v582_v59 = vpop.f32.mrb[4].mxu1  ;;  %v555_v60 = vpop.f32.mrb[5].mxu0 }
 0x100   :  { %v556_v61 = vadd.f32 %v555_v60, %v554_v54  ;;  %v583_v62 = vpop.f32.mrb[5].mxu1  ;;  %v557_v63 = vpop.f32.mrb[6].mxu0 }
 0x101   :  { %525 = vst [vmem:[%s783_s2] sm:$0xff] %v524_v56   ;;  %v449_v0 = vadd.f32 %v446_v58, %v445_v55  ;;  %v584_v1 = vadd.f32 %v583_v62, %v582_v59  ;;  %v585_v2 = vpop.f32.mrb[6].mxu1  ;;  %v558_v3 = vpop.f32.mrb[7].mxu0 }
 0x102   :  { %v559_v4 = vadd.f32 %v558_v3, %v557_v63  ;;  %v586_v5 = vpop.f32.mrb[7].mxu1 }
 0x103   :  { %v410_v6 = vadd.f32 %v584_v1, %v556_v61  ;;  %v587_v7 = vadd.f32 %v586_v5, %v585_v2 }
 0x105   :  { %v437_v8 = vadd.f32 %v436_v57, %v410_v6  ;;  %v447_v9 = vmul.f32 %v410_v6, %v410_v6  ;;  %v413_v10 = vadd.f32 %v587_v7, %v559_v4 }
 0x107   :  { %v450_v11 = vadd.f32 %v449_v0, %v447_v9  ;;  %v529_v12 = vpack.c.bf16 %v413_v10, %v410_v6  ;;  %v438_v13 = vadd.f32 %v437_v8, %v413_v10  ;;  %v448_v14 = vmul.f32 %v413_v10, %v413_v10 }
 0x109   :  { %531 = vst [vmem:[%s783_s2 + $0x8] sm:$0xff] %v529_v12   ;;  %v439_v15 = vrot.slane %v438_v13, 4  ;;  %v451_v16 = vadd.f32 %v450_v11, %v448_v14 }
 0x10b   :  { %v440_v17 = vadd.f32 %v439_v15, %v438_v13  ;;  %v452_v18 = vrot.slane %v451_v16, 4 }
 0x10d   :  { %v441_v20 = vrot.slane %v440_v17, 2  ;;  %v453_v21 = vadd.f32 %v452_v18, %v451_v16 }
 0x10f   :  { %v442_v22 = vadd.f32 %v441_v20, %v440_v17  ;;  %v454_v23 = vrot.slane %v453_v21, 2 }
 0x111   :  { %v455_v25 = vadd.f32 %v454_v23, %v453_v21  ;;  %v443_v26 = vrot.slane %v442_v22, 1 }
 0x113   :  { %v456_v27 = vrot.slane %v455_v25, 1  ;;  %v444_v29 = vadd.f32 %v443_v26, %v442_v22 }
 0x115   :  { %v457_v28 = vadd.f32 %v456_v27, %v455_v25 }
 0x117   :  { %v462_v30 = vsel %vm461_vm0, %v457_v28, 0.0 }
 0x118   :  { %v463_v31 = vsel %vm460_vm1, %v444_v29, %v462_v30 }
 0x119   :  { %464 = vst [vmem:[%s784_s3] sm:$0xff] %v463_v31 }

// kernel: discriminator_forward.15
= control target key start
LH: loop header
LB: loop body
LE: loop exit
PB: predicated region body
PF: predicated region fallthrough
CT: control target
= control target key end

     0   :  { %s1186_s1 = inlined_call_operand.vmem [shape: bf16[1024,128], index: 1, kind: input, shape index: {}]   ;;  %s1187_s0 = inlined_call_operand.vmem [shape: bf16[8,1024], index: 0, kind: input, shape index: {}]   ;;  %s1188_s2 = inlined_call_operand.vmem [shape: f32[8,128], index: 2, kind: output, shape index: {}]  }
   0x1   :  { %v888_v0 = vld [vmem:[%s1186_s1 + $0x40] sm:$0xff]   ;;  %v892_v4 = vld [vmem:[%s1186_s1 + $0x48] sm:$0xff]   ;;  %v896_v8 = vld [vmem:[%s1186_s1 + $0x50] sm:$0xff]  }
   0x2   :  { %v889_v1 = vld [vmem:[%s1186_s1 + $0xc0] sm:$0xff]   ;;  %800 = vmatprep.subr.bf16.mxu0 %v888_v0  ;;  %v893_v5 = vld [vmem:[%s1186_s1 + $0xc8] sm:$0xff]   ;;  %v897_v9 = vld [vmem:[%s1186_s1 + $0xd0] sm:$0xff]  }
   0x3   :  { %v890_v2 = vld [vmem:[%s1186_s1] sm:$0xff]   ;;  %822 = vmatprep.subr.bf16.mxu1 %v889_v1  ;;  %v894_v6 = vld [vmem:[%s1186_s1 + $0x8] sm:$0xff]   ;;  %v898_v10 = vld [vmem:[%s1186_s1 + $0x10] sm:$0xff]  }
   0x4   :  { %v891_v3 = vld [vmem:[%s1186_s1 + $0x80] sm:$0xff]   ;;  %801 = vmatpush3.bf16.msra.mxu0 %v890_v2  ;;  %v895_v7 = vld [vmem:[%s1186_s1 + $0x88] sm:$0xff]   ;;  %v899_v11 = vld [vmem:[%s1186_s1 + $0x90] sm:$0xff]  }
   0x5   :  { %823 = vmatpush3.bf16.msra.mxu1 %v891_v3  ;;  %802 = vmatprep.subr.bf16.mxu0 %v892_v4  ;;  %v900_v12 = vld [vmem:[%s1186_s1 + $0x58] sm:$0xff]   ;;  %v904_v16 = vld [vmem:[%s1186_s1 + $0x60] sm:$0xff]   ;;  %v908_v20 = vld [vmem:[%s1186_s1 + $0x68] sm:$0xff]  }
   0x6   :  { %824 = vmatprep.subr.bf16.mxu1 %v893_v5  ;;  %v901_v13 = vld [vmem:[%s1186_s1 + $0xd8] sm:$0xff]   ;;  %v905_v17 = vld [vmem:[%s1186_s1 + $0xe0] sm:$0xff]   ;;  %v909_v21 = vld [vmem:[%s1186_s1 + $0xe8] sm:$0xff]  }
   0x7   :  { %v902_v14 = vld [vmem:[%s1186_s1 + $0x18] sm:$0xff]   ;;  %v906_v18 = vld [vmem:[%s1186_s1 + $0x20] sm:$0xff]   ;;  %v910_v22 = vld [vmem:[%s1186_s1 + $0x28] sm:$0xff]  }
   0x8   :  { %803 = vmatpush3.bf16.msra.mxu0 %v894_v6  ;;  %v903_v15 = vld [vmem:[%s1186_s1 + $0x98] sm:$0xff]   ;;  %v907_v19 = vld [vmem:[%s1186_s1 + $0xa0] sm:$0xff]   ;;  %v911_v23 = vld [vmem:[%s1186_s1 + $0xa8] sm:$0xff]  }
   0x9   :  { %825 = vmatpush3.bf16.msra.mxu1 %v895_v7  ;;  %804 = vmatprep.subr.bf16.mxu0 %v896_v8  ;;  %v912_v24 = vld [vmem:[%s1186_s1 + $0x70] sm:$0xff]   ;;  %v916_v28 = vld [vmem:[%s1186_s1 + $0x78] sm:$0xff]   ;;  %v12_v32 = vld [vmem:[%s1187_s0] sm:$0xff] }
   0xa   :  { %826 = vmatprep.subr.bf16.mxu1 %v897_v9  ;;  %v913_v25 = vld [vmem:[%s1186_s1 + $0xf0] sm:$0xff]   ;;  %v917_v29 = vld [vmem:[%s1186_s1 + $0xf8] sm:$0xff]   ;;  %v13_v33 = vld [vmem:[%s1187_s0 + $0x8] sm:$0xff]  ;;  %v727_v34 = vcombine.low %v12_v32, %v12_v32  ;;  %v728_v35 = vcombine.high %v12_v32, %v12_v32 }
   0xb   :  { %v914_v26 = vld [vmem:[%s1186_s1 + $0x30] sm:$0xff]   ;;  %v918_v30 = vld [vmem:[%s1186_s1 + $0x38] sm:$0xff]   ;;  %v729_v36 = vcombine.low %v13_v33, %v13_v33  ;;  %v730_v37 = vcombine.high %v13_v33, %v13_v33  ;;  %v924_v38 = vld [vmem:[%s1186_s1 + $0x140] sm:$0xff]  }
   0xc   :  { %805 = vmatpush3.bf16.msra.mxu0 %v898_v10  ;;  %v915_v27 = vld [vmem:[%s1186_s1 + $0xb0] sm:$0xff]   ;;  %v919_v31 = vld [vmem:[%s1186_s1 + $0xb8] sm:$0xff]   ;;  %v925_v39 = vld [vmem:[%s1186_s1 + $0x1c0] sm:$0xff]   ;;  %588 = vmatprep.mubr.bf16.mxu0 %v728_v35 }
   0xd   :  { %827 = vmatpush3.bf16.msra.mxu1 %v899_v11  ;;  %806 = vmatprep.subr.bf16.mxu0 %v900_v12  ;;  %v926_v40 = vld [vmem:[%s1186_s1 + $0x100] sm:$0xff]   ;;  %v928_v42 = vld [vmem:[%s1186_s1 + $0x148] sm:$0xff]   ;;  %v932_v46 = vld [vmem:[%s1186_s1 + $0x150] sm:$0xff]  }
   0xe   :  { %828 = vmatprep.subr.bf16.mxu1 %v901_v13  ;;  %628 = vmatprep.mubr.bf16.mxu1 %v730_v37  ;;  %v927_v41 = vld [vmem:[%s1186_s1 + $0x180] sm:$0xff]   ;;  %v929_v43 = vld [vmem:[%s1186_s1 + $0x1c8] sm:$0xff]   ;;  %v933_v47 = vld [vmem:[%s1186_s1 + $0x1d0] sm:$0xff]  }
   0xf   :  { %v930_v44 = vld [vmem:[%s1186_s1 + $0x108] sm:$0xff]   ;;  %v934_v48 = vld [vmem:[%s1186_s1 + $0x110] sm:$0xff]   ;;  %v936_v50 = vld [vmem:[%s1186_s1 + $0x158] sm:$0xff]  }
  0x10   :  { %807 = vmatpush3.bf16.msra.mxu0 %v902_v14  ;;  %v931_v45 = vld [vmem:[%s1186_s1 + $0x188] sm:$0xff]   ;;  %v935_v49 = vld [vmem:[%s1186_s1 + $0x190] sm:$0xff]   ;;  %v937_v51 = vld [vmem:[%s1186_s1 + $0x1d8] sm:$0xff]  }
  0x11   :  { %829 = vmatpush3.bf16.msra.mxu1 %v903_v15  ;;  %808 = vmatprep.subr.bf16.mxu0 %v904_v16  ;;  %v938_v52 = vld [vmem:[%s1186_s1 + $0x118] sm:$0xff]   ;;  %v940_v54 = vld [vmem:[%s1186_s1 + $0x160] sm:$0xff]   ;;  %v944_v58 = vld [vmem:[%s1186_s1 + $0x168] sm:$0xff]  }
  0x12   :  { %830 = vmatprep.subr.bf16.mxu1 %v905_v17  ;;  %v939_v53 = vld [vmem:[%s1186_s1 + $0x198] sm:$0xff]   ;;  %v941_v55 = vld [vmem:[%s1186_s1 + $0x1e0] sm:$0xff]   ;;  %v945_v59 = vld [vmem:[%s1186_s1 + $0x1e8] sm:$0xff]  }
  0x13   :  { %v942_v56 = vld [vmem:[%s1186_s1 + $0x120] sm:$0xff]   ;;  %v946_v60 = vld [vmem:[%s1186_s1 + $0x128] sm:$0xff]   ;;  %v948_v62 = vld [vmem:[%s1186_s1 + $0x170] sm:$0xff]  }
  0x14   :  { %809 = vmatpush3.bf16.msra.mxu0 %v906_v18  ;;  %v943_v57 = vld [vmem:[%s1186_s1 + $0x1a0] sm:$0xff]   ;;  %v947_v61 = vld [vmem:[%s1186_s1 + $0x1a8] sm:$0xff]   ;;  %v949_v63 = vld [vmem:[%s1186_s1 + $0x1f0] sm:$0xff]  }
  0x15   :  { %831 = vmatpush3.bf16.msra.mxu1 %v907_v19  ;;  %810 = vmatprep.subr.bf16.mxu0 %v908_v20  ;;  %v950_v0 = vld [vmem:[%s1186_s1 + $0x130] sm:$0xff]   ;;  %v952_v2 = vld [vmem:[%s1186_s1 + $0x178] sm:$0xff]  }
  0x16   :  { %832 = vmatprep.subr.bf16.mxu1 %v909_v21  ;;  %v951_v1 = vld [vmem:[%s1186_s1 + $0x1b0] sm:$0xff]   ;;  %v953_v3 = vld [vmem:[%s1186_s1 + $0x1f8] sm:$0xff]  }
  0x17   :  { %v954_v4 = vld [vmem:[%s1186_s1 + $0x138] sm:$0xff]   ;;  %v14_v6 = vld [vmem:[%s1187_s0 + $0x10] sm:$0xff] }
  0x18   :  { %811 = vmatpush3.bf16.msra.mxu0 %v910_v22  ;;  %v955_v5 = vld [vmem:[%s1186_s1 + $0x1b8] sm:$0xff]   ;;  %v731_v7 = vcombine.low %v14_v6, %v14_v6  ;;  %v732_v8 = vcombine.high %v14_v6, %v14_v6 }
  0x19   :  { %833 = vmatpush3.bf16.msra.mxu1 %v911_v23  ;;  %812 = vmatprep.subr.bf16.mxu0 %v912_v24  ;;  %v15_v9 = vld [vmem:[%s1187_s0 + $0x18] sm:$0xff] }
  0x1a   :  { %834 = vmatprep.subr.bf16.mxu1 %v913_v25  ;;  %v733_v10 = vcombine.low %v15_v9, %v15_v9  ;;  %v734_v11 = vcombine.high %v15_v9, %v15_v9 }
  0x1c   :  { %813 = vmatpush3.bf16.msra.mxu0 %v914_v26 }
  0x1d   :  { %835 = vmatpush3.bf16.msra.mxu1 %v915_v27  ;;  %814 = vmatprep.subr.bf16.mxu0 %v916_v28 }
  0x1e   :  { %836 = vmatprep.subr.bf16.mxu1 %v917_v29 }
  0x20   :  { %815 = vmatpush3.bf16.msra.mxu0 %v918_v30 }
  0x21   :  { %837 = vmatpush3.bf16.msra.mxu1 %v919_v31  ;;  %844 = vmatprep.subr.bf16.mxu0 %v924_v38 }
  0x22   :  { %866 = vmatprep.subr.bf16.mxu1 %v925_v39 }
  0x23   :  { %589 = vmatmul.mubr.bf16.vlgmr.msra.gmra.mrb[0].mxu0 %v727_v34 }
  0x24   :  { %629 = vmatmul.mubr.bf16.vlgmr.msra.gmra.mrb[0].mxu1 %v729_v36  ;;  %845 = vmatpush3.bf16.msra.mxu0 %v926_v40 }
  0x25   :  { %867 = vmatpush3.bf16.msra.mxu1 %v927_v41  ;;  %846 = vmatprep.subr.bf16.mxu0 %v928_v42 }
  0x26   :  { %868 = vmatprep.subr.bf16.mxu1 %v929_v43  ;;  %668 = vmatprep.mubr.bf16.mxu0 %v732_v8 }
  0x27   :  { %708 = vmatprep.mubr.bf16.mxu1 %v734_v11 }
  0x28   :  { %847 = vmatpush3.bf16.msra.mxu0 %v930_v44 }
  0x29   :  { %869 = vmatpush3.bf16.msra.mxu1 %v931_v45  ;;  %848 = vmatprep.subr.bf16.mxu0 %v932_v46 }
  0x2a   :  { %870 = vmatprep.subr.bf16.mxu1 %v933_v47 }
  0x2c   :  { %849 = vmatpush3.bf16.msra.mxu0 %v934_v48 }
  0x2d   :  { %871 = vmatpush3.bf16.msra.mxu1 %v935_v49  ;;  %850 = vmatprep.subr.bf16.mxu0 %v936_v50 }
  0x2e   :  { %872 = vmatprep.subr.bf16.mxu1 %v937_v51 }
  0x30   :  { %851 = vmatpush3.bf16.msra.mxu0 %v938_v52 }
  0x31   :  { %873 = vmatpush3.bf16.msra.mxu1 %v939_v53  ;;  %852 = vmatprep.subr.bf16.mxu0 %v940_v54 }
  0x32   :  { %874 = vmatprep.subr.bf16.mxu1 %v941_v55 }
  0x34   :  { %853 = vmatpush3.bf16.msra.mxu0 %v942_v56 }
  0x35   :  { %875 = vmatpush3.bf16.msra.mxu1 %v943_v57  ;;  %854 = vmatprep.subr.bf16.mxu0 %v944_v58 }
  0x36   :  { %876 = vmatprep.subr.bf16.mxu1 %v945_v59 }
  0x38   :  { %855 = vmatpush3.bf16.msra.mxu0 %v946_v60 }
  0x39   :  { %877 = vmatpush3.bf16.msra.mxu1 %v947_v61  ;;  %856 = vmatprep.subr.bf16.mxu0 %v948_v62 }
  0x3a   :  { %878 = vmatprep.subr.bf16.mxu1 %v949_v63 }
  0x3c   :  { %857 = vmatpush3.bf16.msra.mxu0 %v950_v0 }
  0x3d   :  { %879 = vmatpush3.bf16.msra.mxu1 %v951_v1  ;;  %858 = vmatprep.subr.bf16.mxu0 %v952_v2 }
  0x3e   :  { %880 = vmatprep.subr.bf16.mxu1 %v953_v3 }
  0x40   :  { %859 = vmatpush3.bf16.msra.mxu0 %v954_v4 }
  0x41   :  { %881 = vmatpush3.bf16.msra.mxu1 %v955_v5 }
  0x43   :  { %669 = vmatmul.mubr.bf16.vlgmr.msra.gmra.mrb[4].mxu0 %v731_v7 }
  0x44   :  { %709 = vmatmul.mubr.bf16.vlgmr.msra.gmra.mrb[4].mxu1 %v733_v10 }
  0xf6   :  { %v816_v12 = vpop.f32.mrb[0].mxu0 }
  0xf7   :  { %v838_v13 = vpop.f32.mrb[0].mxu1  ;;  %v817_v14 = vpop.f32.mrb[1].mxu0 }
  0xf8   :  { %v839_v15 = vpop.f32.mrb[1].mxu1  ;;  %v818_v16 = vadd.f32 %v817_v14, %v816_v12  ;;  %v819_v18 = vpop.f32.mrb[2].mxu0 }
  0xf9   :  { %v840_v17 = vadd.f32 %v839_v15, %v838_v13  ;;  %v841_v19 = vpop.f32.mrb[2].mxu1  ;;  %v820_v20 = vpop.f32.mrb[3].mxu0 }
  0xfa   :  { %v842_v21 = vpop.f32.mrb[3].mxu1 }
  0xfb   :  { %v631_v22 = vadd.f32 %v840_v17, %v818_v16 }
 0x116   :  { %v860_v23 = vpop.f32.mrb[4].mxu0 }
 0x117   :  { %v882_v24 = vpop.f32.mrb[4].mxu1  ;;  %v861_v25 = vpop.f32.mrb[5].mxu0 }
 0x118   :  { %v883_v26 = vpop.f32.mrb[5].mxu1  ;;  %v862_v27 = vadd.f32 %v861_v25, %v860_v23  ;;  %v863_v29 = vpop.f32.mrb[6].mxu0 }
 0x119   :  { %v884_v28 = vadd.f32 %v883_v26, %v882_v24  ;;  %v885_v30 = vpop.f32.mrb[6].mxu1  ;;  %v864_v31 = vpop.f32.mrb[7].mxu0 }
 0x11a   :  { %v886_v32 = vpop.f32.mrb[7].mxu1  ;;  %v671_v33 = vadd.f32 %v862_v27, %v631_v22 }
 0x11c   :  { %v711_v34 = vadd.f32 %v884_v28, %v671_v33 }
 0x11e   :  { %v799_v35 = vmul.f32 -1.442695, %v711_v34 }
 0x120   :  { %960 = vpow2.f32 %v799_v35 }
 0x12a   :  { %v961_v36 = vpop.eup %960 }
 0x12b   :  { %v719_v37 = vadd.f32 1.0, %v961_v36 }
 0x12d   :  { %962 = vrcp.f32 %v719_v37 }
 0x137   :  { %v963_v38 = vpop.eup %962 }
 0x138   :  { %722 = vst [vmem:[%s1188_s2] sm:$0xff] %v963_v38 }

</bundles_post_ra>
